<compile_context>
chip_gen: v7x
topology: tpu7x:2x2x1
jax: 0.10.0
libtpu: 0.0.40
codegen_flags: <defaults>
</compile_context>

<pallas_src>
import functools

import jax
import jax.numpy as jnp
from jax import lax
from jax.experimental import pallas as pl
from jax.experimental.pallas import tpu as pltpu

LANE = 128


def _round_up(x, m):
    return (x + m - 1) // m * m


# ----------------------------- Pallas kernels -----------------------------

def _conv3x3_relu_kernel(x_ref, w_ref, b_ref, o_ref, *, wp):
    """Fused 3x3 'SAME' conv + bias + ReLU for one (batch, row-tile) block.

    x_ref : (1, 1, S, Cin)  zero-padded input slab, (row, col) flattened;
                            S = (th + 2) * wp + 2, wp = W + 2.
    w_ref : (9, Cin, Fp)    conv taps, tap index = kh * 3 + kw.
    b_ref : (1, Fp)         bias (f32).
    o_ref : (1, 1, M, Fp)   M = th * wp flattened outputs; the 2 wrap-around
                            columns per row are junk the wrapper slices off.
    """
    m = o_ref.shape[2]
    fp = o_ref.shape[3]
    acc = jnp.zeros((m, fp), jnp.float32)
    for k in range(9):
        kh, kw = divmod(k, 3)
        lhs = x_ref[0, 0, pl.ds(kh * wp + kw, m), :]          # (M, Cin) bf16
        acc = acc + jnp.dot(lhs, w_ref[k],
                            preferred_element_type=jnp.float32)
    y = jnp.maximum(acc + b_ref[...], 0.0)
    o_ref[0, 0] = y.astype(o_ref.dtype)


def _conv3x3_relu_gap_fc_kernel(x_ref, w_ref, b_ref, wc_ref, bc_ref, pw_ref,
                                o_ref, acc_ref, *, wp, m):
    """conv3x3 + ReLU, fold into a running global-average-pool accumulator,
    and on the last row-tile apply the linear classifier."""
    r = pl.program_id(1)

    @pl.when(r == 0)
    def _init():
        acc_ref[...] = jnp.zeros_like(acc_ref)

    fp = w_ref.shape[2]
    acc = jnp.zeros((m, fp), jnp.float32)
    for k in range(9):
        kh, kw = divmod(k, 3)
        lhs = x_ref[0, 0, pl.ds(kh * wp + kw, m), :]
        acc = acc + jnp.dot(lhs, w_ref[k],
                            preferred_element_type=jnp.float32)
    y = jnp.maximum(acc + b_ref[...], 0.0)                    # (M, Fp) f32
    # pw carries 1/(H*W) on valid columns and 0 on the wrap-around columns,
    # so this is the masked global-average-pool contribution of this tile.
    acc_ref[...] += jnp.sum(y * pw_ref[...], axis=0, keepdims=True)

    @pl.when(r == pl.num_programs(1) - 1)
    def _finalize():
        pooled = acc_ref[...]                                 # (1, Fp) f32
        logits = jnp.dot(pooled, wc_ref[...].astype(jnp.float32),
                         preferred_element_type=jnp.float32) + bc_ref[...]
        o_ref[0] = logits


# --------------------------- pallas_call wrappers --------------------------

def conv3x3_relu(slabs, w9, b, *, th, w):
    n, r, s, cin = slabs.shape
    fp = w9.shape[-1]
    wp = w + 2
    m = th * wp
    flops = 2 * n * r * m * 9 * cin * fp
    bytes_acc = (slabs.size * slabs.dtype.itemsize
                 + w9.size * w9.dtype.itemsize + b.size * 4
                 + n * r * m * fp * 2)
    return pl.pallas_call(
        functools.partial(_conv3x3_relu_kernel, wp=wp),
        out_shape=jax.ShapeDtypeStruct((n, r, m, fp), jnp.bfloat16),
        grid=(n, r),
        in_specs=[
            pl.BlockSpec((1, 1, s, cin), lambda i, j: (i, j, 0, 0)),
            pl.BlockSpec((9, cin, fp), lambda i, j: (0, 0, 0)),
            pl.BlockSpec((1, fp), lambda i, j: (0, 0)),
        ],
        out_specs=pl.BlockSpec((1, 1, m, fp), lambda i, j: (i, j, 0, 0)),
        compiler_params=pltpu.CompilerParams(
            dimension_semantics=("parallel", "parallel")),
        cost_estimate=pl.CostEstimate(flops=flops, transcendentals=0,
                                      bytes_accessed=bytes_acc),
    )(slabs, w9, b)


def conv3x3_relu_gap_fc(slabs, w9, b, wc, bc, pw, *, th, w):
    n, r, s, cin = slabs.shape
    fp = w9.shape[-1]
    ncp = wc.shape[-1]
    wp = w + 2
    m = th * wp
    flops = 2 * n * r * m * 9 * cin * fp + 2 * n * fp * ncp
    bytes_acc = (slabs.size * slabs.dtype.itemsize
                 + w9.size * w9.dtype.itemsize + wc.size * wc.dtype.itemsize
                 + (b.size + bc.size + pw.size) * 4 + n * ncp * 4)
    return pl.pallas_call(
        functools.partial(_conv3x3_relu_gap_fc_kernel, wp=wp, m=m),
        out_shape=jax.ShapeDtypeStruct((n, 1, ncp), jnp.float32),
        grid=(n, r),
        in_specs=[
            pl.BlockSpec((1, 1, s, cin), lambda i, j: (i, j, 0, 0)),
            pl.BlockSpec((9, cin, fp), lambda i, j: (0, 0, 0)),
            pl.BlockSpec((1, fp), lambda i, j: (0, 0)),
            pl.BlockSpec((fp, ncp), lambda i, j: (0, 0)),
            pl.BlockSpec((1, ncp), lambda i, j: (0, 0)),
            pl.BlockSpec((m, 1), lambda i, j: (0, 0)),
        ],
        out_specs=pl.BlockSpec((1, 1, ncp), lambda i, j: (i, 0, 0)),
        scratch_shapes=[pltpu.VMEM((1, fp), jnp.float32)],
        compiler_params=pltpu.CompilerParams(
            dimension_semantics=("parallel", "arbitrary")),
        cost_estimate=pl.CostEstimate(flops=flops, transcendentals=0,
                                      bytes_accessed=bytes_acc),
    )(slabs, w9, b, wc, bc, pw)


# ------------------------------ glue (JAX) --------------------------------

def _make_slabs(x_nhwc, th):
    """Zero-pad spatially by 1, flatten (row, col) and cut overlapping row
    slabs (halo = 2 padded rows + 2 elems) so each grid step is self-contained
    without a 9x im2col expansion in HBM."""
    n, h, w, c = x_nhwc.shape
    wp = w + 2
    r = h // th
    s = (th + 2) * wp + 2
    xp = jnp.pad(x_nhwc, ((0, 0), (1, 1), (1, 1), (0, 0)))
    xf = xp.reshape(n, (h + 2) * wp, c)
    tail = (r - 1) * th * wp + s - (h + 2) * wp
    if tail > 0:
        xf = jnp.pad(xf, ((0, 0), (0, tail), (0, 0)))
    slabs = [xf[:, i * th * wp: i * th * wp + s, :] for i in range(r)]
    return jnp.stack(slabs, axis=1)                          # (N, R, S, C)


def da_network_forward(x_nchw, pp, *, num_classes, tile_h=8):
    """Forward matching DANetwork.forward: classifier(feature_extractor(x))."""
    x = jnp.transpose(x_nchw, (0, 2, 3, 1)).astype(jnp.bfloat16)  # NCHW->NHWC
    n, h, w, _ = x.shape
    th = tile_h if h % tile_h == 0 else h        # row-tile height (sweepable)
    wp = w + 2
    m = th * wp

    # conv1 + ReLU
    s1 = _make_slabs(x, th)
    y1 = conv3x3_relu(s1, pp["w1"], pp["b1"], th=th, w=w)    # (N, R, M, F1p)
    f1p = y1.shape[-1]
    y1 = y1.reshape(n, h, wp, f1p)[:, :, :w, :]              # drop junk cols

    # conv2 + ReLU + global-average-pool + classifier (single fused kernel)
    s2 = _make_slabs(y1, th)
    pw = jnp.tile(jnp.where(jnp.arange(wp) < w, 1.0 / (h * w), 0.0), th)
    pw = pw.reshape(m, 1).astype(jnp.float32)
    logits = conv3x3_relu_gap_fc(s2, pp["w2"], pp["b2"], pp["wc"], pp["bc"],
                                 pw, th=th, w=w)             # (N, 1, NCp)
    return logits[:, 0, :num_classes]


def da_network_reference(x_nchw, params):
    """Pure-JAX f32 reference (lax.conv) for correctness checking."""
    x = jnp.transpose(x_nchw, (0, 2, 3, 1))
    dn = ("NHWC", "HWIO", "NHWC")
    h = lax.conv_general_dilated(x, params["w1"], (1, 1), "SAME",
                                 dimension_numbers=dn) + params["b1"]
    h = jnp.maximum(h, 0.0)
    h = lax.conv_general_dilated(h, params["w2"], (1, 1), "SAME",
                                 dimension_numbers=dn) + params["b2"]
    h = jnp.maximum(h, 0.0)
    pooled = jnp.mean(h, axis=(1, 2))
    return pooled @ params["wc"] + params["bc"]


def init_params(key, in_ch, f1, f2, num_classes):
    k1, k2, k3 = jax.random.split(key, 3)
    s1 = 1.0 / jnp.sqrt(9.0 * in_ch)
    s2 = 1.0 / jnp.sqrt(9.0 * f1)
    s3 = 1.0 / jnp.sqrt(float(f2))
    return {
        "w1": jax.random.normal(k1, (3, 3, in_ch, f1), jnp.float32) * s1,
        "b1": jnp.zeros((f1,), jnp.float32),
        "w2": jax.random.normal(k2, (3, 3, f1, f2), jnp.float32) * s2,
        "b2": jnp.zeros((f2,), jnp.float32),
        "wc": jax.random.normal(k3, (f2, num_classes), jnp.float32) * s3,
        "bc": jnp.zeros((num_classes,), jnp.float32),
    }


def prepare_params(p):
    """Pad feature dims to 128 lanes (zero columns -> exact) and cast the
    matmul operands to bf16; biases stay f32."""
    c, f1 = p["w1"].shape[2], p["w1"].shape[3]
    f2, nc = p["w2"].shape[3], p["wc"].shape[1]
    f1p, f2p, ncp = _round_up(f1, LANE), _round_up(f2, LANE), _round_up(nc, LANE)
    w1 = jnp.pad(p["w1"], ((0, 0), (0, 0), (0, 0), (0, f1p - f1)))
    w2 = jnp.pad(p["w2"], ((0, 0), (0, 0), (0, f1p - f1), (0, f2p - f2)))
    wc = jnp.pad(p["wc"], ((0, f2p - f2), (0, ncp - nc)))
    return {
        "w1": w1.reshape(9, c, f1p).astype(jnp.bfloat16),
        "b1": jnp.pad(p["b1"], (0, f1p - f1)).reshape(1, f1p).astype(jnp.float32),
        "w2": w2.reshape(9, f1p, f2p).astype(jnp.bfloat16),
        "b2": jnp.pad(p["b2"], (0, f2p - f2)).reshape(1, f2p).astype(jnp.float32),
        "wc": wc.astype(jnp.bfloat16),
        "bc": jnp.pad(p["bc"], (0, ncp - nc)).reshape(1, ncp).astype(jnp.float32),
    }


if __name__ == "__main__":
    key = jax.random.PRNGKey(0)
    kx, kp = jax.random.split(key)

    N, C, H, W = 2, 4, 16, 16
    F1, F2, NUM_CLASSES = 16, 32, 8

    x = jax.random.normal(kx, (N, C, H, W), jnp.float32)   # NCHW, like PyTorch
    params = init_params(kp, C, F1, F2, NUM_CLASSES)
    pp = prepare_params(params)

    fwd = jax.jit(functools.partial(da_network_forward, num_classes=NUM_CLASSES))
    logits = fwd(x, pp)
    jax.block_until_ready(logits)

    ref = da_network_reference(x, params)
    assert logits.shape == (N, NUM_CLASSES)
    # bf16 operands -> loose tolerance vs the f32 reference
    max_err = float(jnp.max(jnp.abs(logits - ref)))
    assert jnp.allclose(logits, ref, atol=1e-1, rtol=1e-1), \
        f"mismatch vs reference (max abs err {max_err})"

    print("KERNEL_OK")
</pallas_src>

<mosaic_0001>
module attributes {stable_mosaic.version = 11 : i64} {
  func.func @_conv3x3_relu_kernel(%arg0: i32, %arg1: i32, %arg2: memref<1x1x182x4xbf16, #tpu.memory_space<vmem>>, %arg3: memref<9x4x128xbf16, #tpu.memory_space<vmem>>, %arg4: memref<1x128xf32, #tpu.memory_space<vmem>>, %arg5: memref<1x1x144x128xbf16, #tpu.memory_space<vmem>>) attributes {dimension_semantics = [#tpu.dimension_semantics<parallel>, #tpu.dimension_semantics<parallel>], iteration_bounds = array<i64: 2, 2>, scalar_prefetch = 0 : i64, scratch_operands = 0 : i64, tpu.core_type = #tpu.core_type<tc>, window_params = [{transform_indices = @transform_0, window_bounds = array<i64: 1, 1, 182, 4>}, {pipeline_mode = #tpu.pipeline_mode<synchronous>, transform_indices = @transform_1, window_bounds = array<i64: 9, 4, 128>}, {pipeline_mode = #tpu.pipeline_mode<synchronous>, transform_indices = @transform_2, window_bounds = array<i64: 1, 128>}, {transform_indices = @transform_3, window_bounds = array<i64: 1, 1, 144, 128>}]} {
    %cst = arith.constant 0.000000e+00 : f32
    %0 = vector.broadcast %cst : f32 to vector<144x128xf32>
    %c0 = arith.constant 0 : index
    %c0_0 = arith.constant 0 : index
    %c0_1 = arith.constant 0 : index
    %c0_2 = arith.constant 0 : index
    %1 = vector.load %arg2[%c0, %c0_0, %c0_1, %c0_2] : memref<1x1x182x4xbf16, #tpu.memory_space<vmem>>, vector<1x1x144x4xbf16>
    %2 = vector.shape_cast %1 : vector<1x1x144x4xbf16> to vector<144x4xbf16>
    %c0_3 = arith.constant 0 : index
    %c0_4 = arith.constant 0 : index
    %c0_5 = arith.constant 0 : index
    %3 = vector.load %arg3[%c0_3, %c0_4, %c0_5] : memref<9x4x128xbf16, #tpu.memory_space<vmem>>, vector<1x4x128xbf16>
    %4 = vector.shape_cast %3 : vector<1x4x128xbf16> to vector<4x128xbf16>
    %cst_6 = arith.constant dense<0.000000e+00> : vector<144x128xf32>
    %5 = tpu.matmul %2, %4, %cst_6 {dimension_numbers = #tpu.dot_dimension_numbers<[1], [0], [0], [1], [0, 0, 1, 1], [], []>} : vector<144x4xbf16>, vector<4x128xbf16>, vector<144x128xf32> -> vector<144x128xf32>
    %6 = arith.addf %0, %5 : vector<144x128xf32>
    %c0_7 = arith.constant 0 : index
    %c0_8 = arith.constant 0 : index
    %c1 = arith.constant 1 : index
    %c0_9 = arith.constant 0 : index
    %7 = vector.load %arg2[%c0_7, %c0_8, %c1, %c0_9] : memref<1x1x182x4xbf16, #tpu.memory_space<vmem>>, vector<1x1x144x4xbf16>
    %8 = vector.shape_cast %7 : vector<1x1x144x4xbf16> to vector<144x4xbf16>
    %c1_10 = arith.constant 1 : index
    %c0_11 = arith.constant 0 : index
    %c0_12 = arith.constant 0 : index
    %9 = vector.load %arg3[%c1_10, %c0_11, %c0_12] : memref<9x4x128xbf16, #tpu.memory_space<vmem>>, vector<1x4x128xbf16>
    %10 = vector.shape_cast %9 : vector<1x4x128xbf16> to vector<4x128xbf16>
    %cst_13 = arith.constant dense<0.000000e+00> : vector<144x128xf32>
    %11 = tpu.matmul %8, %10, %cst_13 {dimension_numbers = #tpu.dot_dimension_numbers<[1], [0], [0], [1], [0, 0, 1, 1], [], []>} : vector<144x4xbf16>, vector<4x128xbf16>, vector<144x128xf32> -> vector<144x128xf32>
    %12 = arith.addf %6, %11 : vector<144x128xf32>
    %c0_14 = arith.constant 0 : index
    %c0_15 = arith.constant 0 : index
    %c2 = arith.constant 2 : index
    %c0_16 = arith.constant 0 : index
    %13 = vector.load %arg2[%c0_14, %c0_15, %c2, %c0_16] : memref<1x1x182x4xbf16, #tpu.memory_space<vmem>>, vector<1x1x144x4xbf16>
    %14 = vector.shape_cast %13 : vector<1x1x144x4xbf16> to vector<144x4xbf16>
    %c2_17 = arith.constant 2 : index
    %c0_18 = arith.constant 0 : index
    %c0_19 = arith.constant 0 : index
    %15 = vector.load %arg3[%c2_17, %c0_18, %c0_19] : memref<9x4x128xbf16, #tpu.memory_space<vmem>>, vector<1x4x128xbf16>
    %16 = vector.shape_cast %15 : vector<1x4x128xbf16> to vector<4x128xbf16>
    %cst_20 = arith.constant dense<0.000000e+00> : vector<144x128xf32>
    %17 = tpu.matmul %14, %16, %cst_20 {dimension_numbers = #tpu.dot_dimension_numbers<[1], [0], [0], [1], [0, 0, 1, 1], [], []>} : vector<144x4xbf16>, vector<4x128xbf16>, vector<144x128xf32> -> vector<144x128xf32>
    %18 = arith.addf %12, %17 : vector<144x128xf32>
    %c0_21 = arith.constant 0 : index
    %c0_22 = arith.constant 0 : index
    %c18 = arith.constant 18 : index
    %c0_23 = arith.constant 0 : index
    %19 = vector.load %arg2[%c0_21, %c0_22, %c18, %c0_23] : memref<1x1x182x4xbf16, #tpu.memory_space<vmem>>, vector<1x1x144x4xbf16>
    %20 = vector.shape_cast %19 : vector<1x1x144x4xbf16> to vector<144x4xbf16>
    %c3 = arith.constant 3 : index
    %c0_24 = arith.constant 0 : index
    %c0_25 = arith.constant 0 : index
    %21 = vector.load %arg3[%c3, %c0_24, %c0_25] : memref<9x4x128xbf16, #tpu.memory_space<vmem>>, vector<1x4x128xbf16>
    %22 = vector.shape_cast %21 : vector<1x4x128xbf16> to vector<4x128xbf16>
    %cst_26 = arith.constant dense<0.000000e+00> : vector<144x128xf32>
    %23 = tpu.matmul %20, %22, %cst_26 {dimension_numbers = #tpu.dot_dimension_numbers<[1], [0], [0], [1], [0, 0, 1, 1], [], []>} : vector<144x4xbf16>, vector<4x128xbf16>, vector<144x128xf32> -> vector<144x128xf32>
    %24 = arith.addf %18, %23 : vector<144x128xf32>
    %c0_27 = arith.constant 0 : index
    %c0_28 = arith.constant 0 : index
    %c19 = arith.constant 19 : index
    %c0_29 = arith.constant 0 : index
    %25 = vector.load %arg2[%c0_27, %c0_28, %c19, %c0_29] : memref<1x1x182x4xbf16, #tpu.memory_space<vmem>>, vector<1x1x144x4xbf16>
    %26 = vector.shape_cast %25 : vector<1x1x144x4xbf16> to vector<144x4xbf16>
    %c4 = arith.constant 4 : index
    %c0_30 = arith.constant 0 : index
    %c0_31 = arith.constant 0 : index
    %27 = vector.load %arg3[%c4, %c0_30, %c0_31] : memref<9x4x128xbf16, #tpu.memory_space<vmem>>, vector<1x4x128xbf16>
    %28 = vector.shape_cast %27 : vector<1x4x128xbf16> to vector<4x128xbf16>
    %cst_32 = arith.constant dense<0.000000e+00> : vector<144x128xf32>
    %29 = tpu.matmul %26, %28, %cst_32 {dimension_numbers = #tpu.dot_dimension_numbers<[1], [0], [0], [1], [0, 0, 1, 1], [], []>} : vector<144x4xbf16>, vector<4x128xbf16>, vector<144x128xf32> -> vector<144x128xf32>
    %30 = arith.addf %24, %29 : vector<144x128xf32>
    %c0_33 = arith.constant 0 : index
    %c0_34 = arith.constant 0 : index
    %c20 = arith.constant 20 : index
    %c0_35 = arith.constant 0 : index
    %31 = vector.load %arg2[%c0_33, %c0_34, %c20, %c0_35] : memref<1x1x182x4xbf16, #tpu.memory_space<vmem>>, vector<1x1x144x4xbf16>
    %32 = vector.shape_cast %31 : vector<1x1x144x4xbf16> to vector<144x4xbf16>
    %c5 = arith.constant 5 : index
    %c0_36 = arith.constant 0 : index
    %c0_37 = arith.constant 0 : index
    %33 = vector.load %arg3[%c5, %c0_36, %c0_37] : memref<9x4x128xbf16, #tpu.memory_space<vmem>>, vector<1x4x128xbf16>
    %34 = vector.shape_cast %33 : vector<1x4x128xbf16> to vector<4x128xbf16>
    %cst_38 = arith.constant dense<0.000000e+00> : vector<144x128xf32>
    %35 = tpu.matmul %32, %34, %cst_38 {dimension_numbers = #tpu.dot_dimension_numbers<[1], [0], [0], [1], [0, 0, 1, 1], [], []>} : vector<144x4xbf16>, vector<4x128xbf16>, vector<144x128xf32> -> vector<144x128xf32>
    %36 = arith.addf %30, %35 : vector<144x128xf32>
    %c0_39 = arith.constant 0 : index
    %c0_40 = arith.constant 0 : index
    %c36 = arith.constant 36 : index
    %c0_41 = arith.constant 0 : index
    %37 = vector.load %arg2[%c0_39, %c0_40, %c36, %c0_41] : memref<1x1x182x4xbf16, #tpu.memory_space<vmem>>, vector<1x1x144x4xbf16>
    %38 = vector.shape_cast %37 : vector<1x1x144x4xbf16> to vector<144x4xbf16>
    %c6 = arith.constant 6 : index
    %c0_42 = arith.constant 0 : index
    %c0_43 = arith.constant 0 : index
    %39 = vector.load %arg3[%c6, %c0_42, %c0_43] : memref<9x4x128xbf16, #tpu.memory_space<vmem>>, vector<1x4x128xbf16>
    %40 = vector.shape_cast %39 : vector<1x4x128xbf16> to vector<4x128xbf16>
    %cst_44 = arith.constant dense<0.000000e+00> : vector<144x128xf32>
    %41 = tpu.matmul %38, %40, %cst_44 {dimension_numbers = #tpu.dot_dimension_numbers<[1], [0], [0], [1], [0, 0, 1, 1], [], []>} : vector<144x4xbf16>, vector<4x128xbf16>, vector<144x128xf32> -> vector<144x128xf32>
    %42 = arith.addf %36, %41 : vector<144x128xf32>
    %c0_45 = arith.constant 0 : index
    %c0_46 = arith.constant 0 : index
    %c37 = arith.constant 37 : index
    %c0_47 = arith.constant 0 : index
    %43 = vector.load %arg2[%c0_45, %c0_46, %c37, %c0_47] : memref<1x1x182x4xbf16, #tpu.memory_space<vmem>>, vector<1x1x144x4xbf16>
    %44 = vector.shape_cast %43 : vector<1x1x144x4xbf16> to vector<144x4xbf16>
    %c7 = arith.constant 7 : index
    %c0_48 = arith.constant 0 : index
    %c0_49 = arith.constant 0 : index
    %45 = vector.load %arg3[%c7, %c0_48, %c0_49] : memref<9x4x128xbf16, #tpu.memory_space<vmem>>, vector<1x4x128xbf16>
    %46 = vector.shape_cast %45 : vector<1x4x128xbf16> to vector<4x128xbf16>
    %cst_50 = arith.constant dense<0.000000e+00> : vector<144x128xf32>
    %47 = tpu.matmul %44, %46, %cst_50 {dimension_numbers = #tpu.dot_dimension_numbers<[1], [0], [0], [1], [0, 0, 1, 1], [], []>} : vector<144x4xbf16>, vector<4x128xbf16>, vector<144x128xf32> -> vector<144x128xf32>
    %48 = arith.addf %42, %47 : vector<144x128xf32>
    %c0_51 = arith.constant 0 : index
    %c0_52 = arith.constant 0 : index
    %c38 = arith.constant 38 : index
    %c0_53 = arith.constant 0 : index
    %49 = vector.load %arg2[%c0_51, %c0_52, %c38, %c0_53] : memref<1x1x182x4xbf16, #tpu.memory_space<vmem>>, vector<1x1x144x4xbf16>
    %50 = vector.shape_cast %49 : vector<1x1x144x4xbf16> to vector<144x4xbf16>
    %c8 = arith.constant 8 : index
    %c0_54 = arith.constant 0 : index
    %c0_55 = arith.constant 0 : index
    %51 = vector.load %arg3[%c8, %c0_54, %c0_55] : memref<9x4x128xbf16, #tpu.memory_space<vmem>>, vector<1x4x128xbf16>
    %52 = vector.shape_cast %51 : vector<1x4x128xbf16> to vector<4x128xbf16>
    %cst_56 = arith.constant dense<0.000000e+00> : vector<144x128xf32>
    %53 = tpu.matmul %50, %52, %cst_56 {dimension_numbers = #tpu.dot_dimension_numbers<[1], [0], [0], [1], [0, 0, 1, 1], [], []>} : vector<144x4xbf16>, vector<4x128xbf16>, vector<144x128xf32> -> vector<144x128xf32>
    %54 = arith.addf %48, %53 : vector<144x128xf32>
    %c0_57 = arith.constant 0 : index
    %c0_58 = arith.constant 0 : index
    %55 = vector.load %arg4[%c0_57, %c0_58] : memref<1x128xf32, #tpu.memory_space<vmem>>, vector<1x128xf32>
    %56 = vector.broadcast %55 : vector<1x128xf32> to vector<144x128xf32>
    %57 = arith.addf %54, %56 : vector<144x128xf32>
    %cst_59 = arith.constant 0.000000e+00 : f32
    %58 = vector.broadcast %cst_59 : f32 to vector<144x128xf32>
    %59 = arith.maximumf %57, %58 : vector<144x128xf32>
    %60 = arith.truncf %59 : vector<144x128xf32> to vector<144x128xbf16>
    %c0_60 = arith.constant 0 : index
    %c0_61 = arith.constant 0 : index
    %c0_62 = arith.constant 0 : index
    %c0_63 = arith.constant 0 : index
    %61 = vector.load %arg5[%c0_60, %c0_61, %c0_62, %c0_63] : memref<1x1x144x128xbf16, #tpu.memory_space<vmem>>, vector<1x1x144x128xbf16>
    %62 = vector.shape_cast %61 : vector<1x1x144x128xbf16> to vector<144x128xbf16>
    %63 = vector.shape_cast %60 : vector<144x128xbf16> to vector<1x1x144x128xbf16>
    tpu.vector_store %arg5[%c0_60, %c0_61, %c0_62, %c0_63], %63 {strides = array<i32>} : memref<1x1x144x128xbf16, #tpu.memory_space<vmem>>, vector<1x1x144x128xbf16>,
    return
  }
  func.func @transform_0(%arg0: i32, %arg1: i32) -> (i32, i32, i32, i32) {
    %c0_i32 = arith.constant 0 : i32
    %c0_i32_0 = arith.constant 0 : i32
    %c0_i32_1 = arith.constant 0 : i32
    return %arg0, %arg1, %c0_i32, %c0_i32_0 : i32, i32, i32, i32
  }
  func.func @transform_1(%arg0: i32, %arg1: i32) -> (i32, i32, i32) {
    %c0_i32 = arith.constant 0 : i32
    %c0_i32_0 = arith.constant 0 : i32
    %c0_i32_1 = arith.constant 0 : i32
    %c0_i32_2 = arith.constant 0 : i32
    return %c0_i32, %c0_i32_0, %c0_i32_1 : i32, i32, i32
  }
  func.func @transform_2(%arg0: i32, %arg1: i32) -> (i32, i32) {
    %c0_i32 = arith.constant 0 : i32
    %c0_i32_0 = arith.constant 0 : i32
    %c0_i32_1 = arith.constant 0 : i32
    return %c0_i32, %c0_i32_0 : i32, i32
  }
  func.func @transform_3(%arg0: i32, %arg1: i32) -> (i32, i32, i32, i32) {
    %c0_i32 = arith.constant 0 : i32
    %c0_i32_0 = arith.constant 0 : i32
    %c0_i32_1 = arith.constant 0 : i32
    return %arg0, %arg1, %c0_i32, %c0_i32_0 : i32, i32, i32, i32
  }
}

module attributes {stable_mosaic.version = 11 : i64} {
  func.func @_conv3x3_relu_gap_fc_kernel(%arg0: i32, %arg1: i32, %arg2: memref<1x1x182x128xbf16, #tpu.memory_space<vmem>>, %arg3: memref<9x128x128xbf16, #tpu.memory_space<vmem>>, %arg4: memref<1x128xf32, #tpu.memory_space<vmem>>, %arg5: memref<128x128xbf16, #tpu.memory_space<vmem>>, %arg6: memref<1x128xf32, #tpu.memory_space<vmem>>, %arg7: memref<144x1xf32, #tpu.memory_space<vmem>>, %arg8: memref<1x1x128xf32, #tpu.memory_space<vmem>>, %arg9: memref<1x128xf32, #tpu.memory_space<vmem>>) attributes {dimension_semantics = [#tpu.dimension_semantics<parallel>, #tpu.dimension_semantics<arbitrary>], iteration_bounds = array<i64: 2, 2>, scalar_prefetch = 0 : i64, scratch_operands = 1 : i64, tpu.core_type = #tpu.core_type<tc>, window_params = [{transform_indices = @transform_0, window_bounds = array<i64: 1, 1, 182, 128>}, {pipeline_mode = #tpu.pipeline_mode<synchronous>, transform_indices = @transform_1, window_bounds = array<i64: 9, 128, 128>}, {pipeline_mode = #tpu.pipeline_mode<synchronous>, transform_indices = @transform_2, window_bounds = array<i64: 1, 128>}, {pipeline_mode = #tpu.pipeline_mode<synchronous>, transform_indices = @transform_3, window_bounds = array<i64: 128, 128>}, {pipeline_mode = #tpu.pipeline_mode<synchronous>, transform_indices = @transform_4, window_bounds = array<i64: 1, 128>}, {pipeline_mode = #tpu.pipeline_mode<synchronous>, transform_indices = @transform_5, window_bounds = array<i64: 144, 1>}, {transform_indices = @transform_6, window_bounds = array<i64: 1, 1, 128>}]} {
    %c0_i32 = arith.constant 0 : i32
    %0 = arith.cmpi eq, %arg1, %c0_i32 : i32
    %1 = arith.extui %0 : i1 to i32
    %c0_i32_0 = arith.constant 0 : i32
    %2 = arith.cmpi ne, %1, %c0_i32_0 : i32
    scf.if %2 {
      %cst_69 = arith.constant 0.000000e+00 : f32
      %74 = vector.broadcast %cst_69 : f32 to vector<1x128xf32>
      %c0_70 = arith.constant 0 : index
      %c0_71 = arith.constant 0 : index
      %75 = vector.load %arg9[%c0_70, %c0_71] : memref<1x128xf32, #tpu.memory_space<vmem>>, vector<1x128xf32>
      tpu.vector_store %arg9[%c0_70, %c0_71], %74 {strides = array<i32>} : memref<1x128xf32, #tpu.memory_space<vmem>>, vector<1x128xf32>,
    } else {
    }
    %cst = arith.constant 0.000000e+00 : f32
    %3 = vector.broadcast %cst : f32 to vector<144x128xf32>
    %c0 = arith.constant 0 : index
    %c0_1 = arith.constant 0 : index
    %c0_2 = arith.constant 0 : index
    %c0_3 = arith.constant 0 : index
    %4 = vector.load %arg2[%c0, %c0_1, %c0_2, %c0_3] : memref<1x1x182x128xbf16, #tpu.memory_space<vmem>>, vector<1x1x144x128xbf16>
    %5 = vector.shape_cast %4 : vector<1x1x144x128xbf16> to vector<144x128xbf16>
    %c0_4 = arith.constant 0 : index
    %c0_5 = arith.constant 0 : index
    %c0_6 = arith.constant 0 : index
    %6 = vector.load %arg3[%c0_4, %c0_5, %c0_6] : memref<9x128x128xbf16, #tpu.memory_space<vmem>>, vector<1x128x128xbf16>
    %7 = vector.shape_cast %6 : vector<1x128x128xbf16> to vector<128x128xbf16>
    %cst_7 = arith.constant dense<0.000000e+00> : vector<144x128xf32>
    %8 = tpu.matmul %5, %7, %cst_7 {dimension_numbers = #tpu.dot_dimension_numbers<[1], [0], [0], [1], [0, 0, 1, 1], [], []>} : vector<144x128xbf16>, vector<128x128xbf16>, vector<144x128xf32> -> vector<144x128xf32>
    %9 = arith.addf %3, %8 : vector<144x128xf32>
    %c0_8 = arith.constant 0 : index
    %c0_9 = arith.constant 0 : index
    %c1 = arith.constant 1 : index
    %c0_10 = arith.constant 0 : index
    %10 = vector.load %arg2[%c0_8, %c0_9, %c1, %c0_10] : memref<1x1x182x128xbf16, #tpu.memory_space<vmem>>, vector<1x1x144x128xbf16>
    %11 = vector.shape_cast %10 : vector<1x1x144x128xbf16> to vector<144x128xbf16>
    %c1_11 = arith.constant 1 : index
    %c0_12 = arith.constant 0 : index
    %c0_13 = arith.constant 0 : index
    %12 = vector.load %arg3[%c1_11, %c0_12, %c0_13] : memref<9x128x128xbf16, #tpu.memory_space<vmem>>, vector<1x128x128xbf16>
    %13 = vector.shape_cast %12 : vector<1x128x128xbf16> to vector<128x128xbf16>
    %cst_14 = arith.constant dense<0.000000e+00> : vector<144x128xf32>
    %14 = tpu.matmul %11, %13, %cst_14 {dimension_numbers = #tpu.dot_dimension_numbers<[1], [0], [0], [1], [0, 0, 1, 1], [], []>} : vector<144x128xbf16>, vector<128x128xbf16>, vector<144x128xf32> -> vector<144x128xf32>
    %15 = arith.addf %9, %14 : vector<144x128xf32>
    %c0_15 = arith.constant 0 : index
    %c0_16 = arith.constant 0 : index
    %c2 = arith.constant 2 : index
    %c0_17 = arith.constant 0 : index
    %16 = vector.load %arg2[%c0_15, %c0_16, %c2, %c0_17] : memref<1x1x182x128xbf16, #tpu.memory_space<vmem>>, vector<1x1x144x128xbf16>
    %17 = vector.shape_cast %16 : vector<1x1x144x128xbf16> to vector<144x128xbf16>
    %c2_18 = arith.constant 2 : index
    %c0_19 = arith.constant 0 : index
    %c0_20 = arith.constant 0 : index
    %18 = vector.load %arg3[%c2_18, %c0_19, %c0_20] : memref<9x128x128xbf16, #tpu.memory_space<vmem>>, vector<1x128x128xbf16>
    %19 = vector.shape_cast %18 : vector<1x128x128xbf16> to vector<128x128xbf16>
    %cst_21 = arith.constant dense<0.000000e+00> : vector<144x128xf32>
    %20 = tpu.matmul %17, %19, %cst_21 {dimension_numbers = #tpu.dot_dimension_numbers<[1], [0], [0], [1], [0, 0, 1, 1], [], []>} : vector<144x128xbf16>, vector<128x128xbf16>, vector<144x128xf32> -> vector<144x128xf32>
    %21 = arith.addf %15, %20 : vector<144x128xf32>
    %c0_22 = arith.constant 0 : index
    %c0_23 = arith.constant 0 : index
    %c18 = arith.constant 18 : index
    %c0_24 = arith.constant 0 : index
    %22 = vector.load %arg2[%c0_22, %c0_23, %c18, %c0_24] : memref<1x1x182x128xbf16, #tpu.memory_space<vmem>>, vector<1x1x144x128xbf16>
    %23 = vector.shape_cast %22 : vector<1x1x144x128xbf16> to vector<144x128xbf16>
    %c3 = arith.constant 3 : index
    %c0_25 = arith.constant 0 : index
    %c0_26 = arith.constant 0 : index
    %24 = vector.load %arg3[%c3, %c0_25, %c0_26] : memref<9x128x128xbf16, #tpu.memory_space<vmem>>, vector<1x128x128xbf16>
    %25 = vector.shape_cast %24 : vector<1x128x128xbf16> to vector<128x128xbf16>
    %cst_27 = arith.constant dense<0.000000e+00> : vector<144x128xf32>
    %26 = tpu.matmul %23, %25, %cst_27 {dimension_numbers = #tpu.dot_dimension_numbers<[1], [0], [0], [1], [0, 0, 1, 1], [], []>} : vector<144x128xbf16>, vector<128x128xbf16>, vector<144x128xf32> -> vector<144x128xf32>
    %27 = arith.addf %21, %26 : vector<144x128xf32>
    %c0_28 = arith.constant 0 : index
    %c0_29 = arith.constant 0 : index
    %c19 = arith.constant 19 : index
    %c0_30 = arith.constant 0 : index
    %28 = vector.load %arg2[%c0_28, %c0_29, %c19, %c0_30] : memref<1x1x182x128xbf16, #tpu.memory_space<vmem>>, vector<1x1x144x128xbf16>
    %29 = vector.shape_cast %28 : vector<1x1x144x128xbf16> to vector<144x128xbf16>
    %c4 = arith.constant 4 : index
    %c0_31 = arith.constant 0 : index
    %c0_32 = arith.constant 0 : index
    %30 = vector.load %arg3[%c4, %c0_31, %c0_32] : memref<9x128x128xbf16, #tpu.memory_space<vmem>>, vector<1x128x128xbf16>
    %31 = vector.shape_cast %30 : vector<1x128x128xbf16> to vector<128x128xbf16>
    %cst_33 = arith.constant dense<0.000000e+00> : vector<144x128xf32>
    %32 = tpu.matmul %29, %31, %cst_33 {dimension_numbers = #tpu.dot_dimension_numbers<[1], [0], [0], [1], [0, 0, 1, 1], [], []>} : vector<144x128xbf16>, vector<128x128xbf16>, vector<144x128xf32> -> vector<144x128xf32>
    %33 = arith.addf %27, %32 : vector<144x128xf32>
    %c0_34 = arith.constant 0 : index
    %c0_35 = arith.constant 0 : index
    %c20 = arith.constant 20 : index
    %c0_36 = arith.constant 0 : index
    %34 = vector.load %arg2[%c0_34, %c0_35, %c20, %c0_36] : memref<1x1x182x128xbf16, #tpu.memory_space<vmem>>, vector<1x1x144x128xbf16>
    %35 = vector.shape_cast %34 : vector<1x1x144x128xbf16> to vector<144x128xbf16>
    %c5 = arith.constant 5 : index
    %c0_37 = arith.constant 0 : index
    %c0_38 = arith.constant 0 : index
    %36 = vector.load %arg3[%c5, %c0_37, %c0_38] : memref<9x128x128xbf16, #tpu.memory_space<vmem>>, vector<1x128x128xbf16>
    %37 = vector.shape_cast %36 : vector<1x128x128xbf16> to vector<128x128xbf16>
    %cst_39 = arith.constant dense<0.000000e+00> : vector<144x128xf32>
    %38 = tpu.matmul %35, %37, %cst_39 {dimension_numbers = #tpu.dot_dimension_numbers<[1], [0], [0], [1], [0, 0, 1, 1], [], []>} : vector<144x128xbf16>, vector<128x128xbf16>, vector<144x128xf32> -> vector<144x128xf32>
    %39 = arith.addf %33, %38 : vector<144x128xf32>
    %c0_40 = arith.constant 0 : index
    %c0_41 = arith.constant 0 : index
    %c36 = arith.constant 36 : index
    %c0_42 = arith.constant 0 : index
    %40 = vector.load %arg2[%c0_40, %c0_41, %c36, %c0_42] : memref<1x1x182x128xbf16, #tpu.memory_space<vmem>>, vector<1x1x144x128xbf16>
    %41 = vector.shape_cast %40 : vector<1x1x144x128xbf16> to vector<144x128xbf16>
    %c6 = arith.constant 6 : index
    %c0_43 = arith.constant 0 : index
    %c0_44 = arith.constant 0 : index
    %42 = vector.load %arg3[%c6, %c0_43, %c0_44] : memref<9x128x128xbf16, #tpu.memory_space<vmem>>, vector<1x128x128xbf16>
    %43 = vector.shape_cast %42 : vector<1x128x128xbf16> to vector<128x128xbf16>
    %cst_45 = arith.constant dense<0.000000e+00> : vector<144x128xf32>
    %44 = tpu.matmul %41, %43, %cst_45 {dimension_numbers = #tpu.dot_dimension_numbers<[1], [0], [0], [1], [0, 0, 1, 1], [], []>} : vector<144x128xbf16>, vector<128x128xbf16>, vector<144x128xf32> -> vector<144x128xf32>
    %45 = arith.addf %39, %44 : vector<144x128xf32>
    %c0_46 = arith.constant 0 : index
    %c0_47 = arith.constant 0 : index
    %c37 = arith.constant 37 : index
    %c0_48 = arith.constant 0 : index
    %46 = vector.load %arg2[%c0_46, %c0_47, %c37, %c0_48] : memref<1x1x182x128xbf16, #tpu.memory_space<vmem>>, vector<1x1x144x128xbf16>
    %47 = vector.shape_cast %46 : vector<1x1x144x128xbf16> to vector<144x128xbf16>
    %c7 = arith.constant 7 : index
    %c0_49 = arith.constant 0 : index
    %c0_50 = arith.constant 0 : index
    %48 = vector.load %arg3[%c7, %c0_49, %c0_50] : memref<9x128x128xbf16, #tpu.memory_space<vmem>>, vector<1x128x128xbf16>
    %49 = vector.shape_cast %48 : vector<1x128x128xbf16> to vector<128x128xbf16>
    %cst_51 = arith.constant dense<0.000000e+00> : vector<144x128xf32>
    %50 = tpu.matmul %47, %49, %cst_51 {dimension_numbers = #tpu.dot_dimension_numbers<[1], [0], [0], [1], [0, 0, 1, 1], [], []>} : vector<144x128xbf16>, vector<128x128xbf16>, vector<144x128xf32> -> vector<144x128xf32>
    %51 = arith.addf %45, %50 : vector<144x128xf32>
    %c0_52 = arith.constant 0 : index
    %c0_53 = arith.constant 0 : index
    %c38 = arith.constant 38 : index
    %c0_54 = arith.constant 0 : index
    %52 = vector.load %arg2[%c0_52, %c0_53, %c38, %c0_54] : memref<1x1x182x128xbf16, #tpu.memory_space<vmem>>, vector<1x1x144x128xbf16>
    %53 = vector.shape_cast %52 : vector<1x1x144x128xbf16> to vector<144x128xbf16>
    %c8 = arith.constant 8 : index
    %c0_55 = arith.constant 0 : index
    %c0_56 = arith.constant 0 : index
    %54 = vector.load %arg3[%c8, %c0_55, %c0_56] : memref<9x128x128xbf16, #tpu.memory_space<vmem>>, vector<1x128x128xbf16>
    %55 = vector.shape_cast %54 : vector<1x128x128xbf16> to vector<128x128xbf16>
    %cst_57 = arith.constant dense<0.000000e+00> : vector<144x128xf32>
    %56 = tpu.matmul %53, %55, %cst_57 {dimension_numbers = #tpu.dot_dimension_numbers<[1], [0], [0], [1], [0, 0, 1, 1], [], []>} : vector<144x128xbf16>, vector<128x128xbf16>, vector<144x128xf32> -> vector<144x128xf32>
    %57 = arith.addf %51, %56 : vector<144x128xf32>
    %c0_58 = arith.constant 0 : index
    %c0_59 = arith.constant 0 : index
    %58 = vector.load %arg4[%c0_58, %c0_59] : memref<1x128xf32, #tpu.memory_space<vmem>>, vector<1x128xf32>
    %59 = vector.broadcast %58 : vector<1x128xf32> to vector<144x128xf32>
    %60 = arith.addf %57, %59 : vector<144x128xf32>
    %cst_60 = arith.constant 0.000000e+00 : f32
    %61 = vector.broadcast %cst_60 : f32 to vector<144x128xf32>
    %62 = arith.maximumf %60, %61 : vector<144x128xf32>
    %c0_61 = arith.constant 0 : index
    %c0_62 = arith.constant 0 : index
    %63 = vector.load %arg9[%c0_61, %c0_62] : memref<1x128xf32, #tpu.memory_space<vmem>>, vector<1x128xf32>
    %c0_63 = arith.constant 0 : index
    %c0_64 = arith.constant 0 : index
    %64 = vector.load %arg7[%c0_63, %c0_64] : memref<144x1xf32, #tpu.memory_space<vmem>>, vector<144x1xf32>
    %65 = vector.broadcast %64 : vector<144x1xf32> to vector<144x128xf32>
    %66 = arith.mulf %62, %65 : vector<144x128xf32>
    %cst_65 = arith.constant dense<0.000000e+00> : vector<128xf32>
    %67 = vector.multi_reduction <add>, %66, %cst_65 [0] : vector<144x128xf32> to vector<128xf32>
    %68 = vector.shape_cast %67 : vector<128xf32> to vector<1x128xf32>
    %69 = arith.addf %63, %68 : vector<1x128xf32>
    %c0_66 = arith.constant 0 : index
    %c0_67 = arith.constant 0 : index
    %70 = vector.load %arg9[%c0_66, %c0_67] : memref<1x128xf32, #tpu.memory_space<vmem>>, vector<1x128xf32>
    tpu.vector_store %arg9[%c0_66, %c0_67], %69 {strides = array<i32>} : memref<1x128xf32, #tpu.memory_space<vmem>>, vector<1x128xf32>,
    %c1_i32 = arith.constant 1 : i32
    %71 = arith.cmpi eq, %arg1, %c1_i32 : i32
    %72 = arith.extui %71 : i1 to i32
    %c0_i32_68 = arith.constant 0 : i32
    %73 = arith.cmpi ne, %72, %c0_i32_68 : i32
    scf.if %73 {
      %c0_69 = arith.constant 0 : index
      %c0_70 = arith.constant 0 : index
      %74 = vector.load %arg9[%c0_69, %c0_70] : memref<1x128xf32, #tpu.memory_space<vmem>>, vector<1x128xf32>
      %c0_71 = arith.constant 0 : index
      %c0_72 = arith.constant 0 : index
      %75 = vector.load %arg5[%c0_71, %c0_72] : memref<128x128xbf16, #tpu.memory_space<vmem>>, vector<128x128xbf16>
      %76 = arith.extf %75 : vector<128x128xbf16> to vector<128x128xf32>
      %cst_73 = arith.constant dense<0.000000e+00> : vector<1x128xf32>
      %77 = tpu.matmul %74, %76, %cst_73 {dimension_numbers = #tpu.dot_dimension_numbers<[1], [0], [0], [1], [0, 0, 1, 1], [], []>} : vector<1x128xf32>, vector<128x128xf32>, vector<1x128xf32> -> vector<1x128xf32>
      %c0_74 = arith.constant 0 : index
      %c0_75 = arith.constant 0 : index
      %78 = vector.load %arg6[%c0_74, %c0_75] : memref<1x128xf32, #tpu.memory_space<vmem>>, vector<1x128xf32>
      %79 = arith.addf %77, %78 : vector<1x128xf32>
      %c0_76 = arith.constant 0 : index
      %c0_77 = arith.constant 0 : index
      %c0_78 = arith.constant 0 : index
      %80 = vector.load %arg8[%c0_76, %c0_77, %c0_78] : memref<1x1x128xf32, #tpu.memory_space<vmem>>, vector<1x1x128xf32>
      %81 = vector.shape_cast %80 : vector<1x1x128xf32> to vector<1x128xf32>
      %82 = vector.shape_cast %79 : vector<1x128xf32> to vector<1x1x128xf32>
      tpu.vector_store %arg8[%c0_76, %c0_77, %c0_78], %82 {strides = array<i32>} : memref<1x1x128xf32, #tpu.memory_space<vmem>>, vector<1x1x128xf32>,
    } else {
    }
    return
  }
  func.func @transform_0(%arg0: i32, %arg1: i32) -> (i32, i32, i32, i32) {
    %c0_i32 = arith.constant 0 : i32
    %c0_i32_0 = arith.constant 0 : i32
    %c0_i32_1 = arith.constant 0 : i32
    return %arg0, %arg1, %c0_i32, %c0_i32_0 : i32, i32, i32, i32
  }
  func.func @transform_1(%arg0: i32, %arg1: i32) -> (i32, i32, i32) {
    %c0_i32 = arith.constant 0 : i32
    %c0_i32_0 = arith.constant 0 : i32
    %c0_i32_1 = arith.constant 0 : i32
    %c0_i32_2 = arith.constant 0 : i32
    return %c0_i32, %c0_i32_0, %c0_i32_1 : i32, i32, i32
  }
  func.func @transform_2(%arg0: i32, %arg1: i32) -> (i32, i32) {
    %c0_i32 = arith.constant 0 : i32
    %c0_i32_0 = arith.constant 0 : i32
    %c0_i32_1 = arith.constant 0 : i32
    return %c0_i32, %c0_i32_0 : i32, i32
  }
  func.func @transform_3(%arg0: i32, %arg1: i32) -> (i32, i32) {
    %c0_i32 = arith.constant 0 : i32
    %c0_i32_0 = arith.constant 0 : i32
    %c0_i32_1 = arith.constant 0 : i32
    return %c0_i32, %c0_i32_0 : i32, i32
  }
  func.func @transform_4(%arg0: i32, %arg1: i32) -> (i32, i32) {
    %c0_i32 = arith.constant 0 : i32
    %c0_i32_0 = arith.constant 0 : i32
    %c0_i32_1 = arith.constant 0 : i32
    return %c0_i32, %c0_i32_0 : i32, i32
  }
  func.func @transform_5(%arg0: i32, %arg1: i32) -> (i32, i32) {
    %c0_i32 = arith.constant 0 : i32
    %c0_i32_0 = arith.constant 0 : i32
    %c0_i32_1 = arith.constant 0 : i32
    return %c0_i32, %c0_i32_0 : i32, i32
  }
  func.func @transform_6(%arg0: i32, %arg1: i32) -> (i32, i32, i32) {
    %c0_i32 = arith.constant 0 : i32
    %c0_i32_0 = arith.constant 0 : i32
    %c0_i32_1 = arith.constant 0 : i32
    return %arg0, %c0_i32, %c0_i32_0 : i32, i32, i32
  }
}

</mosaic_0001>

<bundles_post_ra>
// kernel: tile.8
= control target key start
LH: loop header
LB: loop body
LE: loop exit
PB: predicated region body
PF: predicated region fallthrough
CT: control target
= control target key end

     0   :  { %s22_s0 = inlined_call_operand.vmem [shape: f32[18], index: 0, kind: input, shape index: {}]   ;;  %s23_s1 = inlined_call_operand.vmem [shape: f32[8,18], index: 1, kind: output, shape index: {}]  }
   0x1   :  { %v4_v0 = vld [vmem:[%s22_s0] ss:$0 sm:$0xff] }
   0x2   :  { %5 = vst [vmem:[%s23_s1] sm:$0xff] %v4_v0 }

// kernel: tile.0
= control target key start
LH: loop header
LB: loop body
LE: loop exit
PB: predicated region body
PF: predicated region fallthrough
CT: control target
= control target key end

     0   :  { %s228_s10 = smov 127   ;;  %s229_s11 = smov 125   ;;  %vm3_vm0 = vcmask 7168   ;;  %s461_s0 = inlined_call_operand.vmem [shape: f32[8,18], index: 0, kind: input, shape index: {}]   ;;  %s462_s1 = inlined_call_operand.vmem [shape: f32[144,1], index: 1, kind: output, shape index: {}]  }
   0x1   :  { %v5_v0 = vld.sshfl [vmem:[%s461_s0] sm:$0xff pattern:$0x75316420]   ;;  %s230_s12 = smov 126   ;;  %s231_s13 = smov 124  }
   0x2   :  { %v23_v1 = vld.sshfl [vmem:[%s461_s0] sm:$0xff pattern:$0x53164207]   ;;  %6 = vrot.lane.b32.xlu0 %v5_v0, %s228_s10  ;;  %s232_s16 = smov 123   ;;  %s233_s17 = smov 122  }
   0x3   :  { %24 = vrot.lane.b32.xlu1 %v23_v1, %s229_s11  ;;  %v53_v2 = vld.sshfl [vmem:[%s461_s0] sm:$0xff pattern:$0x31642075]   ;;  %s234_s18 = smov 121   ;;  %s235_s19 = smov 120  }
   0x4   :  { %v93_v3 = vld.sshfl [vmem:[%s461_s0] sm:$0xff pattern:$0x16420753]   ;;  %s236_s22 = smov 119   ;;  %s237_s23 = smov 118  }
   0x5   :  { %v2_v4 = vld [vmem:[%s461_s0] sm:$0xff]   ;;  %s238_s28 = smov 117   ;;  %s239_s29 = smov 116  }
   0x6   :  { %14 = vrot.lane.b32.xlu0 %v23_v1, %s230_s12  ;;  %4 = vst.msk [vmem:[%s462_s1] ss:$18 sm:$0xff] %vm3_vm0, %v2_v4   ;;  %v133_v5 = vld.sshfl [vmem:[%s461_s0] sm:$0xff pattern:$0x64207531]   ;;  %s240_s0 = smov 115  }
   0x7   :  { %34 = vrot.lane.b32.xlu1 %v23_v1, %s231_s13  ;;  %s241_s3 = smov 114   ;;  %s242_s4 = smov 113  }
   0x8   :  { %s243_s5 = smov 112   ;;  %s244_s6 = smov 111  }
   0xa   :  { %44 = vrot.lane.b32.xlu0 %v23_v1, %s232_s16 }
   0xb   :  { %54 = vrot.lane.b32.xlu1 %v53_v2, %s233_s17 }
   0xe   :  { %64 = vrot.lane.b32.xlu0 %v53_v2, %s234_s18 }
   0xf   :  { %74 = vrot.lane.b32.xlu1 %v53_v2, %s235_s19 }
  0x12   :  { %84 = vrot.lane.b32.xlu0 %v53_v2, %s236_s22 }
  0x13   :  { %94 = vrot.lane.b32.xlu1 %v93_v3, %s237_s23 }
  0x16   :  { %104 = vrot.lane.b32.xlu0 %v93_v3, %s238_s28 }
  0x17   :  { %114 = vrot.lane.b32.xlu1 %v93_v3, %s239_s29 }
  0x1a   :  { %124 = vrot.lane.b32.xlu0 %v93_v3, %s240_s0 }
  0x1b   :  { %134 = vrot.lane.b32.xlu1 %v133_v5, %s241_s3 }
  0x1e   :  { %142 = vrot.lane.b32.xlu0 %v133_v5, %s242_s4 }
  0x1f   :  { %150 = vrot.lane.b32.xlu1 %v133_v5, %s243_s5 }
  0x22   :  { %158 = vrot.lane.b32.xlu0 %v133_v5, %s244_s6 }
  0x74   :  { %v7_v6 = vpop.permute.xlu0 %6  }
  0x75   :  { %v25_v7 = vpop.permute.xlu1 %24   ;;  %165 = vst.msk [vmem:[%s462_s1 + $0x1] ss:$36 sm:$0xf] %vm3_vm0, %v7_v6   ;;  %166 = vst.msk [vmem:[%s462_s1 - $0x7d] ss:$36 sm:$0xf0] %vm3_vm0, %v7_v6  }
  0x76   :  { %170 = vst.msk [vmem:[%s462_s1 + $0x81] ss:$-126 sm:$0x3] %vm3_vm0, %v25_v7   ;;  %171 = vst.msk [vmem:[%s462_s1 - $0x21] ss:$36 sm:$0x1c] %vm3_vm0, %v25_v7  }
  0x77   :  { %172 = vst.msk [vmem:[%s462_s1 - $0x9f] ss:$36 sm:$0xe0] %vm3_vm0, %v25_v7  }
  0x78   :  { %v15_v8 = vpop.permute.xlu0 %14  }
  0x79   :  { %v35_v9 = vpop.permute.xlu1 %34   ;;  %167 = vst.msk [vmem:[%s462_s1 + $0x80] ss:$-126 sm:$0x3] %vm3_vm0, %v15_v8   ;;  %168 = vst.msk [vmem:[%s462_s1 - $0x22] ss:$36 sm:$0x1c] %vm3_vm0, %v15_v8  }
  0x7a   :  { %169 = vst.msk [vmem:[%s462_s1 - $0xa0] ss:$36 sm:$0xe0] %vm3_vm0, %v15_v8   ;;  %173 = vst.msk [vmem:[%s462_s1 + $0x82] ss:$-126 sm:$0x3] %vm3_vm0, %v35_v9  }
  0x7b   :  { %174 = vst.msk [vmem:[%s462_s1 - $0x20] ss:$36 sm:$0x1c] %vm3_vm0, %v35_v9   ;;  %175 = vst.msk [vmem:[%s462_s1 - $0x9e] ss:$36 sm:$0xe0] %vm3_vm0, %v35_v9  }
  0x7c   :  { %v45_v10 = vpop.permute.xlu0 %44  }
  0x7d   :  { %v55_v11 = vpop.permute.xlu1 %54   ;;  %176 = vst.msk [vmem:[%s462_s1 + $0x83] ss:$-126 sm:$0x3] %vm3_vm0, %v45_v10   ;;  %177 = vst.msk [vmem:[%s462_s1 - $0x1f] ss:$36 sm:$0x1c] %vm3_vm0, %v45_v10  }
  0x7e   :  { %178 = vst.msk [vmem:[%s462_s1 - $0x9d] ss:$36 sm:$0xe0] %vm3_vm0, %v45_v10   ;;  %179 = vst.msk [vmem:[%s462_s1 + $0x60] ss:$36 sm:$0x3] %vm3_vm0, %v55_v11  }
  0x7f   :  { %180 = vst.msk [vmem:[%s462_s1 - $0x42] ss:$36 sm:$0x3c] %vm3_vm0, %v55_v11   ;;  %181 = vst.msk [vmem:[%s462_s1 - $0xc0] ss:$36 sm:$0xc0] %vm3_vm0, %v55_v11  }
  0x80   :  { %v65_v12 = vpop.permute.xlu0 %64  }
  0x81   :  { %v75_v13 = vpop.permute.xlu1 %74   ;;  %182 = vst.msk [vmem:[%s462_s1 + $0x61] ss:$36 sm:$0x3] %vm3_vm0, %v65_v12   ;;  %183 = vst.msk [vmem:[%s462_s1 - $0x41] ss:$36 sm:$0x3c] %vm3_vm0, %v65_v12  }
  0x82   :  { %184 = vst.msk [vmem:[%s462_s1 - $0xbf] ss:$36 sm:$0xc0] %vm3_vm0, %v65_v12   ;;  %185 = vst.msk [vmem:[%s462_s1 + $0x62] ss:$36 sm:$0x3] %vm3_vm0, %v75_v13  }
  0x83   :  { %186 = vst.msk [vmem:[%s462_s1 - $0x40] ss:$36 sm:$0x3c] %vm3_vm0, %v75_v13   ;;  %187 = vst.msk [vmem:[%s462_s1 - $0xbe] ss:$36 sm:$0xc0] %vm3_vm0, %v75_v13  }
  0x84   :  { %v85_v14 = vpop.permute.xlu0 %84  }
  0x85   :  { %v95_v15 = vpop.permute.xlu1 %94   ;;  %188 = vst.msk [vmem:[%s462_s1 + $0x63] ss:$36 sm:$0x3] %vm3_vm0, %v85_v14   ;;  %189 = vst.msk [vmem:[%s462_s1 - $0x3f] ss:$36 sm:$0x3c] %vm3_vm0, %v85_v14  }
  0x86   :  { %190 = vst.msk [vmem:[%s462_s1 - $0xbd] ss:$36 sm:$0xc0] %vm3_vm0, %v85_v14   ;;  %191 = vst.msk [vmem:[%s462_s1 + $0x40] ss:$36 sm:$0x7] %vm3_vm0, %v95_v15  }
  0x87   :  { %192 = vst.msk [vmem:[%s462_s1 - $0x62] ss:$36 sm:$0x78] %vm3_vm0, %v95_v15   ;;  %193 = vst.msk [vmem:[%s462_s1 + $0x15] sm:$0x80] %vm3_vm0, %v95_v15  }
  0x88   :  { %v105_v16 = vpop.permute.xlu0 %104  }
  0x89   :  { %v115_v17 = vpop.permute.xlu1 %114   ;;  %194 = vst.msk [vmem:[%s462_s1 + $0x41] ss:$36 sm:$0x7] %vm3_vm0, %v105_v16   ;;  %195 = vst.msk [vmem:[%s462_s1 - $0x61] ss:$36 sm:$0x78] %vm3_vm0, %v105_v16  }
  0x8a   :  { %196 = vst.msk [vmem:[%s462_s1 + $0x16] sm:$0x80] %vm3_vm0, %v105_v16   ;;  %197 = vst.msk [vmem:[%s462_s1 + $0x42] ss:$36 sm:$0x7] %vm3_vm0, %v115_v17  }
  0x8b   :  { %198 = vst.msk [vmem:[%s462_s1 - $0x60] ss:$36 sm:$0x78] %vm3_vm0, %v115_v17   ;;  %199 = vst.msk [vmem:[%s462_s1 + $0x17] sm:$0x80] %vm3_vm0, %v115_v17  }
  0x8c   :  { %v125_v18 = vpop.permute.xlu0 %124  }
  0x8d   :  { %v135_v19 = vpop.permute.xlu1 %134   ;;  %200 = vst.msk [vmem:[%s462_s1 + $0x43] ss:$36 sm:$0x7] %vm3_vm0, %v125_v18   ;;  %201 = vst.msk [vmem:[%s462_s1 - $0x5f] ss:$36 sm:$0x78] %vm3_vm0, %v125_v18  }
  0x8e   :  { %202 = vst.msk [vmem:[%s462_s1 + $0x18] sm:$0x80] %vm3_vm0, %v125_v18   ;;  %203 = vst.msk [vmem:[%s462_s1 + $0x20] ss:$36 sm:$0xf] %vm3_vm0, %v135_v19  }
  0x8f   :  { %204 = vst.msk [vmem:[%s462_s1 - $0x82] ss:$36 sm:$0xf0] %vm3_vm0, %v135_v19  }
  0x90   :  { %v143_v20 = vpop.permute.xlu0 %142  }
  0x91   :  { %v151_v21 = vpop.permute.xlu1 %150   ;;  %205 = vst.msk [vmem:[%s462_s1 + $0x21] ss:$36 sm:$0xf] %vm3_vm0, %v143_v20   ;;  %206 = vst.msk [vmem:[%s462_s1 - $0x81] ss:$36 sm:$0xf0] %vm3_vm0, %v143_v20  }
  0x92   :  { %207 = vst.msk [vmem:[%s462_s1 + $0x22] ss:$36 sm:$0xf] %vm3_vm0, %v151_v21   ;;  %208 = vst.msk [vmem:[%s462_s1 - $0x80] ss:$36 sm:$0xf0] %vm3_vm0, %v151_v21  }
  0x94   :  { %v159_v22 = vpop.permute.xlu0 %158  }
  0x95   :  { %209 = vst.msk [vmem:[%s462_s1 + $0x23] ss:$36 sm:$0xf] %vm3_vm0, %v159_v22   ;;  %210 = vst.msk [vmem:[%s462_s1 - $0x7f] ss:$36 sm:$0xf0] %vm3_vm0, %v159_v22  }

// kernel: da_network_forward.2
= control target key start
LH: loop header
LB: loop body
LE: loop exit
PB: predicated region body
PF: predicated region fallthrough
CT: control target
= control target key end

     0   :  { %s3163_s12 = smov 0   ;;  %s3165_s13 = smov 0   ;;  %s4074_s0 = inlined_call_operand.vmem [shape: bf16[2,2,182,4], index: 0, kind: input, shape index: {}]   ;;  %s4075_s1 = inlined_call_operand.vmem [shape: bf16[9,4,128], index: 1, kind: input, shape index: {}]   ;;  %s4076_s2 = inlined_call_operand.vmem [shape: f32[1,128], index: 2, kind: input, shape index: {}]   ;;  %s4077_s3 = inlined_call_operand.vmem [shape: bf16[2,2,144,128], index: 3, kind: output, shape index: {}]  }
   0x1   :  { %s3167_s14 = smov 0   ;;  %s3169_s15 = smov 0  }
   0x2   :  { %s3171_s16 = smov 0  }
   0x3 LB: > { %s22_s17 = sadd.s32 1, %s3131_s14  ;;  %s25_s18 = sadd.s32 1, %s3135_s15  ;;  %s3139_s16 = sphi %s3171_s16, %s13_s16   ;;  %s3135_s15 = sphi %s3169_s15, %s4081_s15   ;;  %s3131_s14 = sphi %s3167_s14, %s4080_s14   ;;  %s3127_s13 = sphi %s3165_s13, %s4079_s13   ;;  %s3123_s12 = sphi %s3163_s12, %s4078_s12  }
   0x4   : > { %p23_p0 = scmp.ge.s32.totalorder %s22_s17, 2  ;;  %p2367_p1 = scmp.ge.s32.totalorder %s3139_s16, 1 }
   0x5   : > { %p157_p2 = scmp.lt.s32.totalorder %s3139_s16, 5 }
   0x6   : > { %s4083_s17 = smov (%p23_p0, %s22_s17), 0  ;;  %s4085_s18 = smov (!%p23_p0, %s25_s18), %s3135_s15 }
   0x7   : > { %p158_p3 = pnand %p2367_p1, %p157_p2  ;;  %p27_p4 = scmp.ge.s32.totalorder %s4085_s18, 2 }
   0x8   : > { %v2370_v0 = vld [vmem:[%s4075_s1 + $0x2] sm:$0x3] (!%p158_p3)  ;;  %vm383_vm0 = vcmask (!%p158_p3), 1041408   ;;  %p189_p5 = scmp.lt.s32.totalorder (!%p158_p3), %s3127_s13, 1  ;;  %v3141_v1 = vmov (!%p158_p3), 0.0   ;;  %p191_p6 = scmp.lt.s32.totalorder (!%p158_p3), %s3123_s12, 1 }
   0x9   : > { %s4087_s18 = smov (%p27_p4, %s4085_s18), 0  ;;  %161 = sbr.rel (%p158_p3) target bundleno = 576 (0x240), region = 32 }
   0xa   : > { %2676 = vmatprep.subr.bf16.mxu0 (!%p158_p3), %v3141_v1  ;;  %3018 = vmatprep.subr.bf16.mxu1 (!%p158_p3), %v3141_v1  ;;  %v385_v2 = vsel (!%p158_p3), %vm383_vm0, %v2370_v0, 0  ;;  %vm3142_vm1 = vmmov (!%p158_p3), 0   ;;  %vm278_vm2 = vsmask.f32 (!%p158_p3), 7424  ;;  %v2399_v12 = vld [vmem:[%s4075_s1 + $0x4] sm:$0x3] (!%p158_p3) }
   0xb   : > { %2677 = vmatpush3.bf16.msra.mxu0 (!%p158_p3), %v385_v2  ;;  %3019 = vmatpush3.bf16.msra.mxu1 (!%p158_p3), %v385_v2  ;;  %vm355_vm3 = vcmask (!%p158_p3), 31744   ;;  %v226_v20 = vld [vmem:[%s4075_s1] sm:$0x3] (!%p158_p3)  ;;  %v672_v26 = vsel (!%p158_p3), %vm383_vm0, %v2399_v12, 0  ;;  %vm624_vm4 = vcmask (!%p158_p3), 1046528   ;;  %vm1293_vm5 = vcmask (!%p158_p3), 1045504  }
   0xc   : > { %2678 = vmatprep.mubr.msk.bf16.mxu0 (!%p158_p3), %vm3142_vm1, %v3141_v1  ;;  %2698 = vmatprep.mubr.msk.bf16.mxu1 (!%p158_p3), %vm3142_vm1, %v3141_v1  ;;  %v511_v31 = vsel (!%p158_p3), %vm383_vm0, %v226_v20, 0  ;;  %v2410_v12 = vld [vmem:[%s4075_s1 + $0x6] sm:$0x3] (!%p158_p3)  ;;  %vm1044_vm6 = vsmask.f32 (!%p158_p3), 6400  ;;  %vm1962_vm8 = vcmask (!%p158_p3), 1044480  }
   0xd   : > { %2752 = vmatprep.subr.bf16.mxu0 (!%p158_p3), %v3141_v1  ;;  %2714 = vmatprep.subr.bf16.mxu1 (!%p158_p3), %v3141_v1  ;;  %vm1713_vm7 = vsmask.f32 (!%p158_p3), 5376 }
  0x10   : > { %s4089_s13 = smov (!%p189_p5, %s3127_s13), 1  ;;  %s4091_s12 = smov (!%p191_p6, %s3123_s12), 1 }
  0x11   : > { %s3021_s21 = smul.u32 46, %s4089_s13 }
  0x12   : > { %s3020_s22 = smul.u32 23, %s4091_s12 }
  0x13   : > { %s3023_s25 = smul.u32 36, %s4089_s13 }
  0x14   : > { %s195_s23 = sadd.s32 %s3021_s21, %s3020_s22 }
  0x15   : > { %s2368_s24 = sshll.u32 %s195_s23, 2 }
  0x16   : > { %s3218_s27 = scalar_lea.vmem %s4074_s0, %s2368_s24  ;;  %s3022_s24 = smul.u32 18, %s4091_s12 }
  0x17   : > { %v208_v3 = vld [vmem:[%s3218_s27] sm:$0xf]  ;;  %v3222_v4 = vld [vmem:[%s3218_s27 + $0x4] sm:$0xf]  ;;  %v3228_v6 = vld [vmem:[%s3218_s27 + $0x8] sm:$0xff]  }
  0x18   : > { %v3225_v5 = vcombine.low %v208_v3, %v3222_v4  ;;  %v287_v9 = vshll.u32 %v3228_v6, 16  ;;  %v3234_v10 = vld [vmem:[%s3218_s27 + $0x28] sm:$0xff]   ;;  %v3237_v11 = vld [vmem:[%s3218_s27 + $0x30] sm:$0xff]   ;;  %v3246_v14 = vld [vmem:[%s3218_s27 + $0x38] sm:$0xff]   ;;  %v291_v21 = vshrl.u32 %v3228_v6, 16  ;;  %s204_s28 = sadd.s32 %s3023_s25, %s3022_s24 }
  0x19   : > { %v3243_v13 = vld [vmem:[%s3218_s27 + $0x10] sm:$0xff]   ;;  %v319_v17 = vshll.u32 %v3234_v10, 16  ;;  %v323_v18 = vshrl.u32 %v3234_v10, 16  ;;  %v327_v19 = vshll.u32 %v3237_v11, 16  ;;  %v331_v29 = vshrl.u32 %v3237_v11, 16  ;;  %v3266_v32 = vld [vmem:[%s3218_s27 + $0x18] sm:$0xff]  }
  0x1a   : > { %v280_v7 = vshrl.u32 %v3225_v5, 16  ;;  %v282_v8 = vshll.u32 %v3225_v5, 16  ;;  %v289_v16 = vrot.slane %v287_v9, 1  ;;  %v295_v24 = vshll.u32 %v3243_v13, 16  ;;  %v3276_v38 = vld [vmem:[%s3218_s27 + $0x40] sm:$0xff]   ;;  %s2369_s12 = sshll.u32 %s204_s28, 2 }
  0x1b   : > { %v3255_v23 = vrot.slane %v319_v17, 1  ;;  %v329_v25 = vrot.slane %v327_v19, 1  ;;  %v335_v30 = vshll.u32 %v3246_v14, 16  ;;  %v303_v39 = vshll.u32 %v3266_v32, 16  ;;  %v3288_v47 = vld [vmem:[%s3218_s27 + $0x20] sm:$0xff]   ;;  %s4018_s30 = scalar_lea.vmem %s4077_s3, %s2369_s12 }
  0x1c   : > { %v284_v15 = vrot.slane %v282_v8, 1  ;;  %v293_v34 = vor.u32 %v291_v21, %v289_v16  ;;  %v297_v35 = vrot.slane %v295_v24, 1  ;;  %v299_v41 = vshrl.u32 %v3243_v13, 16  ;;  %v3075_v42 = vld [vmem:[%s3218_s27 + $0x48] ss:$0 sps:$4 sm:$0x11]  }
  0x1d   : > { %v325_v28 = vor.u32 %v323_v18, %v3255_v23  ;;  %v333_v36 = vor.u32 %v331_v29, %v329_v25  ;;  %v337_v37 = vrot.slane %v335_v30, 1  ;;  %v339_v44 = vshrl.u32 %v3246_v14, 16  ;;  %v618_v8 = vld [vmem:[%s3218_s27] sm:$0xe]  ;;  %v798_v21 = vld [vmem:[%s3218_s27 + $0xc] sm:$0xf] }
  0x1e   : > { %v285_v22 = vor.u32 %v284_v15, %v280_v7  ;;  %v298_v40 = vsel %vm278_vm2, %v293_v34, %v297_v35  ;;  %v343_v45 = vshll.u32 %v3276_v38, 16  ;;  %v305_v46 = vrot.slane %v303_v39, 1  ;;  %v3356_v24 = vld [vmem:[%s3218_s27 + $0x10] sm:$0xff]  }
  0x1f   : > { %v330_v33 = vsel %vm278_vm2, %v325_v28, %v329_v25  ;;  %v338_v43 = vsel %vm278_vm2, %v333_v36, %v337_v37  ;;  %v301_v48 = vor.u32 %v299_v41, %v297_v35  ;;  %v640_v49 = vrot.slane %v3276_v38, 1  ;;  %v3364_v28 = vld [vmem:[%s3218_s27 + $0x18] sm:$0xff]   ;;  %v3383_v35 = vld [vmem:[%s3218_s27 + $0x20] sm:$0xff]  }
  0x20   : > { %v290_v27 = vsel %vm278_vm2, %v285_v22, %v289_v16  ;;  %2699 = vmatmul.mubr.msk.bf16.vlgmr.msra.gmra.mrb[0].mxu1 %vm355_vm3, %v330_v33  ;;  %v642_v50 = vrot.slane %v3075_v42, 1  ;;  %v341_v51 = vor.u32 %v339_v44, %v337_v37  ;;  %v345_v52 = vrot.slane %v343_v45, 1  ;;  %v1287_v22 = vld [vmem:[%s3218_s27 + $0x8] sm:$0xc]  ;;  %v3415_v44 = vld [vmem:[%s3218_s27 + $0x30] sm:$0xff]  }
  0x21   : > { %2679 = vmatmul.mubr.msk.bf16.vlgmr.msra.gmra.mrb[0].mxu0 %vm355_vm3, %v290_v27  ;;  %2715 = vmatpush3.bf16.msra.mxu1 %v511_v31  ;;  %v306_v54 = vsel %vm278_vm2, %v301_v48, %v305_v46  ;;  %v307_v55 = vshrl.u32 %v3266_v32, 16  ;;  %v311_v56 = vshll.u32 %v3288_v47, 16  ;;  %v347_v58 = vshrl.u32 %v3276_v38, 16 }
  0x22   : > { %2753 = vmatpush3.bf16.msra.mxu0 %v672_v26  ;;  %2682 = vmatprep.mubr.msk.bf16.mxu0 %vm3142_vm1, %v3141_v1  ;;  %v3299_v53 = vsel %vm624_vm4, %v640_v49, %v642_v50  ;;  %v346_v57 = vsel %vm278_vm2, %v341_v51, %v345_v52  ;;  %v351_v59 = vshll.u32 %v3075_v42, 16  ;;  %v315_v2 = vshrl.u32 %v3288_v47, 16  ;;  %v797_v50 = vld [vmem:[%s3218_s27 + $0x8] sm:$0xe] }
  0x23   : > { %2828 = vmatprep.subr.bf16.mxu0 %v3141_v1  ;;  %2702 = vmatprep.mubr.msk.bf16.mxu1 %vm3142_vm1, %v3141_v1  ;;  %v309_v60 = vor.u32 %v307_v55, %v305_v46  ;;  %v313_v61 = vrot.slane %v311_v56, 1  ;;  %v349_v62 = vor.u32 %v347_v58, %v345_v52  ;;  %v2400_v15 = vcombine.low %v618_v8, %v3222_v4  ;;  %v2430_v4 = vld [vmem:[%s4075_s1 + $0x8] sm:$0x3] }
  0x24   : > { %2790 = vmatprep.subr.bf16.mxu1 %v3141_v1  ;;  %v353_v63 = vrot.slane %v351_v59, 1  ;;  %v913_v16 = vsel %vm383_vm0, %v2410_v12, 0  ;;  %v626_v18 = vrot.slane %v3228_v6, 1  ;;  %v1162_v20 = vsel %vm383_vm0, %v2430_v4, 0 }
  0x25   : > { %v314_v0 = vsel %vm278_vm2, %v309_v60, %v313_v61  ;;  %v317_v7 = vor.u32 %v315_v2, %v313_v61  ;;  %v625_v17 = vrot.slane %v2400_v15, 1  ;;  %v2442_v25 = vcombine.low %v1287_v22, %v798_v21 }
  0x26   : > { %v354_v3 = vsel %vm278_vm2, %v349_v62, %v353_v63  ;;  %v1295_v27 = vrot.slane %v3356_v24, 2  ;;  %v1297_v30 = vrot.slane %v3364_v28, 2  ;;  %v632_v34 = vrot.slane %v3288_v47, 1 }
  0x27   : > { %v322_v9 = vsel %vm278_vm2, %v317_v7, %v3255_v23  ;;  %v627_v19 = vsel %vm624_vm4, %v625_v17, %v626_v18  ;;  %v1294_v26 = vrot.slane %v2442_v25, 2  ;;  %v634_v39 = vrot.slane %v3234_v10, 1  ;;  %v2452_v7 = vld [vmem:[%s4075_s1 + $0xc] sm:$0x3] }
  0x28   : > { %2703 = vmatmul.mubr.msk.bf16.gmra.mrb[4].mxu1 %vm355_vm3, %v338_v43  ;;  %v3376_v33 = vsel %vm1293_vm5, %v1295_v27, %v1297_v30  ;;  %v636_v43 = vrot.slane %v3237_v11, 1  ;;  %v1303_v45 = vrot.slane %v3415_v44, 2  ;;  %v638_v48 = vrot.slane %v3246_v14, 1 }
  0x29   : > { %2683 = vmatmul.mubr.msk.bf16.gmra.mrb[4].mxu0 %vm355_vm3, %v298_v40  ;;  %2706 = vmatprep.mubr.msk.bf16.mxu1 %vm3142_vm1, %v3141_v1  ;;  %v3367_v29 = vsel %vm1293_vm5, %v1294_v26, %v1295_v27  ;;  %v3399_v40 = vld [vmem:[%s3218_s27 + $0x28] sm:$0xff]   ;;  %v635_v41 = vsel %vm624_vm4, %v632_v34, %v634_v39  ;;  %v2411_v51 = vcombine.low %v797_v50, %v798_v21  ;;  %v1054_v55 = vshrl.u32 %v3356_v24, 16 }
  0x2a   : > { %2686 = vmatprep.mubr.msk.bf16.mxu0 %vm3142_vm1, %v3141_v1  ;;  %v637_v46 = vsel %vm624_vm4, %v634_v39, %v636_v43  ;;  %v1063_v2 = vshrl.u32 %v3364_v28, 16  ;;  %v1582_v15 = vsel %vm383_vm0, %v2452_v7, 0  ;;  %v1075_v4 = vshll.u32 %v3383_v35, 16  ;;  %v3556_v7 = vld [vmem:[%s3218_s27 + $0x50] ss:$0 sps:$4 sm:$0x33]  }
  0x2b   : > { %v1046_v52 = vshrl.u32 %v2411_v51, 16  ;;  %v866_v56 = vrot.slane %v2411_v51, 1  ;;  %v1056_v60 = vrot.slane %v1054_v55, 1  ;;  %v1084_v25 = vshll.u32 %v3399_v40, 16 }
  0x2c   : > { %v1077_v21 = vrot.slane %v1075_v4, 2  ;;  %v873_v26 = vrot.slane %v3399_v40, 1 }
  0x2d   : > { %v1048_v58 = vrot.slane %v1046_v52, 1 }
  0x30   : > { %2707 = vmatmul.mubr.msk.bf16.gmra.mrb[8].mxu1 %vm355_vm3, %v346_v57  ;;  %v2441_v57 = vld [vmem:[%s4075_s1 + $0xa] sm:$0x3] }
  0x31   : > { %2687 = vmatmul.mubr.msk.bf16.gmra.mrb[8].mxu0 %vm355_vm3, %v306_v54  ;;  %2710 = vmatprep.mubr.msk.bf16.mxu1 %vm3142_vm1, %v3141_v1  ;;  %v1049_v54 = vshll.u32 %v2411_v51, 16 }
  0x32   : > { %2690 = vmatprep.mubr.msk.bf16.mxu0 %vm3142_vm1, %v3141_v1 }
  0x33   : > { %v1051_v59 = vrot.slane %v1049_v54, 2  ;;  %v3529_v54 = vld [vmem:[%s3218_s27 + $0x40] sm:$0xff]  }
  0x35   : > { %v1052_v63 = vor.u32 %v1051_v59, %v1048_v58 }
  0x38   : > { %2711 = vmatmul.mubr.msk.bf16.gmra.mrb[12].mxu1 %vm355_vm3, %v354_v3  ;;  %v1066_v3 = vshll.u32 %v3364_v28, 16 }
  0x39   : > { %2691 = vmatmul.mubr.msk.bf16.gmra.mrb[12].mxu0 %vm355_vm3, %v314_v0  ;;  %2716 = vmatprep.mubr.msk.bf16.mxu1 %vm3142_vm1, %v3141_v1 }
  0x3a   : > { %2694 = vmatprep.mubr.msk.bf16.mxu0 %vm3142_vm1, %v3141_v1  ;;  %v1068_v12 = vrot.slane %v1066_v3, 2 }
  0x40   : > { %2717 = vmatmul.mubr.msk.bf16.vlgmr.msra.gmra.mrb[16].mxu1 %vm355_vm3, %v3225_v5  ;;  %v628_v5 = vrot.slane %v3243_v13, 1 }
  0x41   : > { %2695 = vmatmul.mubr.msk.bf16.gmra.mrb[16].mxu0 %vm355_vm3, %v322_v9  ;;  %2791 = vmatpush3.bf16.msra.mxu1 %v913_v16  ;;  %v1065_v9 = vrot.slane %v1063_v2, 1 }
  0x42   : > { %2754 = vmatprep.mubr.msk.bf16.mxu0 %vm3142_vm1, %v3141_v1  ;;  %2720 = vmatprep.mubr.msk.bf16.mxu1 %vm3142_vm1, %v3141_v1  ;;  %v629_v23 = vsel %vm624_vm4, %v626_v18, %v628_v5  ;;  %v1072_v18 = vshrl.u32 %v3383_v35, 16 }
  0x43   : > { %2866 = vmatprep.subr.bf16.mxu1 %v3141_v1  ;;  %v1069_v17 = vor.u32 %v1068_v12, %v1065_v9  ;;  %v3086_v9 = vld [vmem:[%s3218_s27 + $0x50] ss:$0 sps:$4 sm:$0x11]  }
  0x48   : > { %2721 = vmatmul.mubr.msk.bf16.gmra.mrb[20].mxu1 %vm355_vm3, %v3228_v6  ;;  %v630_v6 = vrot.slane %v3266_v32, 1 }
  0x49   : > { %2755 = vmatmul.mubr.msk.bf16.vlgmr.msra.gmra.mrb[20].mxu0 %vm355_vm3, %v627_v19  ;;  %2724 = vmatprep.mubr.msk.bf16.mxu1 %vm3142_vm1, %v3141_v1  ;;  %v871_v19 = vrot.slane %v3383_v35, 1 }
  0x4a   : > { %2829 = vmatpush3.bf16.msra.mxu0 %v1162_v20  ;;  %2758 = vmatprep.mubr.msk.bf16.mxu0 %vm3142_vm1, %v3141_v1  ;;  %v631_v31 = vsel %vm624_vm4, %v628_v5, %v630_v6  ;;  %v633_v36 = vsel %vm624_vm4, %v630_v6, %v632_v34  ;;  %v1074_v5 = vrot.slane %v1072_v18, 1  ;;  %v1090_v34 = vshrl.u32 %v3415_v44, 16 }
  0x4b   : > { %2904 = vmatprep.subr.bf16.mxu0 %v3141_v1 }
  0x4c   : > { %v1092_v39 = vrot.slane %v1090_v34, 1  ;;  %v3605_v34 = vld [vmem:[%s3218_s27 + $0x20] sm:$0xff]  }
  0x50   : > { %2725 = vmatmul.mubr.msk.bf16.gmra.mrb[24].mxu1 %vm355_vm3, %v3243_v13  ;;  %v1299_v13 = vrot.slane %v3383_v35, 2  ;;  %v1093_v35 = vshll.u32 %v3415_v44, 16 }
  0x51   : > { %2759 = vmatmul.mubr.msk.bf16.gmra.mrb[24].mxu0 %vm355_vm3, %v629_v23  ;;  %2728 = vmatprep.mubr.msk.bf16.mxu1 %vm3142_vm1, %v3141_v1  ;;  %v1078_v23 = vor.u32 %v1077_v21, %v1074_v5  ;;  %v1466_v21 = vld [vmem:[%s3218_s27 + $0x10] sm:$0xc] }
  0x52   : > { %2762 = vmatprep.mubr.msk.bf16.mxu0 %vm3142_vm1, %v3141_v1  ;;  %v3392_v37 = vsel %vm1293_vm5, %v1297_v30, %v1299_v13  ;;  %v874_v30 = vsel %vm624_vm4, %v871_v19, %v873_v26 }
  0x53   : > { %v1079_v27 = vsel %vm1044_vm6, %v1069_v17, %v1078_v23 }
  0x58   : > { %2729 = vmatmul.mubr.msk.bf16.gmra.mrb[28].mxu1 %vm355_vm3, %v3266_v32  ;;  %v1301_v32 = vrot.slane %v3399_v40, 2 }
  0x59   : > { %2763 = vmatmul.mubr.msk.bf16.gmra.mrb[28].mxu0 %vm355_vm3, %v631_v31  ;;  %2732 = vmatprep.mubr.msk.bf16.mxu1 %vm3142_vm1, %v3141_v1 }
  0x5a   : > { %2766 = vmatprep.mubr.msk.bf16.mxu0 %vm3142_vm1, %v3141_v1  ;;  %v3408_v42 = vsel %vm1293_vm5, %v1299_v13, %v1301_v32  ;;  %v875_v13 = vrot.slane %v3415_v44, 1 }
  0x60   : > { %2733 = vmatmul.mubr.msk.bf16.gmra.mrb[32].mxu1 %vm355_vm3, %v3288_v47  ;;  %v3426_v47 = vsel %vm1293_vm5, %v1301_v32, %v1303_v45  ;;  %v876_v32 = vsel %vm624_vm4, %v873_v26, %v875_v13  ;;  %v3588_v26 = vld [vmem:[%s3218_s27 + $0x18] sm:$0xff]  }
  0x61   : > { %2767 = vmatmul.mubr.msk.bf16.gmra.mrb[32].mxu0 %vm355_vm3, %v633_v36  ;;  %2736 = vmatprep.mubr.msk.bf16.mxu1 %vm3142_vm1, %v3141_v1 }
  0x62   : > { %2770 = vmatprep.mubr.msk.bf16.mxu0 %vm3142_vm1, %v3141_v1 }
  0x68   : > { %2737 = vmatmul.mubr.msk.bf16.gmra.mrb[36].mxu1 %vm355_vm3, %v3234_v10  ;;  %v639_v10 = vsel %vm624_vm4, %v636_v43, %v638_v48 }
  0x69   : > { %2771 = vmatmul.mubr.msk.bf16.gmra.mrb[36].mxu0 %vm355_vm3, %v635_v41  ;;  %2740 = vmatprep.mubr.msk.bf16.mxu1 %vm3142_vm1, %v3141_v1  ;;  %v3515_v41 = vld [vmem:[%s3218_s27 + $0x38] sm:$0xff]  }
  0x6a   : > { %2774 = vmatprep.mubr.msk.bf16.mxu0 %vm3142_vm1, %v3141_v1 }
  0x70   : > { %2741 = vmatmul.mubr.msk.bf16.gmra.mrb[40].mxu1 %vm355_vm3, %v3237_v11  ;;  %v641_v11 = vsel %vm624_vm4, %v638_v48, %v640_v49  ;;  %v867_v49 = vrot.slane %v3356_v24, 1  ;;  %v1102_v48 = vshll.u32 %v3515_v41, 16 }
  0x71   : > { %2775 = vmatmul.mubr.msk.bf16.gmra.mrb[40].mxu0 %vm355_vm3, %v637_v46  ;;  %2744 = vmatprep.mubr.msk.bf16.mxu1 %vm3142_vm1, %v3141_v1  ;;  %v1099_v46 = vshrl.u32 %v3515_v41, 16 }
  0x72   : > { %2778 = vmatprep.mubr.msk.bf16.mxu0 %vm3142_vm1, %v3141_v1  ;;  %v868_v62 = vsel %vm624_vm4, %v866_v56, %v867_v49  ;;  %v1104_v51 = vrot.slane %v1102_v48, 2  ;;  %v1111_v56 = vshll.u32 %v3529_v54, 16 }
  0x74   : > { %v1113_v59 = vrot.slane %v1111_v56, 2 }
  0x78   : > { %2745 = vmatmul.mubr.msk.bf16.gmra.mrb[44].mxu1 %vm355_vm3, %v3246_v14  ;;  %v1057_v14 = vshll.u32 %v3356_v24, 16  ;;  %v1081_v24 = vshrl.u32 %v3399_v40, 16  ;;  %v1095_v40 = vrot.slane %v1093_v35, 2 }
  0x79   : > { %2779 = vmatmul.mubr.msk.bf16.gmra.mrb[44].mxu0 %vm355_vm3, %v639_v10  ;;  %2748 = vmatprep.mubr.msk.bf16.mxu1 %vm3142_vm1, %v3141_v1  ;;  %v877_v10 = vrot.slane %v3515_v41, 1 }
  0x7a   : > { %2782 = vmatprep.mubr.msk.bf16.mxu0 %vm3142_vm1, %v3141_v1  ;;  %v1059_v61 = vrot.slane %v1057_v14, 2  ;;  %v1083_v6 = vrot.slane %v1081_v24, 1  ;;  %v1096_v43 = vor.u32 %v1095_v40, %v1092_v39  ;;  %v1108_v14 = vshrl.u32 %v3529_v54, 16  ;;  %v2472_v24 = vld [vmem:[%s4075_s1 + $0xe] sm:$0x3]  ;;  %v3630_v40 = vld [vmem:[%s3218_s27 + $0x30] sm:$0xff]  }
  0x7b   : > { %v878_v52 = vsel %vm624_vm4, %v875_v13, %v877_v10 }
  0x7c   : > { %v1060_v0 = vor.u32 %v1059_v61, %v1056_v60  ;;  %v1110_v58 = vrot.slane %v1108_v14, 1  ;;  %v3543_v61 = vld [vmem:[%s3218_s27 + $0x48] sm:$0xff]  }
  0x7e   : > { %v1061_v8 = vsel %vm1044_vm6, %v1052_v63, %v1060_v0  ;;  %v1070_v20 = vsel %vm1044_vm6, %v1060_v0, %v1069_v17  ;;  %v1120_v63 = vshll.u32 %v3543_v61, 16  ;;  %v881_v0 = vrot.slane %v3543_v61, 1 }
  0x7f   : > { %v883_v17 = vrot.slane %v3086_v9, 1 }
  0x80   : > { %2749 = vmatmul.mubr.msk.bf16.gmra.mrb[48].mxu1 %vm355_vm3, %v3276_v38  ;;  %v1341_v38 = vsel %vm383_vm0, %v2441_v57, 0 }
  0x81   : > { %2783 = vmatmul.mubr.msk.bf16.gmra.mrb[48].mxu0 %vm355_vm3, %v641_v11  ;;  %2792 = vmatprep.mubr.msk.bf16.mxu1 %vm3142_vm1, %v3141_v1  ;;  %v1101_v11 = vrot.slane %v1099_v46, 1 }
  0x82   : > { %2786 = vmatprep.mubr.msk.bf16.mxu0 %vm3142_vm1, %v3141_v1 }
  0x83   : > { %v1105_v55 = vor.u32 %v1104_v51, %v1101_v11 }
  0x85   : > { %v1106_v57 = vsel %vm1044_vm6, %v1096_v43, %v1105_v55 }
  0x88   : > { %2793 = vmatmul.mubr.msk.bf16.vlgmr.msra.gmra.mrb[52].mxu1 %vm355_vm3, %v868_v62  ;;  %v1114_v62 = vor.u32 %v1113_v59, %v1110_v58  ;;  %v1307_v58 = vrot.slane %v3529_v54, 2 }
  0x89   : > { %2787 = vmatmul.mubr.msk.bf16.gmra.mrb[52].mxu0 %vm355_vm3, %v3299_v53  ;;  %2867 = vmatpush3.bf16.msra.mxu1 %v1341_v38  ;;  %v869_v53 = vrot.slane %v3364_v28, 1  ;;  %v1086_v28 = vrot.slane %v1084_v25, 2  ;;  %v1117_v38 = vshrl.u32 %v3543_v61, 16 }
  0x8a   : > { %2830 = vmatprep.mubr.msk.bf16.mxu0 %vm3142_vm1, %v3141_v1  ;;  %2796 = vmatprep.mubr.msk.bf16.mxu1 %vm3142_vm1, %v3141_v1  ;;  %v1115_v2 = vsel %vm1044_vm6, %v1105_v55, %v1114_v62 }
  0x8b   : > { %2942 = vmatprep.subr.bf16.mxu1 %v3141_v1  ;;  %v870_v16 = vsel %vm624_vm4, %v867_v49, %v869_v53  ;;  %v872_v22 = vsel %vm624_vm4, %v869_v53, %v871_v19  ;;  %v1087_v31 = vor.u32 %v1086_v28, %v1083_v6  ;;  %v879_v49 = vrot.slane %v3529_v54, 1 }
  0x8c   : > { %v1119_v3 = vrot.slane %v1117_v38, 1  ;;  %v1122_v53 = vrot.slane %v1120_v63, 2  ;;  %v1536_v28 = vrot.slane %v3588_v26, 2 }
  0x8d   : > { %v1088_v36 = vsel %vm1044_vm6, %v1078_v23, %v1087_v31  ;;  %v1097_v50 = vsel %vm1044_vm6, %v1087_v31, %v1096_v43  ;;  %v880_v60 = vsel %vm624_vm4, %v877_v10, %v879_v49  ;;  %v3642_v43 = vld [vmem:[%s3218_s27 + $0x38] sm:$0xff]  }
  0x8e   : > { %v1123_v12 = vor.u32 %v1122_v53, %v1119_v3  ;;  %v1544_v46 = vrot.slane %v3642_v43, 2 }
  0x90   : > { %2797 = vmatmul.mubr.msk.bf16.gmra.mrb[56].mxu1 %vm355_vm3, %v870_v16  ;;  %v1129_v16 = vshll.u32 %v3556_v7, 16  ;;  %v1124_v18 = vsel %vm1044_vm6, %v1114_v62, %v1123_v12  ;;  %v3684_v62 = vld [vmem:[%s3218_s27 + $0x48] sm:$0xff]  }
  0x91   : > { %2831 = vmatmul.mubr.msk.bf16.vlgmr.msra.gmra.mrb[56].mxu0 %vm355_vm3, %v1061_v8  ;;  %2800 = vmatprep.mubr.msk.bf16.mxu1 %vm3142_vm1, %v3141_v1  ;;  %v882_v8 = vsel %vm624_vm4, %v879_v49, %v881_v0  ;;  %v1548_v54 = vrot.slane %v3684_v62, 2 }
  0x92   : > { %2905 = vmatpush3.bf16.msra.mxu0 %v1582_v15  ;;  %2834 = vmatprep.mubr.msk.bf16.mxu0 %vm3142_vm1, %v3141_v1  ;;  %v1126_v15 = vshrl.u32 %v3556_v7, 16  ;;  %v1131_v19 = vrot.slane %v1129_v16, 2 }
  0x93   : > { %2980 = vmatprep.subr.bf16.mxu0 %v3141_v1 }
  0x94   : > { %v1128_v4 = vrot.slane %v1126_v15, 1 }
  0x96   : > { %v1132_v5 = vor.u32 %v1131_v19, %v1128_v4 }
  0x98   : > { %2801 = vmatmul.mubr.msk.bf16.gmra.mrb[60].mxu1 %vm355_vm3, %v872_v22  ;;  %v3576_v22 = vld [vmem:[%s3218_s27 + $0x14] sm:$0xf]  ;;  %v1133_v23 = vsel %vm1044_vm6, %v1123_v12, %v1132_v5 }
  0x99   : > { %2835 = vmatmul.mubr.msk.bf16.gmra.mrb[60].mxu0 %vm355_vm3, %v1070_v20  ;;  %2804 = vmatprep.mubr.msk.bf16.mxu1 %vm3142_vm1, %v3141_v1  ;;  %v884_v20 = vsel %vm624_vm4, %v881_v0, %v883_v17  ;;  %v3585_v25 = vcombine.low %v1466_v21, %v3576_v22  ;;  %v3705_v17 = vld [vmem:[%s3218_s27 + $0x50] sm:$0xff]   ;;  %v1311_v21 = vrot.slane %v3556_v7, 2 }
  0x9a   : > { %2838 = vmatprep.mubr.msk.bf16.mxu0 %vm3142_vm1, %v3141_v1 }
  0x9b   : > { %v1535_v6 = vrot.slane %v3585_v25, 2 }
  0x9d   : > { %v1537_v31 = vsel %vm1293_vm5, %v1535_v6, %v1536_v28  ;;  %v1723_v6 = vshrl.u32 %v3588_v26, 16 }
  0xa0   : > { %2805 = vmatmul.mubr.msk.bf16.gmra.mrb[64].mxu1 %vm355_vm3, %v874_v30  ;;  %v2483_v30 = vld [vmem:[%s4075_s1 + $0x10] sm:$0x3] }
  0xa1   : > { %2839 = vmatmul.mubr.msk.bf16.gmra.mrb[64].mxu0 %vm355_vm3, %v1079_v27  ;;  %2808 = vmatprep.mubr.msk.bf16.mxu1 %vm3142_vm1, %v3141_v1  ;;  %v1831_v27 = vsel %vm383_vm0, %v2472_v24, 0  ;;  %v2010_v35 = vsel %vm383_vm0, %v2483_v30, 0  ;;  %v1715_v24 = vshrl.u32 %v3585_v25, 16 }
  0xa2   : > { %2842 = vmatprep.mubr.msk.bf16.mxu0 %vm3142_vm1, %v3141_v1 }
  0xa8   : > { %2809 = vmatmul.mubr.msk.bf16.gmra.mrb[68].mxu1 %vm355_vm3, %v876_v32  ;;  %v1542_v32 = vrot.slane %v3630_v40, 2 }
  0xa9   : > { %2843 = vmatmul.mubr.msk.bf16.gmra.mrb[68].mxu0 %vm355_vm3, %v1088_v36  ;;  %2812 = vmatprep.mubr.msk.bf16.mxu1 %vm3142_vm1, %v3141_v1  ;;  %v3618_v36 = vld [vmem:[%s3218_s27 + $0x28] sm:$0xff]  }
  0xaa   : > { %2846 = vmatprep.mubr.msk.bf16.mxu0 %vm3142_vm1, %v3141_v1  ;;  %v1540_v39 = vrot.slane %v3618_v36, 2  ;;  %v1545_v51 = vsel %vm1293_vm5, %v1542_v32, %v1544_v46 }
  0xb0   : > { %2813 = vmatmul.mubr.msk.bf16.gmra.mrb[72].mxu1 %vm355_vm3, %v878_v52  ;;  %v3661_v52 = vld [vmem:[%s3218_s27 + $0x40] sm:$0xff]  }
  0xb1   : > { %2847 = vmatmul.mubr.msk.bf16.gmra.mrb[72].mxu0 %vm355_vm3, %v1097_v50  ;;  %2816 = vmatprep.mubr.msk.bf16.mxu1 %vm3142_vm1, %v3141_v1  ;;  %v1546_v49 = vrot.slane %v3661_v52, 2 }
  0xb2   : > { %2850 = vmatprep.mubr.msk.bf16.mxu0 %vm3142_vm1, %v3141_v1 }
  0xb3   : > { %v1549_v16 = vsel %vm1293_vm5, %v1546_v49, %v1548_v54 }
  0xb8   : > { %2817 = vmatmul.mubr.msk.bf16.gmra.mrb[76].mxu1 %vm355_vm3, %v880_v60  ;;  %v1547_v60 = vsel %vm1293_vm5, %v1544_v46, %v1546_v49  ;;  %v1725_v46 = vrot.slane %v1723_v6, 2  ;;  %v1732_v49 = vshrl.u32 %v3605_v34, 16 }
  0xb9   : > { %2851 = vmatmul.mubr.msk.bf16.gmra.mrb[76].mxu0 %vm355_vm3, %v1106_v57  ;;  %2820 = vmatprep.mubr.msk.bf16.mxu1 %vm3142_vm1, %v3141_v1 }
  0xba   : > { %2854 = vmatprep.mubr.msk.bf16.mxu0 %vm3142_vm1, %v3141_v1 }
  0xc0   : > { %2821 = vmatmul.mubr.msk.bf16.gmra.mrb[80].mxu1 %vm355_vm3, %v882_v8  ;;  %v1309_v8 = vrot.slane %v3543_v61, 2  ;;  %v1550_v61 = vrot.slane %v3705_v17, 2 }
  0xc1   : > { %2855 = vmatmul.mubr.msk.bf16.gmra.mrb[80].mxu0 %vm355_vm3, %v1115_v2  ;;  %2824 = vmatprep.mubr.msk.bf16.mxu1 %vm3142_vm1, %v3141_v1 }
  0xc2   : > { %2858 = vmatprep.mubr.msk.bf16.mxu0 %vm3142_vm1, %v3141_v1  ;;  %v1551_v7 = vsel %vm1293_vm5, %v1548_v54, %v1550_v61 }
  0xc8   : > { %2825 = vmatmul.mubr.msk.bf16.gmra.mrb[84].mxu1 %vm355_vm3, %v884_v20  ;;  %v1310_v20 = vsel %vm1293_vm5, %v1307_v58, %v1309_v8 }
  0xc9   : > { %2859 = vmatmul.mubr.msk.bf16.gmra.mrb[84].mxu0 %vm355_vm3, %v1124_v18  ;;  %2868 = vmatprep.mubr.msk.bf16.mxu1 %vm3142_vm1, %v3141_v1 }
  0xca   : > { %2862 = vmatprep.mubr.msk.bf16.mxu0 %vm3142_vm1, %v3141_v1 }
  0xd0   : > { %2869 = vmatmul.mubr.msk.bf16.vlgmr.msra.gmra.mrb[88].mxu1 %vm355_vm3, %v3367_v29  ;;  %v1538_v29 = vrot.slane %v3605_v34, 2 }
  0xd1   : > { %2863 = vmatmul.mubr.msk.bf16.gmra.mrb[88].mxu0 %vm355_vm3, %v1133_v23  ;;  %2943 = vmatpush3.bf16.msra.mxu1 %v1831_v27  ;;  %v1718_v27 = vshll.u32 %v3585_v25, 16  ;;  %v1717_v25 = vrot.slane %v1715_v24, 2  ;;  %v1741_v24 = vshrl.u32 %v3618_v36, 16 }
  0xd2   : > { %2906 = vmatprep.mubr.msk.bf16.mxu0 %vm3142_vm1, %v3141_v1  ;;  %2872 = vmatprep.mubr.msk.bf16.mxu1 %vm3142_vm1, %v3141_v1  ;;  %v1539_v13 = vsel %vm1293_vm5, %v1536_v28, %v1538_v29  ;;  %v1726_v28 = vshll.u32 %v3588_v26, 16 }
  0xd8   : > { %2873 = vmatmul.mubr.msk.bf16.gmra.mrb[92].mxu1 %vm355_vm3, %v3376_v33  ;;  %v1541_v33 = vsel %vm1293_vm5, %v1538_v29, %v1540_v39  ;;  %v3098_v29 = vld [vmem:[%s3218_s27 + $0x58] ss:$0 sps:$4 sm:$0x33]  }
  0xd9   : > { %2907 = vmatmul.mubr.msk.bf16.vlgmr.msra.gmra.mrb[92].mxu0 %vm355_vm3, %v1537_v31  ;;  %2876 = vmatprep.mubr.msk.bf16.mxu1 %vm3142_vm1, %v3141_v1 }
  0xda   : > { %2981 = vmatpush3.bf16.msra.mxu0 %v2010_v35  ;;  %2910 = vmatprep.mubr.msk.bf16.mxu0 %vm3142_vm1, %v3141_v1 }
  0xe0   : > { %2877 = vmatmul.mubr.msk.bf16.gmra.mrb[96].mxu1 %vm355_vm3, %v3392_v37  ;;  %v1543_v37 = vsel %vm1293_vm5, %v1540_v39, %v1542_v32 }
  0xe1   : > { %2911 = vmatmul.mubr.msk.bf16.gmra.mrb[96].mxu0 %vm355_vm3, %v1539_v13  ;;  %2880 = vmatprep.mubr.msk.bf16.mxu1 %vm3142_vm1, %v3141_v1 }
  0xe2   : > { %2914 = vmatprep.mubr.msk.bf16.mxu0 %vm3142_vm1, %v3141_v1 }
  0xe8   : > { %2881 = vmatmul.mubr.msk.bf16.gmra.mrb[100].mxu1 %vm355_vm3, %v3408_v42  ;;  %v1305_v42 = vrot.slane %v3515_v41, 2 }
  0xe9   : > { %2915 = vmatmul.mubr.msk.bf16.gmra.mrb[100].mxu0 %vm355_vm3, %v1541_v33  ;;  %2884 = vmatprep.mubr.msk.bf16.mxu1 %vm3142_vm1, %v3141_v1  ;;  %v1312_v33 = vsel %vm1293_vm5, %v1309_v8, %v1311_v21 }
  0xea   : > { %2918 = vmatprep.mubr.msk.bf16.mxu0 %vm3142_vm1, %v3141_v1  ;;  %v1306_v56 = vsel %vm1293_vm5, %v1303_v45, %v1305_v42  ;;  %v1308_v2 = vsel %vm1293_vm5, %v1305_v42, %v1307_v58  ;;  %v1728_v42 = vrot.slane %v1726_v28, 3  ;;  %v1735_v58 = vshll.u32 %v3605_v34, 16 }
  0xf0   : > { %2885 = vmatmul.mubr.msk.bf16.gmra.mrb[104].mxu1 %vm355_vm3, %v3426_v47 }
  0xf1   : > { %2919 = vmatmul.mubr.msk.bf16.gmra.mrb[104].mxu0 %vm355_vm3, %v1543_v37  ;;  %2888 = vmatprep.mubr.msk.bf16.mxu1 %vm3142_vm1, %v3141_v1  ;;  %v1720_v37 = vrot.slane %v1718_v27, 3 }
  0xf2   : > { %2922 = vmatprep.mubr.msk.bf16.mxu0 %vm3142_vm1, %v3141_v1 }
  0xf3   : > { %v3657_v11 = vpop.f32.mrb[0].mxu1 }
  0xf4   : > { %v3650_v48 = vpop.f32.mrb[0].mxu0  ;;  %v2700_v14 = vpop.f32.mrb[1].mxu1 }
  0xf5   : > { %v2680_v10 = vpop.f32.mrb[1].mxu0  ;;  %v3663_v47 = vpop.f32.mrb[2].mxu1 }
  0xf6   : > { %v3655_v50 = vpop.f32.mrb[2].mxu0  ;;  %v2701_v41 = vpop.f32.mrb[3].mxu1 }
  0xf7   : > { %v2681_v55 = vpop.f32.mrb[3].mxu0  ;;  %v1729_v41 = vor.u32 %v1728_v42, %v1725_v46 }
  0xf8   : > { %2889 = vmatmul.mubr.msk.bf16.gmra.mrb[108].mxu1 %vm355_vm3, %v1306_v56  ;;  %v1956_v55 = vld [vmem:[%s3218_s27 + $0x10] sm:$0x8]  ;;  %v1721_v56 = vor.u32 %v1720_v37, %v1717_v25  ;;  %v1743_v37 = vrot.slane %v1741_v24, 2 }
  0xf9   : > { %2923 = vmatmul.mubr.msk.bf16.gmra.mrb[108].mxu0 %vm355_vm3, %v1545_v51  ;;  %2892 = vmatprep.mubr.msk.bf16.mxu1 %vm3142_vm1, %v3141_v1  ;;  %v1552_v51 = vrot.slane %v3098_v29, 2 }
  0xfa   : > { %2926 = vmatprep.mubr.msk.bf16.mxu0 %vm3142_vm1, %v3141_v1 }
  0xfb   : > { %v3680_v45 = vpop.f32.mrb[4].mxu1 }
  0xfc   : > { %v3673_v57 = vpop.f32.mrb[4].mxu0  ;;  %v2704_v63 = vpop.f32.mrb[5].mxu1 }
  0xfd   : > { %v2684_v44 = vpop.f32.mrb[5].mxu0  ;;  %v3686_v0 = vpop.f32.mrb[6].mxu1  ;;  %v1553_v63 = vsel %vm1293_vm5, %v1550_v61, %v1552_v51  ;;  %v1966_v51 = vrot.slane %v3605_v34, 3 }
  0xfe   : > { %v3678_v59 = vpop.f32.mrb[6].mxu0  ;;  %v2705_v3 = vpop.f32.mrb[7].mxu1 }
  0xff   : > { %v2685_v38 = vpop.f32.mrb[7].mxu0 }
 0x100   : > { %2893 = vmatmul.mubr.msk.bf16.gmra.mrb[112].mxu1 %vm355_vm3, %v1308_v2  ;;  %v2484_v2 = vcombine.low %v1956_v55, %v3576_v22  ;;  %v1964_v22 = vrot.slane %v3588_v26, 3 }
 0x101   : > { %2927 = vmatmul.mubr.msk.bf16.gmra.mrb[112].mxu0 %vm355_vm3, %v1547_v60  ;;  %2896 = vmatprep.mubr.msk.bf16.mxu1 %vm3142_vm1, %v3141_v1 }
 0x102   : > { %2930 = vmatprep.mubr.msk.bf16.mxu0 %vm3142_vm1, %v3141_v1  ;;  %v1963_v61 = vrot.slane %v2484_v2, 3 }
 0x103   : > { %v3701_v15 = vpop.f32.mrb[8].mxu1 }
 0x104   : > { %v3694_v53 = vpop.f32.mrb[8].mxu0  ;;  %v2708_v4 = vpop.f32.mrb[9].mxu1 }
 0x105   : > { %v2688_v9 = vpop.f32.mrb[9].mxu0  ;;  %v3707_v19 = vpop.f32.mrb[10].mxu1  ;;  %v1737_v4 = vrot.slane %v1735_v58, 3 }
 0x106   : > { %v3699_v12 = vpop.f32.mrb[10].mxu0  ;;  %v2709_v5 = vpop.f32.mrb[11].mxu1 }
 0x107   : > { %v2689_v18 = vpop.f32.mrb[11].mxu0 }
 0x108   : > { %2897 = vmatmul.mubr.msk.bf16.gmra.mrb[116].mxu1 %vm355_vm3, %v1310_v20  ;;  %v1734_v18 = vrot.slane %v1732_v49, 2 }
 0x109   : > { %2931 = vmatmul.mubr.msk.bf16.gmra.mrb[116].mxu0 %vm355_vm3, %v1549_v16  ;;  %2900 = vmatprep.mubr.msk.bf16.mxu1 %vm3142_vm1, %v3141_v1  ;;  %v1730_v16 = vsel %vm1713_vm7, %v1721_v56, %v1729_v41  ;;  %v1750_v56 = vshrl.u32 %v3630_v40, 16 }
 0x10a   : > { %2934 = vmatprep.mubr.msk.bf16.mxu0 %vm3142_vm1, %v3141_v1  ;;  %v1738_v21 = vor.u32 %v1737_v4, %v1734_v18 }
 0x10b   : > { %v3726_v35 = vpop.f32.mrb[12].mxu1 }
 0x10c   : > { %v3716_v23 = vpop.f32.mrb[12].mxu0  ;;  %v2712_v39 = vpop.f32.mrb[13].mxu1  ;;  %v1739_v25 = vsel %vm1713_vm7, %v1729_v41, %v1738_v21  ;;  %v1753_v41 = vshll.u32 %v3630_v40, 16 }
 0x10d   : > { %v2692_v30 = vpop.f32.mrb[13].mxu0  ;;  %v3731_v32 = vpop.f32.mrb[14].mxu1 }
 0x10e   : > { %v3724_v31 = vpop.f32.mrb[14].mxu0  ;;  %v2713_v10 = vpop.f32.mrb[15].mxu1 }
 0x10f   : > { %v2693_v13 = vpop.f32.mrb[15].mxu0 }
 0x110   : > { %2901 = vmatmul.mubr.msk.bf16.gmra.mrb[120].mxu1 %vm355_vm3, %v1312_v33 }
 0x111   : > { %2935 = vmatmul.mubr.msk.bf16.gmra.mrb[120].mxu0 %vm355_vm3, %v1551_v7  ;;  %2944 = vmatprep.mubr.msk.bf16.mxu1 %vm3142_vm1, %v3141_v1  ;;  %v1965_v7 = vsel %vm1962_vm8, %v1963_v61, %v1964_v22  ;;  %v1759_v61 = vshrl.u32 %v3642_v43, 16 }
 0x112   : > { %2938 = vmatprep.mubr.msk.bf16.mxu0 %vm3142_vm1, %v3141_v1 }
 0x113   : > { %v547_v60 = vpop.f32.mrb[16].mxu1 }
 0x114   : > { %v3738_v14 = vpop.f32.mrb[16].mxu0  ;;  %v548_v3 = vadd.f32 %v547_v60, %v3650_v48  ;;  %v2718_v54 = vpop.f32.mrb[17].mxu1  ;;  %v1967_v60 = vsel %vm1962_vm8, %v1964_v22, %v1966_v51  ;;  %v1762_v22 = vshll.u32 %v3642_v43, 16 }
 0x115   : > { %v2696_v44 = vpop.f32.mrb[17].mxu0  ;;  %v550_v9 = vpop.f32.mrb[18].mxu1 }
 0x116   : > { %v3744_v38 = vpop.f32.mrb[18].mxu0  ;;  %v551_v20 = vadd.f32 %v550_v9, %v3655_v50  ;;  %v2719_v5 = vpop.f32.mrb[19].mxu1  ;;  %v1744_v50 = vshll.u32 %v3618_v36, 16  ;;  %v1752_v9 = vrot.slane %v1750_v56, 2 }
 0x117   : > { %v2697_v8 = vpop.f32.mrb[19].mxu0 }
 0x118   : > { %2945 = vmatmul.mubr.msk.bf16.vlgmr.msra.gmra.mrb[124].mxu1 %vm355_vm3, %v1730_v16  ;;  %v1746_v46 = vrot.slane %v1744_v50, 3  ;;  %v1755_v16 = vrot.slane %v1753_v41, 3 }
 0x119   : > { %2939 = vmatmul.mubr.msk.bf16.gmra.mrb[124].mxu0 %vm355_vm3, %v1553_v63  ;;  %2948 = vmatprep.mubr.msk.bf16.mxu1 %vm3142_vm1, %v3141_v1 }
 0x11a   : > { %2982 = vmatprep.mubr.msk.bf16.mxu0 %vm3142_vm1, %v3141_v1  ;;  %v1747_v55 = vor.u32 %v1746_v46, %v1743_v37  ;;  %v1756_v5 = vor.u32 %v1755_v16, %v1752_v9  ;;  %v1970_v37 = vrot.slane %v3630_v40, 3  ;;  %v1777_v16 = vshrl.u32 %v3684_v62, 16 }
 0x11b   : > { %v555_v28 = vpop.f32.mrb[20].mxu1 }
 0x11c   : > { %v708_v48 = vpop.f32.mrb[20].mxu0  ;;  %v556_v26 = vadd.f32 %v555_v28, %v3673_v57  ;;  %v2722_v29 = vpop.f32.mrb[21].mxu1  ;;  %v1748_v8 = vsel %vm1713_vm7, %v1738_v21, %v1747_v55 }
 0x11d   : > { %v3760_v27 = vadd.f32 %v708_v48, %v548_v3  ;;  %v2756_v6 = vpop.f32.mrb[21].mxu0  ;;  %v558_v33 = vpop.f32.mrb[22].mxu1  ;;  %v1761_v29 = vrot.slane %v1759_v61, 2 }
 0x11e   : > { %v711_v30 = vpop.f32.mrb[22].mxu0  ;;  %v559_v42 = vadd.f32 %v558_v33, %v3678_v59  ;;  %v2723_v10 = vpop.f32.mrb[23].mxu1 }
 0x11f   : > { %v3764_v13 = vadd.f32 %v711_v30, %v551_v20  ;;  %v2757_v39 = vpop.f32.mrb[23].mxu0  ;;  %v1968_v20 = vrot.slane %v3618_v36, 3  ;;  %v1771_v10 = vshll.u32 %v3661_v52, 16 }
 0x120   : > { %2949 = vmatmul.mubr.msk.bf16.gmra.mrb[128].mxu1 %vm355_vm3, %v1739_v25  ;;  %v1764_v39 = vrot.slane %v1762_v22, 3 }
 0x121   : > { %2983 = vmatmul.mubr.msk.bf16.vlgmr.msra.gmra.mrb[128].mxu0 %vm355_vm3, %v1965_v7  ;;  %2952 = vmatprep.mubr.msk.bf16.mxu1 %vm3142_vm1, %v3141_v1  ;;  %v1969_v50 = vsel %vm1962_vm8, %v1966_v51, %v1968_v20  ;;  %v1971_v56 = vsel %vm1962_vm8, %v1968_v20, %v1970_v37 }
 0x122   : > { %2986 = vmatprep.mubr.msk.bf16.mxu0 %vm3142_vm1, %v3141_v1  ;;  %v1765_v46 = vor.u32 %v1764_v39, %v1761_v29  ;;  %v1786_v29 = vshrl.u32 %v3705_v17, 16 }
 0x123   : > { %v563_v58 = vpop.f32.mrb[24].mxu1 }
 0x124   : > { %v716_v57 = vpop.f32.mrb[24].mxu0  ;;  %v564_v34 = vadd.f32 %v563_v58, %v3694_v53  ;;  %v2726_v63 = vpop.f32.mrb[25].mxu1 }
 0x125   : > { %v3777_v59 = vadd.f32 %v716_v57, %v556_v26  ;;  %v2760_v49 = vpop.f32.mrb[25].mxu0  ;;  %v566_v54 = vpop.f32.mrb[26].mxu1  ;;  %v1757_v26 = vsel %vm1713_vm7, %v1747_v55, %v1756_v5  ;;  %v1773_v63 = vrot.slane %v1771_v10, 3 }
 0x126   : > { %v719_v44 = vpop.f32.mrb[26].mxu0  ;;  %v567_v18 = vadd.f32 %v566_v54, %v3699_v12  ;;  %v2727_v4 = vpop.f32.mrb[27].mxu1 }
 0x127   : > { %v3781_v2 = vadd.f32 %v719_v44, %v559_v42  ;;  %v2761_v3 = vpop.f32.mrb[27].mxu0  ;;  %v1768_v42 = vshrl.u32 %v3661_v52, 16 }
 0x128   : > { %2953 = vmatmul.mubr.msk.bf16.gmra.mrb[132].mxu1 %vm355_vm3, %v1748_v8  ;;  %v1972_v8 = vrot.slane %v3642_v43, 3 }
 0x129   : > { %2987 = vmatmul.mubr.msk.bf16.gmra.mrb[132].mxu0 %vm355_vm3, %v1967_v60  ;;  %2956 = vmatprep.mubr.msk.bf16.mxu1 %vm3142_vm1, %v3141_v1  ;;  %v1766_v60 = vsel %vm1713_vm7, %v1756_v5, %v1765_v46 }
 0x12a   : > { %2990 = vmatprep.mubr.msk.bf16.mxu0 %vm3142_vm1, %v3141_v1  ;;  %v1973_v5 = vsel %vm1962_vm8, %v1970_v37, %v1972_v8 }
 0x12b   : > { %v571_v21 = vpop.f32.mrb[28].mxu1 }
 0x12c   : > { %v724_v53 = vpop.f32.mrb[28].mxu0  ;;  %v572_v36 = vadd.f32 %v571_v21, %v3716_v23  ;;  %v2730_v6 = vpop.f32.mrb[29].mxu1 }
 0x12d   : > { %v3794_v12 = vadd.f32 %v724_v53, %v564_v34  ;;  %v2764_v48 = vpop.f32.mrb[29].mxu0  ;;  %v574_v7 = vpop.f32.mrb[30].mxu1  ;;  %v1770_v34 = vrot.slane %v1768_v42, 2 }
 0x12e   : > { %v727_v24 = vpop.f32.mrb[30].mxu0  ;;  %v575_v33 = vadd.f32 %v574_v7, %v3724_v31  ;;  %v2731_v25 = vpop.f32.mrb[31].mxu1  ;;  %v1974_v7 = vrot.slane %v3661_v52, 3 }
 0x12f   : > { %v3798_v28 = vadd.f32 %v727_v24, %v567_v18  ;;  %v2765_v30 = vpop.f32.mrb[31].mxu0  ;;  %v1774_v9 = vor.u32 %v1773_v63, %v1770_v34  ;;  %v1780_v18 = vshll.u32 %v3684_v62, 16 }
 0x130   : > { %2957 = vmatmul.mubr.msk.bf16.gmra.mrb[136].mxu1 %vm355_vm3, %v1757_v26 }
 0x131   : > { %2991 = vmatmul.mubr.msk.bf16.gmra.mrb[136].mxu0 %vm355_vm3, %v1969_v50  ;;  %2960 = vmatprep.mubr.msk.bf16.mxu1 %vm3142_vm1, %v3141_v1  ;;  %v1775_v24 = vsel %vm1713_vm7, %v1765_v46, %v1774_v9  ;;  %v1779_v50 = vrot.slane %v1777_v16, 2 }
 0x132   : > { %2994 = vmatprep.mubr.msk.bf16.mxu0 %vm3142_vm1, %v3141_v1 }
 0x133   : > { %v579_v57 = vpop.f32.mrb[32].mxu1 }
 0x134   : > { %v732_v23 = vpop.f32.mrb[32].mxu0  ;;  %v580_v40 = vadd.f32 %v579_v57, %v3738_v14  ;;  %v2734_v41 = vpop.f32.mrb[33].mxu1 }
 0x135   : > { %v3811_v31 = vadd.f32 %v732_v23, %v572_v36  ;;  %v2768_v51 = vpop.f32.mrb[33].mxu0  ;;  %v582_v44 = vpop.f32.mrb[34].mxu1  ;;  %v1782_v36 = vrot.slane %v1780_v18, 3  ;;  %v1975_v23 = vsel %vm1962_vm8, %v1972_v8, %v1974_v7 }
 0x136   : > { %v735_v55 = vpop.f32.mrb[34].mxu0  ;;  %v583_v3 = vadd.f32 %v582_v44, %v3744_v38  ;;  %v2735_v54 = vpop.f32.mrb[35].mxu1 }
 0x137   : > { %v3815_v49 = vadd.f32 %v735_v55, %v575_v33  ;;  %v2769_v58 = vpop.f32.mrb[35].mxu0  ;;  %v1783_v26 = vor.u32 %v1782_v36, %v1779_v50  ;;  %v1788_v55 = vrot.slane %v1786_v29, 2 }
 0x138   : > { %2961 = vmatmul.mubr.msk.bf16.gmra.mrb[140].mxu1 %vm355_vm3, %v1766_v60 }
 0x139   : > { %2995 = vmatmul.mubr.msk.bf16.gmra.mrb[140].mxu0 %vm355_vm3, %v1971_v56  ;;  %2964 = vmatprep.mubr.msk.bf16.mxu1 %vm3142_vm1, %v3141_v1  ;;  %v1784_v57 = vsel %vm1713_vm7, %v1774_v9, %v1783_v26 }
 0x13a   : > { %2998 = vmatprep.mubr.msk.bf16.mxu0 %vm3142_vm1, %v3141_v1 }
 0x13b   : > { %v587_v20 = vpop.f32.mrb[36].mxu1 }
 0x13c   : > { %v740_v14 = vpop.f32.mrb[36].mxu0  ;;  %v588_v43 = vadd.f32 %v587_v20, %v3657_v11  ;;  %v2738_v61 = vpop.f32.mrb[37].mxu1 }
 0x13d   : > { %v3828_v38 = vadd.f32 %v740_v14, %v580_v40  ;;  %v2772_v4 = vpop.f32.mrb[37].mxu0  ;;  %v590_v21 = vpop.f32.mrb[38].mxu1  ;;  %v3100_v40 = vld [vmem:[%s3218_s27 + $0x58] ss:$0 sps:$4 sm:$0x77]  }
 0x13e   : > { %v743_v53 = vpop.f32.mrb[38].mxu0  ;;  %v591_v6 = vadd.f32 %v590_v21, %v3663_v47  ;;  %v2739_v30 = vpop.f32.mrb[39].mxu1  ;;  %v1789_v47 = vshll.u32 %v3705_v17, 16  ;;  %v1795_v34 = vshrl.u32 %v3100_v40, 16  ;;  %v1798_v63 = vshll.u32 %v3100_v40, 16 }
 0x13f   : > { %v3832_v22 = vadd.f32 %v743_v53, %v583_v3  ;;  %v2773_v48 = vpop.f32.mrb[39].mxu0 }
 0x140   : > { %2965 = vmatmul.mubr.msk.bf16.gmra.mrb[144].mxu1 %vm355_vm3, %v1775_v24  ;;  %v1791_v56 = vrot.slane %v1789_v47, 3  ;;  %v1797_v53 = vrot.slane %v1795_v34, 2  ;;  %v1978_v48 = vrot.slane %v3705_v17, 3 }
 0x141   : > { %2999 = vmatmul.mubr.msk.bf16.gmra.mrb[144].mxu0 %vm355_vm3, %v1973_v5  ;;  %2968 = vmatprep.mubr.msk.bf16.mxu1 %vm3142_vm1, %v3141_v1  ;;  %v1800_v5 = vrot.slane %v1798_v63, 3 }
 0x142   : > { %3002 = vmatprep.mubr.msk.bf16.mxu0 %vm3142_vm1, %v3141_v1  ;;  %v1792_v60 = vor.u32 %v1791_v56, %v1788_v55 }
 0x143   : > { %v595_v25 = vpop.f32.mrb[40].mxu1  ;;  %v1801_v21 = vor.u32 %v1800_v5, %v1797_v53 }
 0x144   : > { %v748_v11 = vpop.f32.mrb[40].mxu0  ;;  %v596_v52 = vadd.f32 %v595_v25, %v3680_v45  ;;  %v2742_v46 = vpop.f32.mrb[41].mxu1  ;;  %v1976_v45 = vrot.slane %v3684_v62, 3  ;;  %v1793_v20 = vsel %vm1713_vm7, %v1783_v26, %v1792_v60  ;;  %v1980_v25 = vrot.slane %v3100_v40, 3 }
 0x145   : > { %v3845_v39 = vadd.f32 %v748_v11, %v588_v43  ;;  %v2776_v33 = vpop.f32.mrb[41].mxu0  ;;  %v598_v51 = vpop.f32.mrb[42].mxu1  ;;  %v1802_v29 = vsel %vm1713_vm7, %v1792_v60, %v1801_v21 }
 0x146   : > { %v751_v37 = vpop.f32.mrb[42].mxu0  ;;  %v599_v41 = vadd.f32 %v598_v51, %v3686_v0  ;;  %v2743_v58 = vpop.f32.mrb[43].mxu1  ;;  %v1977_v14 = vsel %vm1962_vm8, %v1974_v7, %v1976_v45 }
 0x147   : > { %v3849_v42 = vadd.f32 %v751_v37, %v591_v6  ;;  %v2777_v10 = vpop.f32.mrb[43].mxu0  ;;  %v1979_v6 = vsel %vm1962_vm8, %v1976_v45, %v1978_v48 }
 0x148   : > { %2969 = vmatmul.mubr.msk.bf16.gmra.mrb[148].mxu1 %vm355_vm3, %v1784_v57  ;;  %v1981_v10 = vsel %vm1962_vm8, %v1978_v48, %v1980_v25 }
 0x149   : > { %3003 = vmatmul.mubr.msk.bf16.gmra.mrb[148].mxu0 %vm355_vm3, %v1975_v23  ;;  %2972 = vmatprep.mubr.msk.bf16.mxu1 %vm3142_vm1, %v3141_v1 }
 0x14a   : > { %3006 = vmatprep.mubr.msk.bf16.mxu0 %vm3142_vm1, %v3141_v1 }
 0x14b   : > { %v603_v54 = vpop.f32.mrb[44].mxu1 }
 0x14c   : > { %v756_v44 = vpop.f32.mrb[44].mxu0  ;;  %v604_v9 = vadd.f32 %v603_v54, %v3701_v15  ;;  %v2746_v16 = vpop.f32.mrb[45].mxu1 }
 0x14d   : > { %v3861_v3 = vadd.f32 %v756_v44, %v596_v52  ;;  %v2780_v0 = vpop.f32.mrb[45].mxu0  ;;  %v606_v4 = vpop.f32.mrb[46].mxu1 }
 0x14e   : > { %v759_v8 = vpop.f32.mrb[46].mxu0  ;;  %v607_v43 = vadd.f32 %v606_v4, %v3707_v19  ;;  %v2747_v61 = vpop.f32.mrb[47].mxu1 }
 0x14f   : > { %v3865_v62 = vadd.f32 %v759_v8, %v599_v41  ;;  %v2781_v18 = vpop.f32.mrb[47].mxu0 }
 0x150   : > { %2973 = vmatmul.mubr.msk.bf16.gmra.mrb[152].mxu1 %vm355_vm3, %v1793_v20 }
 0x151   : > { %3007 = vmatmul.mubr.msk.bf16.gmra.mrb[152].mxu0 %vm355_vm3, %v1977_v14  ;;  %2976 = vmatprep.mubr.msk.bf16.mxu1 %vm3142_vm1, %v3141_v1 }
 0x152   : > { %3010 = vmatprep.mubr.msk.bf16.mxu0 %vm3142_vm1, %v3141_v1 }
 0x153   : > { %v611_v36 = vpop.f32.mrb[48].mxu1 }
 0x154   : > { %v764_v15 = vpop.f32.mrb[48].mxu0  ;;  %v612_v30 = vadd.f32 %v611_v36, %v3726_v35  ;;  %v2750_v7 = vpop.f32.mrb[49].mxu1 }
 0x155   : > { %v3876_v24 = vadd.f32 %v764_v15, %v604_v9  ;;  %v2784_v50 = vpop.f32.mrb[49].mxu0  ;;  %v614_v26 = vpop.f32.mrb[50].mxu1 }
 0x156   : > { %v767_v19 = vpop.f32.mrb[50].mxu0  ;;  %v615_v47 = vadd.f32 %v614_v26, %v3731_v32  ;;  %v2751_v33 = vpop.f32.mrb[51].mxu1 }
 0x157   : > { %v3880_v11 = vadd.f32 %v767_v19, %v607_v43  ;;  %v2785_v17 = vpop.f32.mrb[51].mxu0 }
 0x158   : > { %2977 = vmatmul.mubr.msk.bf16.gmra.mrb[156].mxu1 %vm355_vm3, %v1802_v29 }
 0x159   : > { %3011 = vmatmul.mubr.msk.bf16.gmra.mrb[156].mxu0 %vm355_vm3, %v1979_v6 }
 0x15a   : > { %3014 = vmatprep.mubr.msk.bf16.mxu0 %vm3142_vm1, %v3141_v1 }
 0x15b   : > { %v949_v52 = vpop.f32.mrb[52].mxu1 }
 0x15c   : > { %v772_v37 = vpop.f32.mrb[52].mxu0  ;;  %v1020_v51 = vadd.f32 %v949_v52, %v3760_v27  ;;  %v2794_v32 = vpop.f32.mrb[53].mxu1 }
 0x15d   : > { %v3888_v35 = vadd.f32 %v772_v37, %v612_v30  ;;  %v2788_v23 = vpop.f32.mrb[53].mxu0  ;;  %v952_v56 = vpop.f32.mrb[54].mxu1 }
 0x15e   : > { %v775_v46 = vpop.f32.mrb[54].mxu0  ;;  %v1021_v1 = vadd.f32 %v952_v56, %v3764_v13  ;;  %v2795_v40 = vpop.f32.mrb[55].mxu1 }
 0x15f   : > { %v3892_v57 = vadd.f32 %v775_v46, %v615_v47  ;;  %v2789_v55 = vpop.f32.mrb[55].mxu0 }
 0x161   : > { %3015 = vmatmul.mubr.msk.bf16.gmra.mrb[160].mxu0 %vm355_vm3, %v1981_v10 }
 0x163   : > { %v957_v44 = vpop.f32.mrb[56].mxu1 }
 0x164   : > { %v1198_v41 = vpop.f32.mrb[56].mxu0  ;;  %v1022_v34 = vadd.f32 %v957_v44, %v3777_v59  ;;  %v2798_v63 = vpop.f32.mrb[57].mxu1 }
 0x165   : > { %v3896_v58 = vadd.f32 %v1198_v41, %v1020_v51  ;;  %v2832_v45 = vpop.f32.mrb[57].mxu0  ;;  %v960_v54 = vpop.f32.mrb[58].mxu1 }
 0x166   : > { %v1201_v60 = vpop.f32.mrb[58].mxu0  ;;  %v1023_v8 = vadd.f32 %v960_v54, %v3781_v2  ;;  %v2799_v14 = vpop.f32.mrb[59].mxu1 }
 0x167   : > { %v3899_v27 = vadd.f32 %v1201_v60, %v1021_v1  ;;  %v2833_v0 = vpop.f32.mrb[59].mxu0 }
 0x16b   : > { %v965_v18 = vpop.f32.mrb[60].mxu1 }
 0x16c   : > { %v1206_v13 = vpop.f32.mrb[60].mxu0  ;;  %v1024_v20 = vadd.f32 %v965_v18, %v3794_v12  ;;  %v2802_v53 = vpop.f32.mrb[61].mxu1 }
 0x16d   : > { %v3902_v9 = vadd.f32 %v1206_v13, %v1022_v34  ;;  %v2836_v16 = vpop.f32.mrb[61].mxu0  ;;  %v968_v43 = vpop.f32.mrb[62].mxu1 }
 0x16e   : > { %v1209_v4 = vpop.f32.mrb[62].mxu0  ;;  %v1025_v61 = vadd.f32 %v968_v43, %v3798_v28  ;;  %v2803_v48 = vpop.f32.mrb[63].mxu1 }
 0x16f   : > { %v3905_v5 = vadd.f32 %v1209_v4, %v1023_v8  ;;  %v2837_v59 = vpop.f32.mrb[63].mxu0 }
 0x173   : > { %v973_v50 = vpop.f32.mrb[64].mxu1 }
 0x174   : > { %v1214_v15 = vpop.f32.mrb[64].mxu0  ;;  %v1026_v19 = vadd.f32 %v973_v50, %v3811_v31  ;;  %v2806_v6 = vpop.f32.mrb[65].mxu1 }
 0x175   : > { %v3908_v21 = vadd.f32 %v1214_v15, %v1024_v20  ;;  %v2840_v2 = vpop.f32.mrb[65].mxu0  ;;  %v976_v7 = vpop.f32.mrb[66].mxu1 }
 0x176   : > { %v1217_v36 = vpop.f32.mrb[66].mxu0  ;;  %v1027_v17 = vadd.f32 %v976_v7, %v3815_v49  ;;  %v2807_v26 = vpop.f32.mrb[67].mxu1 }
 0x177   : > { %v3911_v30 = vadd.f32 %v1217_v36, %v1025_v61  ;;  %v2841_v12 = vpop.f32.mrb[67].mxu0 }
 0x17b   : > { %v981_v33 = vpop.f32.mrb[68].mxu1 }
 0x17c   : > { %v1222_v29 = vpop.f32.mrb[68].mxu0  ;;  %v1028_v37 = vadd.f32 %v981_v33, %v3828_v38  ;;  %v2810_v23 = vpop.f32.mrb[69].mxu1 }
 0x17d   : > { %v3914_v47 = vadd.f32 %v1222_v29, %v1026_v19  ;;  %v2844_v28 = vpop.f32.mrb[69].mxu0  ;;  %v984_v46 = vpop.f32.mrb[70].mxu1 }
 0x17e   : > { %v1225_v25 = vpop.f32.mrb[70].mxu0  ;;  %v1029_v10 = vadd.f32 %v984_v46, %v3832_v22  ;;  %v2811_v51 = vpop.f32.mrb[71].mxu1 }
 0x17f   : > { %v3917_v52 = vadd.f32 %v1225_v25, %v1027_v17  ;;  %v2845_v31 = vpop.f32.mrb[71].mxu0 }
 0x183   : > { %v989_v56 = vpop.f32.mrb[72].mxu1 }
 0x184   : > { %v1230_v32 = vpop.f32.mrb[72].mxu0  ;;  %v1030_v40 = vadd.f32 %v989_v56, %v3845_v39  ;;  %v2814_v41 = vpop.f32.mrb[73].mxu1 }
 0x185   : > { %v3920_v55 = vadd.f32 %v1230_v32, %v1028_v37  ;;  %v2848_v49 = vpop.f32.mrb[73].mxu0  ;;  %v992_v44 = vpop.f32.mrb[74].mxu1 }
 0x186   : > { %v1233_v1 = vpop.f32.mrb[74].mxu0  ;;  %v1031_v60 = vadd.f32 %v992_v44, %v3849_v42  ;;  %v2815_v34 = vpop.f32.mrb[75].mxu1 }
 0x187   : > { %v3923_v45 = vadd.f32 %v1233_v1, %v1029_v10  ;;  %v2849_v38 = vpop.f32.mrb[75].mxu0 }
 0x18b   : > { %v997_v54 = vpop.f32.mrb[76].mxu1 }
 0x18c   : > { %v1238_v63 = vpop.f32.mrb[76].mxu0  ;;  %v1032_v14 = vadd.f32 %v997_v54, %v3861_v3  ;;  %v2818_v13 = vpop.f32.mrb[77].mxu1 }
 0x18d   : > { %v3926_v0 = vadd.f32 %v1238_v63, %v1030_v40  ;;  %v2852_v22 = vpop.f32.mrb[77].mxu0  ;;  %v1000_v18 = vpop.f32.mrb[78].mxu1 }
 0x18e   : > { %v1241_v8 = vpop.f32.mrb[78].mxu0  ;;  %v1033_v4 = vadd.f32 %v1000_v18, %v3865_v62  ;;  %v2819_v20 = vpop.f32.mrb[79].mxu1 }
 0x18f   : > { %v3929_v16 = vadd.f32 %v1241_v8, %v1031_v60  ;;  %v2853_v39 = vpop.f32.mrb[79].mxu0 }
 0x193   : > { %v1005_v43 = vpop.f32.mrb[80].mxu1 }
 0x194   : > { %v1246_v53 = vpop.f32.mrb[80].mxu0  ;;  %v1034_v48 = vadd.f32 %v1005_v43, %v3876_v24  ;;  %v2822_v15 = vpop.f32.mrb[81].mxu1 }
 0x195   : > { %v3932_v59 = vadd.f32 %v1246_v53, %v1032_v14  ;;  %v2856_v42 = vpop.f32.mrb[81].mxu0  ;;  %v1008_v50 = vpop.f32.mrb[82].mxu1 }
 0x196   : > { %v1249_v61 = vpop.f32.mrb[82].mxu0  ;;  %v1035_v36 = vadd.f32 %v1008_v50, %v3880_v11  ;;  %v2823_v19 = vpop.f32.mrb[83].mxu1 }
 0x197   : > { %v3935_v2 = vadd.f32 %v1249_v61, %v1033_v4  ;;  %v2857_v3 = vpop.f32.mrb[83].mxu0 }
 0x19b   : > { %v1013_v7 = vpop.f32.mrb[84].mxu1 }
 0x19c   : > { %v1254_v6 = vpop.f32.mrb[84].mxu0  ;;  %v1036_v26 = vadd.f32 %v1013_v7, %v3888_v35  ;;  %v2826_v29 = vpop.f32.mrb[85].mxu1 }
 0x19d   : > { %v3938_v12 = vadd.f32 %v1254_v6, %v1034_v48  ;;  %v2860_v62 = vpop.f32.mrb[85].mxu0  ;;  %v1016_v33 = vpop.f32.mrb[86].mxu1 }
 0x19e   : > { %v1257_v17 = vpop.f32.mrb[86].mxu0  ;;  %v1037_v25 = vadd.f32 %v1016_v33, %v3892_v57  ;;  %v2827_v37 = vpop.f32.mrb[87].mxu1 }
 0x19f   : > { %v3941_v28 = vadd.f32 %v1257_v17, %v1035_v36  ;;  %v2861_v24 = vpop.f32.mrb[87].mxu0 }
 0x1a3   : > { %v1377_v46 = vpop.f32.mrb[88].mxu1 }
 0x1a4   : > { %v1262_v23 = vpop.f32.mrb[88].mxu0  ;;  %v1448_v51 = vadd.f32 %v1377_v46, %v3896_v58  ;;  %v2870_v32 = vpop.f32.mrb[89].mxu1 }
 0x1a5   : > { %v3944_v31 = vadd.f32 %v1262_v23, %v1036_v26  ;;  %v2864_v11 = vpop.f32.mrb[89].mxu0  ;;  %v1380_v56 = vpop.f32.mrb[90].mxu1 }
 0x1a6   : > { %v1265_v10 = vpop.f32.mrb[90].mxu0  ;;  %v1449_v1 = vadd.f32 %v1380_v56, %v3899_v27  ;;  %v2871_v40 = vpop.f32.mrb[91].mxu1 }
 0x1a7   : > { %v3947_v49 = vadd.f32 %v1265_v10, %v1037_v25  ;;  %v2865_v35 = vpop.f32.mrb[91].mxu0 }
 0x1ab   : > { %v1385_v44 = vpop.f32.mrb[92].mxu1 }
 0x1ac   : > { %v1618_v41 = vpop.f32.mrb[92].mxu0  ;;  %v1450_v34 = vadd.f32 %v1385_v44, %v3902_v9  ;;  %v2874_v63 = vpop.f32.mrb[93].mxu1 }
 0x1ad   : > { %v3950_v38 = vadd.f32 %v1618_v41, %v1448_v51  ;;  %v2908_v57 = vpop.f32.mrb[93].mxu0  ;;  %v1388_v54 = vpop.f32.mrb[94].mxu1 }
 0x1ae   : > { %v1621_v60 = vpop.f32.mrb[94].mxu0  ;;  %v1451_v8 = vadd.f32 %v1388_v54, %v3905_v5  ;;  %v2875_v14 = vpop.f32.mrb[95].mxu1 }
 0x1af   : > { %v3953_v22 = vadd.f32 %v1621_v60, %v1449_v1  ;;  %v2909_v58 = vpop.f32.mrb[95].mxu0 }
 0x1b3   : > { %v1393_v18 = vpop.f32.mrb[96].mxu1 }
 0x1b4   : > { %v1626_v13 = vpop.f32.mrb[96].mxu0  ;;  %v1452_v20 = vadd.f32 %v1393_v18, %v3908_v21  ;;  %v2878_v53 = vpop.f32.mrb[97].mxu1 }
 0x1b5   : > { %v3956_v39 = vadd.f32 %v1626_v13, %v1450_v34  ;;  %v2912_v27 = vpop.f32.mrb[97].mxu0  ;;  %v1396_v43 = vpop.f32.mrb[98].mxu1 }
 0x1b6   : > { %v1629_v4 = vpop.f32.mrb[98].mxu0  ;;  %v1453_v61 = vadd.f32 %v1396_v43, %v3911_v30  ;;  %v2879_v48 = vpop.f32.mrb[99].mxu1 }
 0x1b7   : > { %v3959_v42 = vadd.f32 %v1629_v4, %v1451_v8  ;;  %v2913_v9 = vpop.f32.mrb[99].mxu0 }
 0x1bb   : > { %v1401_v50 = vpop.f32.mrb[100].mxu1 }
 0x1bc   : > { %v1634_v15 = vpop.f32.mrb[100].mxu0  ;;  %v1454_v19 = vadd.f32 %v1401_v50, %v3914_v47  ;;  %v2882_v6 = vpop.f32.mrb[101].mxu1 }
 0x1bd   : > { %v3962_v3 = vadd.f32 %v1634_v15, %v1452_v20  ;;  %v2916_v5 = vpop.f32.mrb[101].mxu0  ;;  %v1404_v7 = vpop.f32.mrb[102].mxu1 }
 0x1be   : > { %v1637_v36 = vpop.f32.mrb[102].mxu0  ;;  %v1455_v17 = vadd.f32 %v1404_v7, %v3917_v52  ;;  %v2883_v26 = vpop.f32.mrb[103].mxu1 }
 0x1bf   : > { %v3965_v62 = vadd.f32 %v1637_v36, %v1453_v61  ;;  %v2917_v21 = vpop.f32.mrb[103].mxu0 }
 0x1c3   : > { %v1409_v33 = vpop.f32.mrb[104].mxu1 }
 0x1c4   : > { %v1642_v29 = vpop.f32.mrb[104].mxu0  ;;  %v1456_v37 = vadd.f32 %v1409_v33, %v3920_v55  ;;  %v2886_v23 = vpop.f32.mrb[105].mxu1 }
 0x1c5   : > { %v3968_v24 = vadd.f32 %v1642_v29, %v1454_v19  ;;  %v2920_v30 = vpop.f32.mrb[105].mxu0  ;;  %v1412_v46 = vpop.f32.mrb[106].mxu1 }
 0x1c6   : > { %v1645_v25 = vpop.f32.mrb[106].mxu0  ;;  %v1457_v10 = vadd.f32 %v1412_v46, %v3923_v45  ;;  %v2887_v51 = vpop.f32.mrb[107].mxu1 }
 0x1c7   : > { %v3971_v11 = vadd.f32 %v1645_v25, %v1455_v17  ;;  %v2921_v47 = vpop.f32.mrb[107].mxu0 }
 0x1cb   : > { %v1417_v56 = vpop.f32.mrb[108].mxu1 }
 0x1cc   : > { %v1650_v32 = vpop.f32.mrb[108].mxu0  ;;  %v1458_v40 = vadd.f32 %v1417_v56, %v3926_v0  ;;  %v2890_v41 = vpop.f32.mrb[109].mxu1 }
 0x1cd   : > { %v3974_v35 = vadd.f32 %v1650_v32, %v1456_v37  ;;  %v2924_v52 = vpop.f32.mrb[109].mxu0  ;;  %v1420_v44 = vpop.f32.mrb[110].mxu1  ;;  %v4009_v41 = vld [vmem:[%s4076_s2] ss:$0 sm:$0xff] }
 0x1ce   : > { %v1653_v1 = vpop.f32.mrb[110].mxu0  ;;  %v1459_v60 = vadd.f32 %v1420_v44, %v3929_v16  ;;  %v2891_v34 = vpop.f32.mrb[111].mxu1 }
 0x1cf   : > { %v3977_v57 = vadd.f32 %v1653_v1, %v1457_v10  ;;  %v2925_v55 = vpop.f32.mrb[111].mxu0 }
 0x1d3   : > { %v1425_v54 = vpop.f32.mrb[112].mxu1 }
 0x1d4   : > { %v1658_v63 = vpop.f32.mrb[112].mxu0  ;;  %v1460_v14 = vadd.f32 %v1425_v54, %v3932_v59  ;;  %v2894_v13 = vpop.f32.mrb[113].mxu1 }
 0x1d5   : > { %v3980_v58 = vadd.f32 %v1658_v63, %v1458_v40  ;;  %v2928_v45 = vpop.f32.mrb[113].mxu0  ;;  %v1428_v18 = vpop.f32.mrb[114].mxu1 }
 0x1d6   : > { %v1661_v8 = vpop.f32.mrb[114].mxu0  ;;  %v1461_v4 = vadd.f32 %v1428_v18, %v3935_v2  ;;  %v2895_v20 = vpop.f32.mrb[115].mxu1 }
 0x1d7   : > { %v3983_v27 = vadd.f32 %v1661_v8, %v1459_v60  ;;  %v2929_v0 = vpop.f32.mrb[115].mxu0 }
 0x1db   : > { %v1433_v43 = vpop.f32.mrb[116].mxu1 }
 0x1dc   : > { %v1666_v53 = vpop.f32.mrb[116].mxu0  ;;  %v1462_v48 = vadd.f32 %v1433_v43, %v3938_v12  ;;  %v2898_v15 = vpop.f32.mrb[117].mxu1 }
 0x1dd   : > { %v3986_v9 = vadd.f32 %v1666_v53, %v1460_v14  ;;  %v2932_v16 = vpop.f32.mrb[117].mxu0  ;;  %v1436_v50 = vpop.f32.mrb[118].mxu1 }
 0x1de   : > { %v1669_v61 = vpop.f32.mrb[118].mxu0  ;;  %v1463_v36 = vadd.f32 %v1436_v50, %v3941_v28  ;;  %v2899_v19 = vpop.f32.mrb[119].mxu1 }
 0x1df   : > { %v3989_v5 = vadd.f32 %v1669_v61, %v1461_v4  ;;  %v2933_v59 = vpop.f32.mrb[119].mxu0 }
 0x1e3   : > { %v1441_v7 = vpop.f32.mrb[120].mxu1 }
 0x1e4   : > { %v1674_v6 = vpop.f32.mrb[120].mxu0  ;;  %v1464_v26 = vadd.f32 %v1441_v7, %v3944_v31  ;;  %v2902_v29 = vpop.f32.mrb[121].mxu1 }
 0x1e5   : > { %v3992_v21 = vadd.f32 %v1674_v6, %v1462_v48  ;;  %v2936_v2 = vpop.f32.mrb[121].mxu0  ;;  %v1444_v33 = vpop.f32.mrb[122].mxu1 }
 0x1e6   : > { %v1677_v17 = vpop.f32.mrb[122].mxu0  ;;  %v1465_v25 = vadd.f32 %v1444_v33, %v3947_v49  ;;  %v2903_v37 = vpop.f32.mrb[123].mxu1 }
 0x1e7   : > { %v3995_v30 = vadd.f32 %v1677_v17, %v1463_v36  ;;  %v2937_v12 = vpop.f32.mrb[123].mxu0 }
 0x1eb   : > { %v1867_v46 = vpop.f32.mrb[124].mxu1 }
 0x1ec   : > { %v1682_v28 = vpop.f32.mrb[124].mxu0  ;;  %v1938_v51 = vadd.f32 %v1867_v46, %v3950_v38  ;;  %v2946_v32 = vpop.f32.mrb[125].mxu1 }
 0x1ed   : > { %v3998_v23 = vadd.f32 %v1682_v28, %v1464_v26  ;;  %v2940_v47 = vpop.f32.mrb[125].mxu0  ;;  %v1870_v56 = vpop.f32.mrb[126].mxu1 }
 0x1ee   : > { %v1685_v10 = vpop.f32.mrb[126].mxu0  ;;  %v1939_v1 = vadd.f32 %v1870_v56, %v3953_v22  ;;  %v2947_v40 = vpop.f32.mrb[127].mxu1 }
 0x1ef   : > { %v4001_v31 = vadd.f32 %v1685_v10, %v1465_v25  ;;  %v2941_v52 = vpop.f32.mrb[127].mxu0 }
 0x1f3   : > { %v1875_v60 = vpop.f32.mrb[128].mxu1 }
 0x1f4   : > { %v2046_v49 = vpop.f32.mrb[128].mxu0  ;;  %v1940_v34 = vadd.f32 %v1875_v60, %v3956_v39  ;;  %v2950_v45 = vpop.f32.mrb[129].mxu1 }
 0x1f5   : > { %v2117_v55 = vadd.f32 %v2046_v49, %v1938_v51  ;;  %v2984_v44 = vpop.f32.mrb[129].mxu0  ;;  %v1878_v8 = vpop.f32.mrb[130].mxu1 }
 0x1f6   : > { %v2049_v38 = vpop.f32.mrb[130].mxu0  ;;  %v1941_v14 = vadd.f32 %v1878_v8, %v3959_v42  ;;  %v2951_v0 = vpop.f32.mrb[131].mxu1 }
 0x1f7   : > { %v2142_v63 = vadd.f32 %v4009_v41, %v2117_v55  ;;  %v2118_v22 = vadd.f32 %v2049_v38, %v1939_v1  ;;  %v2985_v54 = vpop.f32.mrb[131].mxu0 }
 0x1f9   : > { %v2143_v13 = vadd.f32 %v4009_v41, %v2118_v22  ;;  %v2160_v18 = vmax.f32 %v2142_v63, 0.0 }
 0x1fb   : > { %v2161_v4 = vmax.f32 %v2143_v13, 0.0  ;;  %v1883_v43 = vpop.f32.mrb[132].mxu1 }
 0x1fc   : > { %v2054_v39 = vpop.f32.mrb[132].mxu0  ;;  %v1942_v42 = vadd.f32 %v1883_v43, %v3962_v3  ;;  %v2954_v15 = vpop.f32.mrb[133].mxu1 }
 0x1fd   : > { %v2536_v20 = vpack.c.bf16 %v2161_v4, %v2160_v18  ;;  %v2119_v53 = vadd.f32 %v2054_v39, %v1940_v34  ;;  %v2988_v16 = vpop.f32.mrb[133].mxu0  ;;  %v1886_v36 = vpop.f32.mrb[134].mxu1 }
 0x1fe   : > { %v2057_v61 = vpop.f32.mrb[134].mxu0  ;;  %v1943_v19 = vadd.f32 %v1886_v36, %v3965_v62  ;;  %v2955_v2 = vpop.f32.mrb[135].mxu1 }
 0x1ff   : > { %2537 = vst [vmem:[%s4018_s30] sm:$0xff] %v2536_v20   ;;  %v2144_v48 = vadd.f32 %v4009_v41, %v2119_v53  ;;  %v2120_v59 = vadd.f32 %v2057_v61, %v1941_v14  ;;  %v2989_v50 = vpop.f32.mrb[135].mxu0 }
 0x201   : > { %v2145_v6 = vadd.f32 %v4009_v41, %v2120_v59  ;;  %v2162_v7 = vmax.f32 %v2144_v48, 0.0 }
 0x203   : > { %v2163_v17 = vmax.f32 %v2145_v6, 0.0  ;;  %v1891_v25 = vpop.f32.mrb[136].mxu1 }
 0x204   : > { %v2062_v26 = vpop.f32.mrb[136].mxu0  ;;  %v1944_v37 = vadd.f32 %v1891_v25, %v3968_v24  ;;  %v2958_v47 = vpop.f32.mrb[137].mxu1 }
 0x205   : > { %v2541_v29 = vpack.c.bf16 %v2163_v17, %v2162_v7  ;;  %v2121_v12 = vadd.f32 %v2062_v26, %v1942_v42  ;;  %v2992_v33 = vpop.f32.mrb[137].mxu0  ;;  %v1894_v10 = vpop.f32.mrb[138].mxu1 }
 0x206   : > { %v2065_v3 = vpop.f32.mrb[138].mxu0  ;;  %v1945_v51 = vadd.f32 %v1894_v10, %v3971_v11  ;;  %v2959_v52 = vpop.f32.mrb[139].mxu1 }
 0x207   : > { %2578 = vst [vmem:[%s4018_s30 + $0x8] sm:$0xff] %v2541_v29   ;;  %v2146_v28 = vadd.f32 %v4009_v41, %v2121_v12  ;;  %v2122_v46 = vadd.f32 %v2065_v3, %v1943_v19  ;;  %v2993_v62 = vpop.f32.mrb[139].mxu0 }
 0x209   : > { %v2147_v32 = vadd.f32 %v4009_v41, %v2122_v46  ;;  %v2164_v56 = vmax.f32 %v2146_v28, 0.0 }
 0x20b   : > { %v2165_v1 = vmax.f32 %v2147_v32, 0.0  ;;  %v1899_v60 = vpop.f32.mrb[140].mxu1 }
 0x20c   : > { %v2070_v40 = vpop.f32.mrb[140].mxu0  ;;  %v1946_v38 = vadd.f32 %v1899_v60, %v3974_v35  ;;  %v2962_v63 = vpop.f32.mrb[141].mxu1 }
 0x20d   : > { %v2546_v49 = vpack.c.bf16 %v2165_v1, %v2164_v56  ;;  %v2123_v55 = vadd.f32 %v2070_v40, %v1944_v37  ;;  %v2996_v44 = vpop.f32.mrb[141].mxu0  ;;  %v1902_v22 = vpop.f32.mrb[142].mxu1 }
 0x20e   : > { %v2073_v24 = vpop.f32.mrb[142].mxu0  ;;  %v1947_v54 = vadd.f32 %v1902_v22, %v3977_v57  ;;  %v2963_v14 = vpop.f32.mrb[143].mxu1 }
 0x20f   : > { %2579 = vst [vmem:[%s4018_s30 + $0x10] sm:$0xff] %v2546_v49   ;;  %v2148_v34 = vadd.f32 %v4009_v41, %v2123_v55  ;;  %v2124_v45 = vadd.f32 %v2073_v24, %v1945_v51  ;;  %v2997_v11 = vpop.f32.mrb[143].mxu0 }
 0x211   : > { %v2149_v8 = vadd.f32 %v4009_v41, %v2124_v45  ;;  %v2166_v13 = vmax.f32 %v2148_v34, 0.0 }
 0x213   : > { %v2167_v0 = vmax.f32 %v2149_v8, 0.0  ;;  %v1907_v53 = vpop.f32.mrb[144].mxu1 }
 0x214   : > { %v2078_v18 = vpop.f32.mrb[144].mxu0  ;;  %v1948_v16 = vadd.f32 %v1907_v53, %v3980_v58  ;;  %v2966_v61 = vpop.f32.mrb[145].mxu1 }
 0x215   : > { %v2551_v4 = vpack.c.bf16 %v2167_v0, %v2166_v13  ;;  %v2125_v39 = vadd.f32 %v2078_v18, %v1946_v38  ;;  %v3000_v20 = vpop.f32.mrb[145].mxu0  ;;  %v1910_v48 = vpop.f32.mrb[146].mxu1 }
 0x216   : > { %v2081_v35 = vpop.f32.mrb[146].mxu0  ;;  %v1949_v15 = vadd.f32 %v1910_v48, %v3983_v27  ;;  %v2967_v50 = vpop.f32.mrb[147].mxu1 }
 0x217   : > { %2580 = vst [vmem:[%s4018_s30 + $0x18] sm:$0xff] %v2551_v4   ;;  %v2150_v43 = vadd.f32 %v4009_v41, %v2125_v39  ;;  %v2126_v42 = vadd.f32 %v2081_v35, %v1947_v54  ;;  %v3001_v57 = vpop.f32.mrb[147].mxu0 }
 0x219   : > { %v2151_v59 = vadd.f32 %v4009_v41, %v2126_v42  ;;  %v2168_v36 = vmax.f32 %v2150_v43, 0.0 }
 0x21b   : > { %v2169_v19 = vmax.f32 %v2151_v59, 0.0  ;;  %v1915_v26 = vpop.f32.mrb[148].mxu1 }
 0x21c   : > { %v2086_v6 = vpop.f32.mrb[148].mxu0  ;;  %v1950_v29 = vadd.f32 %v1915_v26, %v3986_v9  ;;  %v2970_v33 = vpop.f32.mrb[149].mxu1 }
 0x21d   : > { %v2556_v2 = vpack.c.bf16 %v2169_v19, %v2168_v36  ;;  %v2127_v7 = vadd.f32 %v2086_v6, %v1948_v16  ;;  %v3004_v17 = vpop.f32.mrb[149].mxu0  ;;  %v1918_v3 = vpop.f32.mrb[150].mxu1 }
 0x21e   : > { %v2089_v58 = vpop.f32.mrb[150].mxu0  ;;  %v1951_v37 = vadd.f32 %v1918_v3, %v3989_v5  ;;  %v2971_v47 = vpop.f32.mrb[151].mxu1 }
 0x21f   : > { %2581 = vst [vmem:[%s4018_s30 + $0x20] sm:$0xff] %v2556_v2   ;;  %v2152_v12 = vadd.f32 %v4009_v41, %v2127_v7  ;;  %v2128_v25 = vadd.f32 %v2089_v58, %v1949_v15  ;;  %v3005_v27 = vpop.f32.mrb[151].mxu0 }
 0x221   : > { %v2153_v28 = vadd.f32 %v4009_v41, %v2128_v25  ;;  %v2170_v46 = vmax.f32 %v2152_v12, 0.0 }
 0x223   : > { %v2171_v62 = vmax.f32 %v2153_v28, 0.0  ;;  %v1923_v56 = vpop.f32.mrb[152].mxu1 }
 0x224   : > { %v2094_v10 = vpop.f32.mrb[152].mxu0  ;;  %v1952_v1 = vadd.f32 %v1923_v56, %v3992_v21  ;;  %v2974_v49 = vpop.f32.mrb[153].mxu1 }
 0x225   : > { %v2561_v51 = vpack.c.bf16 %v2171_v62, %v2170_v46  ;;  %v2129_v32 = vadd.f32 %v2094_v10, %v1950_v29  ;;  %v3008_v52 = vpop.f32.mrb[153].mxu0  ;;  %v1926_v44 = vpop.f32.mrb[154].mxu1 }
 0x226   : > { %v2097_v9 = vpop.f32.mrb[154].mxu0  ;;  %v1953_v60 = vadd.f32 %v1926_v44, %v3995_v30  ;;  %v2975_v38 = vpop.f32.mrb[155].mxu1 }
 0x227   : > { %2582 = vst [vmem:[%s4018_s30 + $0x28] sm:$0xff] %v2561_v51   ;;  %v2154_v40 = vadd.f32 %v4009_v41, %v2129_v32  ;;  %v2130_v55 = vadd.f32 %v2097_v9, %v1951_v37  ;;  %v3009_v5 = vpop.f32.mrb[155].mxu0 }
 0x229   : > { %v2155_v24 = vadd.f32 %v4009_v41, %v2130_v55  ;;  %v2172_v34 = vmax.f32 %v2154_v40, 0.0 }
 0x22b   : > { %v2173_v63 = vmax.f32 %v2155_v24, 0.0  ;;  %v1931_v8 = vpop.f32.mrb[156].mxu1 }
 0x22c   : > { %v2102_v45 = vpop.f32.mrb[156].mxu0  ;;  %v1954_v14 = vadd.f32 %v1931_v8, %v3998_v23  ;;  %v2978_v0 = vpop.f32.mrb[157].mxu1 }
 0x22d   : > { %v2566_v11 = vpack.c.bf16 %v2173_v63, %v2172_v34  ;;  %v2131_v22 = vadd.f32 %v2102_v45, %v1952_v1  ;;  %v3012_v54 = vpop.f32.mrb[157].mxu0  ;;  %v1934_v4 = vpop.f32.mrb[158].mxu1 }
 0x22e   : > { %v2105_v21 = vpop.f32.mrb[158].mxu0  ;;  %v1955_v39 = vadd.f32 %v1934_v4, %v4001_v31  ;;  %v2979_v53 = vpop.f32.mrb[159].mxu1 }
 0x22f   : > { %2583 = vst [vmem:[%s4018_s30 + $0x30] sm:$0xff] %v2566_v11   ;;  %v2156_v13 = vadd.f32 %v4009_v41, %v2131_v22  ;;  %v2132_v18 = vadd.f32 %v2105_v21, %v1953_v60  ;;  %v3013_v30 = vpop.f32.mrb[159].mxu0 }
 0x231   : > { %v2157_v20 = vadd.f32 %v4009_v41, %v2132_v18  ;;  %v2174_v35 = vmax.f32 %v2156_v13, 0.0 }
 0x233   : > { %v2175_v16 = vmax.f32 %v2157_v20, 0.0 }
 0x234   : > { %v2110_v43 = vpop.f32.mrb[160].mxu0 }
 0x235   : > { %v2571_v61 = vpack.c.bf16 %v2175_v16, %v2174_v35  ;;  %v2133_v42 = vadd.f32 %v2110_v43, %v1954_v14  ;;  %v3016_v57 = vpop.f32.mrb[161].mxu0 }
 0x236   : > { %v2113_v23 = vpop.f32.mrb[162].mxu0 }
 0x237   : > { %2584 = vst [vmem:[%s4018_s30 + $0x38] sm:$0xff] %v2571_v61   ;;  %v2158_v48 = vadd.f32 %v4009_v41, %v2133_v42  ;;  %v2134_v15 = vadd.f32 %v2113_v23, %v1955_v39  ;;  %v3017_v59 = vpop.f32.mrb[163].mxu0 }
 0x239   : > { %v2159_v50 = vadd.f32 %v4009_v41, %v2134_v15  ;;  %v2176_v36 = vmax.f32 %v2158_v48, 0.0 }
 0x23b   : > { %v2177_v31 = vmax.f32 %v2159_v50, 0.0 }
 0x23d   : > { %v2576_v19 = vpack.c.bf16 %v2177_v31, %v2176_v36 }
 0x23f   : > { %2585 = vst [vmem:[%s4018_s30 + $0x40] sm:$0xff] %v2576_v19  }
 0x240 PF: > { %s13_s16 = sadd.s32 1, %s3139_s16   ;;  %s4078_s12 = smov %s3131_s14 }
 0x241   : > { %p10_p7 = scmp.ge.s32.totalorder %s13_s16, 6   ;;  %s4079_s13 = smov %s3135_s15 }
 0x242   : > { %s4080_s14 = smov %s4083_s17  ;;  %s4081_s15 = smov %s4087_s18 }
 0x243   :  { %12 = sbr.rel (!%p10_p7) target bundleno = 3 (0x3), region = 70 }

// kernel: da_network_forward.3
= control target key start
LH: loop header
LB: loop body
LE: loop exit
PB: predicated region body
PF: predicated region fallthrough
CT: control target
= control target key end

     0   :  { %11 = vsyncpa [#allocation4], 0  ;;  %s5547_s0 = inlined_call_operand.vmem [shape: bf16[2,2,182,128], index: 0, kind: input, shape index: {}]   ;;  %s5548_s1 = inlined_call_operand.vmem [shape: bf16[9,128,128], index: 1, kind: input, shape index: {}]   ;;  %s5549_s2 = inlined_call_operand.vmem [shape: f32[1,128], index: 2, kind: input, shape index: {}]   ;;  %s5550_s3 = inlined_call_operand.vmem [shape: bf16[128,128], index: 3, kind: input, shape index: {}]   ;;  %s5551_s4 = inlined_call_operand.vmem [shape: f32[1,128], index: 4, kind: input, shape index: {}]   ;;  %s5552_s5 = inlined_call_operand.vmem [shape: f32[144,1], index: 5, kind: input, shape index: {}]   ;;  %s5553_s6 = inlined_call_operand.hbm [shape: f32[2,1,128], index: 6, kind: output, shape index: {}]  }
   0x1   :  { %13 = vsyncpa [#allocation4 + $0x1], 0  ;;  %s4312_s21 = smov 0   ;;  %s4314_s22 = smov 0  }
   0x2   :  { %s4316_s23 = smov 0   ;;  %s4318_s24 = smov 0  }
   0x3   :  { %s4320_s25 = smov 0   ;;  %s4322_s26 = smov 0  }
   0x4   :  { %s4324_s27 = smov 0   ;;  %s4326_s28 = smov 0  }
   0x5 LB: > { %s2985_s29 = sadd.s32 4294967295, %s4267_s28   ;;  %s2986_s30 = sadd.s32 4294967294, %s4267_s28   ;;  %s4267_s28 = sphi %s4326_s28, %s19_s28   ;;  %s4263_s27 = sphi %s4324_s27, %s5567_s27   ;;  %s4259_s26 = sphi %s4322_s26, %s5566_s26   ;;  %s4255_s25 = sphi %s4320_s25, %s5565_s25   ;;  %s4251_s24 = sphi %s4318_s24, %s5564_s24   ;;  %s4247_s23 = sphi %s4316_s23, %s5563_s23   ;;  %s4243_s22 = sphi %s4314_s22, %s5562_s22   ;;  %s4239_s21 = sphi %s4312_s21, %s5561_s21  }
   0x6   : > { %s28_s7 = sadd.s32 1, %s4259_s26  ;;  %s31_s8 = sadd.s32 1, %s4263_s27 }
   0x7   : > { %p29_p0 = scmp.ge.s32.totalorder %s28_s7, 2  ;;  %p181_p1 = scmp.ne.s32.totalorder %s4247_s23, %s4243_s22 }
   0x8   : > { %p182_p2 = scmp.eq.s32.totalorder %s2985_s29, 3  ;;  %p187_p4 = scmp.ne.s32.totalorder %s4243_s22, %s4239_s21 }
   0x9   : > { %s5569_s7 = smov (%p29_p0, %s28_s7), 0  ;;  %s5571_s8 = smov (!%p29_p0, %s31_s8), %s4263_s27 }
   0xa   : > { %5555 = sst [smem:[#allocation6_spill]] %s5569_s7  ;;  %p4361_p3 = por %p182_p2, %p181_p1 }
   0xb   : > { %p33_p5 = scmp.ge.s32.totalorder %s5571_s8, 2  ;;  %p188_p6 = scmp.eq.s32.totalorder %s2986_s30, 3 }
   0xc   : > { %p2989_p7 = scmp.ge.s32.totalorder %s4267_s28, 1  ;;  %p233_p8 = scmp.lt.s32.totalorder %s4267_s28, 5 }
   0xd   : > { %s5573_s8 = smov (%p33_p5, %s5571_s8), 0  ;;  %p4371_p9 = por %p188_p6, %p187_p4 }
   0xe   : > { %5557 = sst [smem:[#allocation7_spill]] %s5573_s8  ;;  %p234_p10 = pnand %p2989_p7, %p233_p8 }
   0xf   : > { %s168_s11 = ssub.s32 %s4263_s27, %s5573_s8  ;;  %s171_s12 = sadd.s32 1, %s4247_s23 }
  0x10   : > { %p169_p11 = scmp.eq.s32.totalorder %s168_s11, 0  ;;  %237 = sbr.rel (%p234_p10) target bundleno = 876 (0x36c), region = 44 }
  0x11   : > { %s264_s14 = sand.u32 (!%p234_p10), 1, %s4243_s22   ;;  %p266_p12 = scmp.lt.s32.totalorder (!%p234_p10), %s4255_s25, 1 }
  0x12   : > { %s4379_s13 = scalar_select %p169_p11, %s4247_s23, %s171_s12  }
  0x13   : > { %p268_p13 = scmp.lt.s32.totalorder (!%p234_p10), %s4251_s24, 1  ;;  %s4393_s12 = scalar_lea.vmem (!%p234_p10), [#allocation3], %s264_s14 }
  0x14   : > { %p2991_p0 = scmp.ne.s32.totalorder (!%p234_p10), %s4251_s24, 0 }
  0x17   : > { %s267_s15 = scalar_select %p266_p12, %s4255_s25, 1 }
  0x18   : > { %s269_s16 = scalar_select %p268_p13, %s4251_s24, 1 }
  0x19   : > { %s3985_s17 = smul.u32 46, %s267_s15  ;;  %v4269_v0 = vmov (!%p2991_p0), 0.0  }
  0x1a   : > { %s3984_s18 = smul.u32 23, %s269_s16  ;;  %280 = vst [vmem:[#allocation2] sm:$0x1] (!%p2991_p0), %v4269_v0 }
  0x1b   : > { %279 = sbr.rel (%p2991_p0) target bundleno = 34 (0x22), region = 48 }
  0x1c   : > { %s272_s19 = sadd.s32 %s3985_s17, %s3984_s18 }
  0x1d   : > { %s2990_s20 = sshll.u32 %s272_s19, 2 }
  0x1e   : > { %s4389_s11 = scalar_lea.vmem %s5547_s0, %s2990_s20 }
  0x22 PF: > { %v4066_v1 = vld [vmem:[%s5548_s1 + $0x40] sm:$0xff]   ;;  %v4270_v2 = vmov 0.0   ;;  %v4067_v3 = vld [vmem:[%s5548_s1 + $0x48] sm:$0xff]   ;;  %vm4271_vm0 = vmmov 0   ;;  %v4068_v4 = vld [vmem:[%s5548_s1 + $0x50] sm:$0xff]   ;;  %vm803_vm2 = vcmask 1046528  }
  0x23   : > { %3968 = vmatprep.subr.bf16.mxu1 %v4270_v2  ;;  %3441 = vmatprep.subr.bf16.mxu0 %v4270_v2  ;;  %v4069_v5 = vld [vmem:[%s5548_s1 + $0x58] sm:$0xff]   ;;  %v281_v6 = vld [vmem:[%s4389_s11] sm:$0xf]  ;;  %v4422_v7 = vld [vmem:[%s4389_s11 + $0x4] sm:$0xf]  ;;  %vm1598_vm3 = vcmask 1045504  }
  0x24   : > { %3976 = vmatpush3.bf16.msra.mxu1 %v4066_v1  ;;  %3442 = vmatpush3.bf16.msra.mxu0 %v4066_v1  ;;  %v4425_v8 = vld [vmem:[%s4389_s11 + $0x20] sm:$0xff]   ;;  %v4431_v10 = vcombine.low %v281_v6, %v4422_v7  ;;  %v4436_v11 = vld [vmem:[%s4389_s11 + $0x28] sm:$0xff]   ;;  %v4072_v16 = vld [vmem:[%s5548_s1 + $0x70] sm:$0xff]   ;;  %vm381_vm1 = vsmask.f32 7424  ;;  %vm2393_vm5 = vcmask 1044480  }
  0x25   : > { %3969 = vmatprep.subr.bf16.mxu1 %v4270_v2  ;;  %3443 = vmatprep.subr.bf16.mxu0 %v4270_v2  ;;  %v4070_v9 = vld [vmem:[%s5548_s1 + $0x60] sm:$0xff]   ;;  %v4071_v12 = vld [vmem:[%s5548_s1 + $0x68] sm:$0xff]   ;;  %v414_v13 = vshll.u32 %v4425_v8, 16  ;;  %v418_v17 = vshrl.u32 %v4425_v8, 16  ;;  %v422_v18 = vshll.u32 %v4436_v11, 16  ;;  %v4073_v23 = vld [vmem:[%s5548_s1 + $0x78] sm:$0xff]  }
  0x26   : > { %3473 = vmatprep.mubr.msk.bf16.mxu1 %vm4271_vm0, %v4270_v2  ;;  %3457 = vmatprep.mubr.msk.bf16.mxu0 %vm4271_vm0, %v4270_v2  ;;  %v4443_v14 = vld [vmem:[%s4389_s11 + $0x8] sm:$0xff]   ;;  %v385_v15 = vshll.u32 %v4431_v10, 16  ;;  %v383_v20 = vshrl.u32 %v4431_v10, 16  ;;  %v4463_v25 = vld [vmem:[%s4389_s11 + $0x30] sm:$0xff]   ;;  %v4076_v30 = vld [vmem:[%s5548_s1] sm:$0xff]   ;;  %v426_v31 = vshrl.u32 %v4436_v11, 16 }
  0x27   : > { %v4453_v19 = vrot.slane %v414_v13, 1  ;;  %v390_v22 = vshll.u32 %v4443_v14, 16  ;;  %v424_v24 = vrot.slane %v422_v18, 1  ;;  %v4467_v29 = vld [vmem:[%s4389_s11 + $0x10] sm:$0xff]   ;;  %v430_v32 = vshll.u32 %v4463_v25, 16  ;;  %v4081_v37 = vld [vmem:[%s5548_s1 + $0x80] sm:$0xff]  }
  0x28   : > { %3977 = vmatpush3.bf16.msra.mxu1 %v4067_v3  ;;  %3444 = vmatpush3.bf16.msra.mxu0 %v4067_v3  ;;  %v387_v21 = vrot.slane %v385_v15, 1  ;;  %v394_v35 = vshrl.u32 %v4443_v14, 16  ;;  %v398_v36 = vshll.u32 %v4467_v29, 16  ;;  %v4077_v38 = vld [vmem:[%s5548_s1 + $0x8] sm:$0xff]   ;;  %v4489_v40 = vld [vmem:[%s4389_s11 + $0x38] sm:$0xff]   ;;  %v4082_v46 = vld [vmem:[%s5548_s1 + $0x10] sm:$0xff]  }
  0x29   : > { %3970 = vmatprep.subr.bf16.mxu1 %v4270_v2  ;;  %3445 = vmatprep.subr.bf16.mxu0 %v4270_v2  ;;  %v420_v26 = vor.u32 %v418_v17, %v4453_v19  ;;  %v392_v28 = vrot.slane %v390_v22, 1  ;;  %v432_v39 = vrot.slane %v430_v32, 1  ;;  %v428_v41 = vor.u32 %v426_v31, %v424_v24  ;;  %v4494_v44 = vld [vmem:[%s4389_s11 + $0x18] sm:$0xff]   ;;  %v4083_v45 = vld [vmem:[%s5548_s1 + $0x88] sm:$0xff]   ;;  %v4087_v53 = vld [vmem:[%s5548_s1 + $0x90] sm:$0xff]   ;;  %p3228_p1 = scmp.ne.s32.totalorder %s4251_s24, 1 }
  0x2a   : > { %v388_v27 = vor.u32 %v387_v21, %v383_v20  ;;  %v400_v43 = vrot.slane %v398_v36, 1  ;;  %v434_v47 = vshrl.u32 %v4463_v25, 16  ;;  %v438_v48 = vshll.u32 %v4489_v40, 16  ;;  %v4096_v54 = vld [vmem:[%s4389_s11 + $0x48] ss:$0 sps:$4 sm:$0x11]  }
  0x2b   : > { %v425_v33 = vsel %vm381_vm1, %v420_v26, %v424_v24  ;;  %v396_v42 = vor.u32 %v394_v35, %v392_v28  ;;  %v433_v49 = vsel %vm381_vm1, %v428_v41, %v432_v39  ;;  %v402_v51 = vshrl.u32 %v4467_v29, 16  ;;  %v4086_v57 = vld [vmem:[%s5548_s1 + $0x18] sm:$0xff]   ;;  %v4524_v60 = vld [vmem:[%s4389_s11 + $0x40] sm:$0xff]   ;;  %v4094_v18 = vld [vmem:[%s5548_s1 + $0xa8] sm:$0xff]  }
  0x2c   : > { %3978 = vmatpush3.bf16.msra.mxu1 %v4068_v4  ;;  %3446 = vmatpush3.bf16.msra.mxu0 %v4068_v4  ;;  %v393_v34 = vsel %vm381_vm1, %v388_v27, %v392_v28  ;;  %v406_v52 = vshll.u32 %v4494_v44, 16  ;;  %v436_v55 = vor.u32 %v434_v47, %v432_v39  ;;  %v440_v56 = vrot.slane %v438_v48, 1  ;;  %v4089_v61 = vld [vmem:[%s5548_s1 + $0x98] sm:$0xff]   ;;  %v4088_v1 = vld [vmem:[%s5548_s1 + $0x20] sm:$0xff]   ;;  %v4097_v27 = vld [vmem:[%s5548_s1 + $0xb0] sm:$0xff]  }
  0x2d   : > { %3971 = vmatprep.subr.bf16.mxu1 %v4270_v2  ;;  %3447 = vmatprep.subr.bf16.mxu0 %v4270_v2  ;;  %v401_v50 = vsel %vm381_vm1, %v396_v42, %v400_v43  ;;  %v404_v58 = vor.u32 %v402_v51, %v400_v43  ;;  %v819_v62 = vrot.slane %v4524_v60, 1  ;;  %v821_v63 = vrot.slane %v4096_v54, 1  ;;  %v782_v20 = vld [vmem:[%s4389_s11] sm:$0xe]  ;;  %v4106_v42 = vld [vmem:[%s5548_s1 + $0x110] sm:$0xff]   ;;  %v4103_v43 = vld [vmem:[%s5548_s1 + $0xc8] sm:$0xff]  }
  0x2e   : > { %v408_v59 = vrot.slane %v406_v52, 1  ;;  %v441_v0 = vsel %vm381_vm1, %v436_v55, %v440_v56  ;;  %v442_v3 = vshrl.u32 %v4489_v40, 16  ;;  %v410_v6 = vshrl.u32 %v4494_v44, 16  ;;  %v4102_v35 = vld [vmem:[%s5548_s1 + $0x100] sm:$0xff]   ;;  %v4649_v51 = vld [vmem:[%s4389_s11 + $0xc] sm:$0xf] }
  0x2f   : > { %v454_v21 = vshll.u32 %v4096_v54, 16  ;;  %v450_v26 = vshrl.u32 %v4524_v60, 16  ;;  %v3050_v28 = vcombine.low %v782_v20, %v4422_v7  ;;  %v4099_v7 = vld [vmem:[%s5548_s1 + $0xb8] sm:$0xff]   ;;  %v4101_v39 = vld [vmem:[%s5548_s1 + $0xc0] sm:$0xff]   ;;  %v1577_v52 = vld [vmem:[%s4389_s11 + $0x8] sm:$0xc] }
  0x30   : > { %3979 = vmatpush3.bf16.msra.mxu1 %v4069_v5  ;;  %3448 = vmatpush3.bf16.msra.mxu0 %v4069_v5  ;;  %v409_v4 = vsel %vm381_vm1, %v404_v58, %v408_v59  ;;  %v446_v5 = vshll.u32 %v4524_v60, 16  ;;  %v444_v13 = vor.u32 %v442_v3, %v440_v56  ;;  %v412_v17 = vor.u32 %v410_v6, %v408_v59  ;;  %v4110_v48 = vld [vmem:[%s5548_s1 + $0x120] sm:$0xff]   ;;  %v4669_v59 = vld [vmem:[%s4389_s11 + $0x18] sm:$0xff]  }
  0x31   : > { %3972 = vmatprep.subr.bf16.mxu1 %v4270_v2  ;;  %3449 = vmatprep.subr.bf16.mxu0 %v4270_v2  ;;  %v804_v32 = vrot.slane %v3050_v28, 1  ;;  %v3134_v54 = vcombine.low %v1577_v52, %v4649_v51  ;;  %v4109_v56 = vld [vmem:[%s5548_s1 + $0xe0] sm:$0xff]   ;;  %v813_v3 = vrot.slane %v4436_v11, 1  ;;  %vm1307_vm4 = vsmask.f32 6400 }
  0x32   : > { %v448_v15 = vrot.slane %v446_v5, 1  ;;  %v417_v24 = vsel %vm381_vm1, %v412_v17, %v4453_v19  ;;  %v4098_v19 = vld [vmem:[%s5548_s1 + $0x38] sm:$0xff]   ;;  %v4113_v5 = vld [vmem:[%s5548_s1 + $0xf0] sm:$0xff]   ;;  %v4698_v6 = vld [vmem:[%s4389_s11 + $0x20] sm:$0xff]   ;;  %vm2102_vm6 = vsmask.f32 5376 }
  0x33   : > { %v1599_v58 = vrot.slane %v3134_v54, 2  ;;  %v4718_v17 = vld [vmem:[%s4389_s11 + $0x28] sm:$0xff]   ;;  %v1335_v52 = vshrl.u32 %v4698_v6, 16  ;;  %vm4274_vm7 = vmmov (!%p3228_p1), 0  }
  0x34   : > { %3980 = vmatpush3.bf16.msra.mxu1 %v4070_v9  ;;  %3450 = vmatpush3.bf16.msra.mxu0 %v4070_v9  ;;  %v4545_v9 = vsel %vm803_vm2, %v819_v62, %v821_v63  ;;  %v449_v22 = vsel %vm381_vm1, %v444_v13, %v448_v15  ;;  %v452_v31 = vor.u32 %v450_v26, %v448_v15  ;;  %v4115_v13 = vld [vmem:[%s5548_s1 + $0xf8] sm:$0xff]   ;;  %v1604_v15 = vrot.slane %v4698_v6, 2 }
  0x35   : > { %3973 = vmatprep.subr.bf16.mxu1 %v4270_v2  ;;  %3451 = vmatprep.subr.bf16.mxu0 %v4270_v2  ;;  %v1606_v20 = vrot.slane %v4718_v17, 2  ;;  %v1337_v54 = vrot.slane %v1335_v52, 1 }
  0x38   : > { %3981 = vmatpush3.bf16.msra.mxu1 %v4071_v12  ;;  %3452 = vmatpush3.bf16.msra.mxu0 %v4071_v12  ;;  %v4092_v12 = vld [vmem:[%s5548_s1 + $0xa0] sm:$0xff]  }
  0x39   : > { %3974 = vmatprep.subr.bf16.mxu1 %v4270_v2  ;;  %3453 = vmatprep.subr.bf16.mxu0 %v4270_v2 }
  0x3c   : > { %3982 = vmatpush3.bf16.msra.mxu1 %v4072_v16  ;;  %3454 = vmatpush3.bf16.msra.mxu0 %v4072_v16  ;;  %v4093_v16 = vld [vmem:[%s5548_s1 + $0x28] sm:$0xff]  }
  0x3d   : > { %3975 = vmatprep.subr.bf16.mxu1 %v4270_v2  ;;  %3455 = vmatprep.subr.bf16.mxu0 %v4270_v2 }
  0x40   : > { %3983 = vmatpush3.bf16.msra.mxu1 %v4073_v23  ;;  %3456 = vmatpush3.bf16.msra.mxu0 %v4073_v23  ;;  %v4095_v23 = vld [vmem:[%s5548_s1 + $0x30] sm:$0xff]  }
  0x41   : > { %3493 = vmatprep.subr.bf16.mxu1 %v4270_v2  ;;  %3545 = vmatprep.subr.bf16.mxu0 %v4270_v2 }
  0x43   : > { %3474 = vmatmul.mubr.bf16.vlgmr.msra.gmra.mrb[0].mxu1 %v425_v33  ;;  %3458 = vmatmul.mubr.bf16.vlgmr.msra.gmra.mrb[0].mxu0 %v393_v34  ;;  %v805_v33 = vrot.slane %v4443_v14, 1 }
  0x44   : > { %3494 = vmatpush3.bf16.msra.mxu1 %v4076_v30  ;;  %3477 = vmatprep.mubr.msk.bf16.mxu1 %vm4271_vm0, %v4270_v2  ;;  %v456_v30 = vrot.slane %v454_v21, 1  ;;  %v817_v21 = vrot.slane %v4489_v40, 1 }
  0x45   : > { %3495 = vmatprep.subr.bf16.mxu1 %v4270_v2  ;;  %3546 = vmatpush3.bf16.msra.mxu0 %v4081_v37  ;;  %v806_v36 = vsel %vm803_vm2, %v804_v32, %v805_v33  ;;  %v807_v37 = vrot.slane %v4467_v29, 1 }
  0x46   : > { %3547 = vmatprep.subr.bf16.mxu0 %v4270_v2  ;;  %3461 = vmatprep.mubr.msk.bf16.mxu0 %vm4271_vm0, %v4270_v2  ;;  %v457_v34 = vsel %vm381_vm1, %v452_v31, %v456_v30  ;;  %v820_v28 = vsel %vm803_vm2, %v817_v21, %v819_v62  ;;  %v4758_v62 = vld [vmem:[%s4389_s11 + $0x38] sm:$0xff]  }
  0x47   : > { %v808_v41 = vsel %vm803_vm2, %v805_v33, %v807_v37  ;;  %v1610_v32 = vrot.slane %v4758_v62, 2  ;;  %v1098_v52 = vrot.slane %v4758_v62, 1 }
  0x48   : > { %3496 = vmatpush3.bf16.msra.mxu1 %v4077_v38  ;;  %v4104_v38 = vld [vmem:[%s5548_s1 + $0x108] sm:$0xff]  }
  0x49   : > { %3497 = vmatprep.subr.bf16.mxu1 %v4270_v2  ;;  %3548 = vmatpush3.bf16.msra.mxu0 %v4083_v45  ;;  %v809_v45 = vrot.slane %v4494_v44, 1 }
  0x4a   : > { %3549 = vmatprep.subr.bf16.mxu0 %v4270_v2 }
  0x4b   : > { %3478 = vmatmul.mubr.bf16.gmra.mrb[4].mxu1 %v433_v49  ;;  %3462 = vmatmul.mubr.bf16.gmra.mrb[4].mxu0 %v401_v50  ;;  %v810_v47 = vsel %vm803_vm2, %v807_v37, %v809_v45  ;;  %v4107_v49 = vld [vmem:[%s5548_s1 + $0xd8] sm:$0xff]   ;;  %v4645_v50 = vld [vmem:[%s4389_s11 + $0x10] sm:$0xff]  }
  0x4c   : > { %3498 = vmatpush3.bf16.msra.mxu1 %v4082_v46  ;;  %3481 = vmatprep.mubr.msk.bf16.mxu1 %vm4271_vm0, %v4270_v2  ;;  %v4108_v46 = vld [vmem:[%s5548_s1 + $0x118] sm:$0xff]   ;;  %v1600_v55 = vrot.slane %v4645_v50, 2  ;;  %v1317_v31 = vshrl.u32 %v4645_v50, 16 }
  0x4d   : > { %3499 = vmatprep.subr.bf16.mxu1 %v4270_v2  ;;  %3550 = vmatpush3.bf16.msra.mxu0 %v4087_v53  ;;  %v4112_v53 = vld [vmem:[%s5548_s1 + $0x128] sm:$0xff]  }
  0x4e   : > { %3551 = vmatprep.subr.bf16.mxu0 %v4270_v2  ;;  %3465 = vmatprep.mubr.msk.bf16.mxu0 %vm4271_vm0, %v4270_v2  ;;  %v4673_v63 = vsel %vm1598_vm3, %v1599_v58, %v1600_v55  ;;  %v4122_v58 = vld [vmem:[%s5548_s1 + $0x148] sm:$0xff]  }
  0x50   : > { %3500 = vmatpush3.bf16.msra.mxu1 %v4086_v57  ;;  %v4114_v57 = vld [vmem:[%s5548_s1 + $0x130] sm:$0xff]  }
  0x51   : > { %3501 = vmatprep.subr.bf16.mxu1 %v4270_v2  ;;  %3552 = vmatpush3.bf16.msra.mxu0 %v4089_v61 }
  0x52   : > { %3553 = vmatprep.subr.bf16.mxu0 %v4270_v2 }
  0x53   : > { %3482 = vmatmul.mubr.bf16.gmra.mrb[8].mxu1 %v441_v0  ;;  %3466 = vmatmul.mubr.bf16.gmra.mrb[8].mxu0 %v409_v4  ;;  %v4111_v0 = vld [vmem:[%s5548_s1 + $0xe8] sm:$0xff]  }
  0x54   : > { %3502 = vmatpush3.bf16.msra.mxu1 %v4088_v1  ;;  %3485 = vmatprep.mubr.msk.bf16.mxu1 %vm4271_vm0, %v4270_v2  ;;  %v1602_v1 = vrot.slane %v4669_v59, 2 }
  0x55   : > { %3503 = vmatprep.subr.bf16.mxu1 %v4270_v2  ;;  %3554 = vmatpush3.bf16.msra.mxu0 %v4092_v12 }
  0x56   : > { %3555 = vmatprep.subr.bf16.mxu0 %v4270_v2  ;;  %3469 = vmatprep.mubr.msk.bf16.mxu0 %vm4271_vm0, %v4270_v2  ;;  %v4691_v4 = vsel %vm1598_vm3, %v1600_v55, %v1602_v1 }
  0x58   : > { %3504 = vmatpush3.bf16.msra.mxu1 %v4093_v16  ;;  %v815_v16 = vrot.slane %v4463_v25, 1 }
  0x59   : > { %3556 = vmatpush3.bf16.msra.mxu0 %v4094_v18  ;;  %3505 = vmatprep.subr.bf16.mxu1 %v4270_v2 }
  0x5a   : > { %3557 = vmatprep.subr.bf16.mxu0 %v4270_v2  ;;  %v816_v18 = vsel %vm803_vm2, %v813_v3, %v815_v16 }
  0x5b   : > { %3486 = vmatmul.mubr.bf16.gmra.mrb[12].mxu1 %v449_v22  ;;  %3470 = vmatmul.mubr.bf16.gmra.mrb[12].mxu0 %v417_v24  ;;  %v4730_v22 = vsel %vm1598_vm3, %v1604_v15, %v1606_v20  ;;  %v4740_v24 = vld [vmem:[%s4389_s11 + $0x30] sm:$0xff]  }
  0x5c   : > { %3489 = vmatprep.mubr.msk.bf16.mxu1 %vm4271_vm0, %v4270_v2  ;;  %3506 = vmatpush3.bf16.msra.mxu1 %v4095_v23  ;;  %v818_v23 = vsel %vm803_vm2, %v815_v16, %v817_v21  ;;  %v1608_v26 = vrot.slane %v4740_v24, 2  ;;  %v1092_v16 = vrot.slane %v4698_v6, 1  ;;  %v1353_v21 = vshrl.u32 %v4740_v24, 16 }
  0x5d   : > { %3558 = vmatpush3.bf16.msra.mxu0 %v4097_v27  ;;  %3507 = vmatprep.subr.bf16.mxu1 %v4270_v2 }
  0x5e   : > { %3559 = vmatprep.subr.bf16.mxu0 %v4270_v2  ;;  %3561 = vmatprep.mubr.msk.bf16.mxu0 %vm4271_vm0, %v4270_v2 }
  0x60   : > { %3508 = vmatpush3.bf16.msra.mxu1 %v4098_v19 }
  0x61   : > { %3560 = vmatpush3.bf16.msra.mxu0 %v4099_v7  ;;  %3597 = vmatprep.subr.bf16.mxu1 %v4270_v2  ;;  %v1320_v7 = vshll.u32 %v4645_v50, 16 }
  0x62   : > { %3649 = vmatprep.subr.bf16.mxu0 %v4270_v2 }
  0x63   : > { %3490 = vmatmul.mubr.bf16.gmra.mrb[16].mxu1 %v457_v34  ;;  %v1319_v34 = vrot.slane %v1317_v31, 1  ;;  %v1094_v31 = vrot.slane %v4718_v17, 1 }
  0x64   : > { %3509 = vmatprep.mubr.msk.bf16.mxu1 %vm4271_vm0, %v4270_v2  ;;  %3562 = vmatmul.mubr.bf16.vlgmr.msra.gmra.mrb[16].mxu0 %v806_v36  ;;  %v4762_v36 = vsel %vm1598_vm3, %v1608_v26, %v1610_v32 }
  0x65   : > { %3650 = vmatpush3.bf16.msra.mxu0 %v4102_v35  ;;  %3565 = vmatprep.mubr.msk.bf16.mxu0 %vm4271_vm0, %v4270_v2  ;;  %v1322_v35 = vrot.slane %v1320_v7, 2  ;;  %v4134_v7 = vld [vmem:[%s5548_s1 + $0x168] sm:$0xff]  }
  0x66   : > { %3651 = vmatprep.subr.bf16.mxu0 %v4270_v2 }
  0x69   : > { %3652 = vmatpush3.bf16.msra.mxu0 %v4104_v38  ;;  %v1323_v38 = vor.u32 %v1322_v35, %v1319_v34  ;;  %v1095_v34 = vsel %vm803_vm2, %v1092_v16, %v1094_v31  ;;  %v4137_v35 = vld [vmem:[%s5548_s1 + $0x170] sm:$0xff]  }
  0x6a   : > { %3653 = vmatprep.subr.bf16.mxu0 %v4270_v2 }
  0x6b   : > { %3510 = vmatmul.mubr.bf16.vlgmr.msra.gmra.mrb[20].mxu1 %v4431_v10  ;;  %v4105_v10 = vld [vmem:[%s5548_s1 + $0xd0] sm:$0xff]  }
  0x6c   : > { %3598 = vmatpush3.bf16.msra.mxu1 %v4101_v39  ;;  %3513 = vmatprep.mubr.msk.bf16.mxu1 %vm4271_vm0, %v4270_v2  ;;  %v1326_v39 = vshrl.u32 %v4669_v59, 16 }
  0x6d   : > { %3566 = vmatmul.mubr.bf16.gmra.mrb[20].mxu0 %v808_v41  ;;  %3599 = vmatprep.subr.bf16.mxu1 %v4270_v2  ;;  %v1329_v41 = vshll.u32 %v4669_v59, 16 }
  0x6e   : > { %3569 = vmatprep.mubr.msk.bf16.mxu0 %vm4271_vm0, %v4270_v2  ;;  %3654 = vmatpush3.bf16.msra.mxu0 %v4106_v42  ;;  %v4773_v42 = vld [vmem:[%s4389_s11 + $0x40] sm:$0xff]  }
  0x6f   : > { %3655 = vmatprep.subr.bf16.mxu0 %v4270_v2 }
  0x70   : > { %3600 = vmatpush3.bf16.msra.mxu1 %v4103_v43  ;;  %v1612_v43 = vrot.slane %v4773_v42, 2 }
  0x71   : > { %3601 = vmatprep.subr.bf16.mxu1 %v4270_v2 }
  0x72   : > { %3656 = vmatpush3.bf16.msra.mxu0 %v4108_v46  ;;  %v1331_v46 = vrot.slane %v1329_v41, 2  ;;  %v1096_v41 = vrot.slane %v4740_v24, 1 }
  0x73   : > { %3514 = vmatmul.mubr.bf16.gmra.mrb[24].mxu1 %v4443_v14  ;;  %3657 = vmatprep.subr.bf16.mxu0 %v4270_v2  ;;  %v811_v14 = vrot.slane %v4425_v8, 1 }
  0x74   : > { %3517 = vmatprep.mubr.msk.bf16.mxu1 %vm4271_vm0, %v4270_v2  ;;  %3602 = vmatpush3.bf16.msra.mxu1 %v4105_v10  ;;  %v4783_v10 = vsel %vm1598_vm3, %v1610_v32, %v1612_v43 }
  0x75   : > { %3570 = vmatmul.mubr.bf16.gmra.mrb[24].mxu0 %v810_v47  ;;  %3603 = vmatprep.subr.bf16.mxu1 %v4270_v2  ;;  %v812_v61 = vsel %vm803_vm2, %v809_v45, %v811_v14  ;;  %v814_v12 = vsel %vm803_vm2, %v811_v14, %v813_v3  ;;  %v1328_v45 = vrot.slane %v1326_v39, 1 }
  0x76   : > { %3573 = vmatprep.mubr.msk.bf16.mxu0 %vm4271_vm0, %v4270_v2  ;;  %3658 = vmatpush3.bf16.msra.mxu0 %v4110_v48  ;;  %v1088_v48 = vrot.slane %v4645_v50, 1  ;;  %v4119_v50 = vld [vmem:[%s5548_s1 + $0x140] sm:$0xff]  }
  0x77   : > { %3659 = vmatprep.subr.bf16.mxu0 %v4270_v2 }
  0x78   : > { %3604 = vmatpush3.bf16.msra.mxu1 %v4107_v49  ;;  %v1332_v49 = vor.u32 %v1331_v46, %v1328_v45  ;;  %v1371_v45 = vshrl.u32 %v4773_v42, 16  ;;  %v1374_v46 = vshll.u32 %v4773_v42, 16 }
  0x79   : > { %3605 = vmatprep.subr.bf16.mxu1 %v4270_v2 }
  0x7a   : > { %3660 = vmatpush3.bf16.msra.mxu0 %v4112_v53  ;;  %v1333_v53 = vsel %vm1307_vm4, %v1323_v38, %v1332_v49 }
  0x7b   : > { %3518 = vmatmul.mubr.bf16.gmra.mrb[28].mxu1 %v4467_v29  ;;  %3661 = vmatprep.subr.bf16.mxu0 %v4270_v2  ;;  %v4116_v29 = vld [vmem:[%s5548_s1 + $0x138] sm:$0xff]  }
  0x7c   : > { %3521 = vmatprep.mubr.msk.bf16.mxu1 %vm4271_vm0, %v4270_v2  ;;  %3606 = vmatpush3.bf16.msra.mxu1 %v4109_v56  ;;  %v4126_v56 = vld [vmem:[%s5548_s1 + $0x190] sm:$0xff]  }
  0x7d   : > { %3574 = vmatmul.mubr.bf16.gmra.mrb[28].mxu0 %v812_v61  ;;  %3607 = vmatprep.subr.bf16.mxu1 %v4270_v2 }
  0x7e   : > { %3577 = vmatprep.mubr.msk.bf16.mxu0 %vm4271_vm0, %v4270_v2  ;;  %3662 = vmatpush3.bf16.msra.mxu0 %v4114_v57  ;;  %v1090_v57 = vrot.slane %v4669_v59, 1  ;;  %v4129_v59 = vld [vmem:[%s5548_s1 + $0x198] sm:$0xff]  }
  0x7f   : > { %3663 = vmatprep.subr.bf16.mxu0 %v4270_v2 }
  0x80   : > { %3608 = vmatpush3.bf16.msra.mxu1 %v4111_v0  ;;  %v1344_v0 = vshrl.u32 %v4718_v17, 16  ;;  %v1091_v3 = vsel %vm803_vm2, %v1088_v48, %v1090_v57 }
  0x81   : > { %3609 = vmatprep.subr.bf16.mxu1 %v4270_v2 }
  0x82   : > { %3664 = vmatpush3.bf16.msra.mxu0 %v4116_v29  ;;  %v4125_v29 = vld [vmem:[%s5548_s1 + $0x150] sm:$0xff]  }
  0x83   : > { %3522 = vmatmul.mubr.bf16.gmra.mrb[32].mxu1 %v4494_v44  ;;  %3753 = vmatprep.subr.bf16.mxu0 %v4270_v2  ;;  %v4715_v44 = vsel %vm1598_vm3, %v1602_v1, %v1604_v15  ;;  %v1347_v1 = vshll.u32 %v4718_v17, 16  ;;  %v4132_v15 = vld [vmem:[%s5548_s1 + $0x1a0] sm:$0xff]   ;;  %v4143_v17 = vld [vmem:[%s5548_s1 + $0x1b8] sm:$0xff]  }
  0x84   : > { %3525 = vmatprep.mubr.msk.bf16.mxu1 %vm4271_vm0, %v4270_v2  ;;  %3610 = vmatpush3.bf16.msra.mxu1 %v4113_v5 }
  0x85   : > { %3578 = vmatmul.mubr.bf16.gmra.mrb[32].mxu0 %v814_v12  ;;  %3611 = vmatprep.subr.bf16.mxu1 %v4270_v2  ;;  %v1346_v12 = vrot.slane %v1344_v0, 1 }
  0x86   : > { %3581 = vmatprep.mubr.msk.bf16.mxu0 %vm4271_vm0, %v4270_v2 }
  0x88   : > { %3612 = vmatpush3.bf16.msra.mxu1 %v4115_v13  ;;  %v1349_v13 = vrot.slane %v1347_v1, 2 }
  0x89   : > { %3701 = vmatprep.subr.bf16.mxu1 %v4270_v2 }
  0x8b   : > { %3526 = vmatmul.mubr.bf16.gmra.mrb[36].mxu1 %v4425_v8  ;;  %v1003_v8 = vld [vmem:[%s4389_s11 + $0x8] sm:$0xe] }
  0x8c   : > { %3529 = vmatprep.mubr.msk.bf16.mxu1 %vm4271_vm0, %v4270_v2  ;;  %v3075_v27 = vcombine.low %v1003_v8, %v4649_v51  ;;  %v4123_v51 = vld [vmem:[%s5548_s1 + $0x188] sm:$0xff]   ;;  %v1093_v8 = vsel %vm803_vm2, %v1090_v57, %v1092_v16  ;;  %v4905_v57 = vld [vmem:[%s4389_s11 + $0x50] ss:$0 sps:$4 sm:$0x33]  }
  0x8d   : > { %3582 = vmatmul.mubr.bf16.gmra.mrb[36].mxu0 %v816_v18  ;;  %v4128_v18 = vld [vmem:[%s5548_s1 + $0x158] sm:$0xff]   ;;  %v1392_v0 = vshll.u32 %v4905_v57, 16 }
  0x8e   : > { %3585 = vmatprep.mubr.msk.bf16.mxu0 %vm4271_vm0, %v4270_v2  ;;  %v1309_v30 = vshrl.u32 %v3075_v27, 16  ;;  %v1312_v19 = vshll.u32 %v3075_v27, 16  ;;  %v1087_v47 = vrot.slane %v3075_v27, 1 }
  0x90   : > { %v1311_v33 = vrot.slane %v1309_v30, 1  ;;  %v1089_v14 = vsel %vm803_vm2, %v1087_v47, %v1088_v48  ;;  %v1097_v47 = vsel %vm803_vm2, %v1094_v31, %v1096_v41  ;;  %v1373_v48 = vrot.slane %v1371_v45, 1  ;;  %v4159_v45 = vld [vmem:[%s5548_s1 + $0x1e0] sm:$0xff]  }
  0x93   : > { %3530 = vmatmul.mubr.bf16.gmra.mrb[40].mxu1 %v4436_v11  ;;  %v4748_v11 = vsel %vm1598_vm3, %v1606_v20, %v1608_v26  ;;  %v1350_v20 = vor.u32 %v1349_v13, %v1346_v12  ;;  %v4131_v26 = vld [vmem:[%s5548_s1 + $0x160] sm:$0xff]   ;;  %v1798_v13 = vld [vmem:[%s4389_s11 + $0x10] sm:$0xc] }
  0x94   : > { %3533 = vmatprep.mubr.msk.bf16.mxu1 %vm4271_vm0, %v4270_v2 }
  0x95   : > { %3586 = vmatmul.mubr.bf16.gmra.mrb[40].mxu0 %v818_v23  ;;  %v1356_v23 = vshll.u32 %v4740_v24, 16 }
  0x96   : > { %3589 = vmatprep.mubr.msk.bf16.mxu0 %vm4271_vm0, %v4270_v2 }
  0x97   : > { %v1358_v30 = vrot.slane %v1356_v23, 2  ;;  %v4932_v23 = vld [vmem:[%s4389_s11 + $0x18] sm:$0xff]  }
  0x9b   : > { %3534 = vmatmul.mubr.bf16.gmra.mrb[44].mxu1 %v4463_v25  ;;  %v1314_v25 = vrot.slane %v1312_v19, 2  ;;  %v4139_v19 = vld [vmem:[%s5548_s1 + $0x1b0] sm:$0xff]  }
  0x9c   : > { %3537 = vmatprep.mubr.msk.bf16.mxu1 %vm4271_vm0, %v4270_v2 }
  0x9d   : > { %3590 = vmatmul.mubr.bf16.gmra.mrb[44].mxu0 %v820_v28  ;;  %v1315_v37 = vor.u32 %v1314_v25, %v1311_v33  ;;  %v1355_v28 = vrot.slane %v1353_v21, 1  ;;  %v1362_v33 = vshrl.u32 %v4758_v62, 16  ;;  %v1365_v25 = vshll.u32 %v4758_v62, 16 }
  0x9e   : > { %3593 = vmatprep.mubr.msk.bf16.mxu0 %vm4271_vm0, %v4270_v2  ;;  %v1100_v62 = vrot.slane %v4773_v42, 1 }
  0x9f   : > { %v1359_v32 = vor.u32 %v1358_v30, %v1355_v28  ;;  %v1367_v39 = vrot.slane %v1365_v25, 2  ;;  %v4148_v30 = vld [vmem:[%s5548_s1 + $0x200] sm:$0xff]   ;;  %v4962_v25 = vld [vmem:[%s4389_s11 + $0x28] sm:$0xff]  }
  0xa0   : > { %v1101_v1 = vsel %vm803_vm2, %v1098_v52, %v1100_v62 }
  0xa3   : > { %3538 = vmatmul.mubr.bf16.gmra.mrb[48].mxu1 %v4489_v40  ;;  %v1324_v40 = vsel %vm1307_vm4, %v1315_v37, %v1323_v38  ;;  %v1360_v37 = vsel %vm1307_vm4, %v1350_v20, %v1359_v32  ;;  %v1364_v38 = vrot.slane %v1362_v33, 1 }
  0xa4   : > { %3541 = vmatprep.mubr.msk.bf16.mxu1 %vm4271_vm0, %v4270_v2 }
  0xa5   : > { %3594 = vmatmul.mubr.bf16.gmra.mrb[48].mxu0 %v4545_v9  ;;  %v4120_v9 = vld [vmem:[%s5548_s1 + $0x180] sm:$0xff]  }
  0xa6   : > { %3665 = vmatprep.mubr.msk.bf16.mxu0 %vm4271_vm0, %v4270_v2 }
  0xab   : > { %3542 = vmatmul.mubr.bf16.gmra.mrb[52].mxu1 %v4524_v60  ;;  %v1338_v60 = vshll.u32 %v4698_v6, 16  ;;  %v4136_v6 = vld [vmem:[%s5548_s1 + $0x1a8] sm:$0xff]  }
  0xac   : > { %3613 = vmatprep.mubr.msk.bf16.mxu1 %vm4271_vm0, %v4270_v2 }
  0xad   : > { %3666 = vmatmul.mubr.bf16.vlgmr.msra.gmra.mrb[52].mxu0 %v1324_v40  ;;  %v1340_v55 = vrot.slane %v1338_v60, 2  ;;  %v4142_v40 = vld [vmem:[%s5548_s1 + $0x178] sm:$0xff]  }
  0xae   : > { %3754 = vmatpush3.bf16.msra.mxu0 %v4120_v9  ;;  %3669 = vmatprep.mubr.msk.bf16.mxu0 %vm4271_vm0, %v4270_v2  ;;  %v1368_v9 = vor.u32 %v1367_v39, %v1364_v38  ;;  %v4988_v39 = vld [vmem:[%s4389_s11 + $0x30] sm:$0xff]  }
  0xaf   : > { %3755 = vmatprep.subr.bf16.mxu0 %v4270_v2  ;;  %v1341_v61 = vor.u32 %v1340_v55, %v1337_v54 }
  0xb0   : > { %v1369_v24 = vsel %vm1307_vm4, %v1359_v32, %v1368_v9  ;;  %v4147_v32 = vld [vmem:[%s5548_s1 + $0x1c0] sm:$0xff]  }
  0xb1   : > { %v1342_v5 = vsel %vm1307_vm4, %v1332_v49, %v1341_v61  ;;  %v1351_v27 = vsel %vm1307_vm4, %v1341_v61, %v1350_v20  ;;  %v1376_v49 = vrot.slane %v1374_v46, 2  ;;  %v1389_v61 = vshrl.u32 %v4905_v57, 16 }
  0xb2   : > { %3756 = vmatpush3.bf16.msra.mxu0 %v4123_v51  ;;  %v4893_v51 = vld [vmem:[%s4389_s11 + $0x48] sm:$0xff]  }
  0xb3   : > { %3614 = vmatmul.mubr.bf16.vlgmr.msra.gmra.mrb[56].mxu1 %v1089_v14  ;;  %3757 = vmatprep.subr.bf16.mxu0 %v4270_v2  ;;  %v1377_v60 = vor.u32 %v1376_v49, %v1373_v48  ;;  %v1380_v14 = vshrl.u32 %v4893_v51, 16  ;;  %v4162_v48 = vld [vmem:[%s5548_s1 + $0x1e8] sm:$0xff]  }
  0xb4   : > { %3702 = vmatpush3.bf16.msra.mxu1 %v4119_v50  ;;  %3617 = vmatprep.mubr.msk.bf16.mxu1 %vm4271_vm0, %v4270_v2  ;;  %v1383_v50 = vshll.u32 %v4893_v51, 16 }
  0xb5   : > { %3670 = vmatmul.mubr.bf16.gmra.mrb[56].mxu0 %v1333_v53  ;;  %3703 = vmatprep.subr.bf16.mxu1 %v4270_v2  ;;  %v1099_v53 = vsel %vm803_vm2, %v1096_v41, %v1098_v52  ;;  %v1378_v54 = vsel %vm1307_vm4, %v1368_v9, %v1377_v60  ;;  %v1382_v55 = vrot.slane %v1380_v14, 1  ;;  %v4160_v41 = vld [vmem:[%s5548_s1 + $0x220] sm:$0xff]   ;;  %v1889_v9 = vrot.slane %v4988_v39, 2  ;;  %v4165_v52 = vld [vmem:[%s5548_s1 + $0x1f0] sm:$0xff]  }
  0xb6   : > { %3673 = vmatprep.mubr.msk.bf16.mxu0 %vm4271_vm0, %v4270_v2  ;;  %3758 = vmatpush3.bf16.msra.mxu0 %v4126_v56  ;;  %v1385_v56 = vrot.slane %v1383_v50, 2  ;;  %v5040_v14 = vld [vmem:[%s4389_s11 + $0x40] sm:$0xff]   ;;  %v4169_v50 = vld [vmem:[%s5548_s1 + $0x1f8] sm:$0xff]  }
  0xb7   : > { %3759 = vmatprep.subr.bf16.mxu0 %v4270_v2 }
  0xb8   : > { %3704 = vmatpush3.bf16.msra.mxu1 %v4122_v58  ;;  %v1386_v58 = vor.u32 %v1385_v56, %v1382_v55 }
  0xb9   : > { %3705 = vmatprep.subr.bf16.mxu1 %v4270_v2 }
  0xba   : > { %3760 = vmatpush3.bf16.msra.mxu0 %v4129_v59  ;;  %v1387_v59 = vsel %vm1307_vm4, %v1377_v60, %v1386_v58 }
  0xbb   : > { %3618 = vmatmul.mubr.bf16.gmra.mrb[60].mxu1 %v1091_v3  ;;  %3761 = vmatprep.subr.bf16.mxu0 %v4270_v2  ;;  %v1391_v3 = vrot.slane %v1389_v61, 1 }
  0xbc   : > { %3621 = vmatprep.mubr.msk.bf16.mxu1 %vm4271_vm0, %v4270_v2  ;;  %3706 = vmatpush3.bf16.msra.mxu1 %v4125_v29  ;;  %v1394_v29 = vrot.slane %v1392_v0, 2 }
  0xbd   : > { %3674 = vmatmul.mubr.bf16.gmra.mrb[60].mxu0 %v1342_v5  ;;  %3707 = vmatprep.subr.bf16.mxu1 %v4270_v2  ;;  %v1102_v5 = vrot.slane %v4893_v51, 1 }
  0xbe   : > { %3677 = vmatprep.mubr.msk.bf16.mxu0 %vm4271_vm0, %v4270_v2  ;;  %3762 = vmatpush3.bf16.msra.mxu0 %v4132_v15  ;;  %v1395_v12 = vor.u32 %v1394_v29, %v1391_v3  ;;  %v4923_v15 = vld [vmem:[%s4389_s11 + $0x14] sm:$0xf]  ;;  %v2637_v3 = vld [vmem:[%s5552_s5] sm:$0xff]  ;;  %v4272_v29 = vmov 0  }
  0xbf   : > { %3763 = vmatprep.subr.bf16.mxu0 %v4270_v2  ;;  %v1103_v16 = vsel %vm803_vm2, %v1100_v62, %v1102_v5  ;;  %v4929_v21 = vcombine.low %v1798_v13, %v4923_v15  ;;  %4064 = vset.pattern.permute.xlu0 %v4272_v29 }
  0xc0   : > { %3708 = vmatpush3.bf16.msra.mxu1 %v4128_v18  ;;  %v4140_v18 = vld [vmem:[%s4389_s11 + $0x50] ss:$0 sps:$4 sm:$0x11]   ;;  %v1396_v20 = vsel %vm1307_vm4, %v1386_v58, %v1395_v12  ;;  %2657 = vperm.xlu0 %4064, %v2637_v3  }
  0xc1   : > { %3709 = vmatprep.subr.bf16.mxu1 %v4270_v2  ;;  %4065 = vset.pattern.permute.xlu1 %v4272_v29  ;;  %v2104_v42 = vshrl.u32 %v4929_v21, 16  ;;  %v2648_v29 = vld [vmem:[%s5552_s5 + $0x58] sm:$0xff] }
  0xc2   : > { %3764 = vmatpush3.bf16.msra.mxu0 %v4136_v6  ;;  %v1104_v6 = vrot.slane %v4140_v18, 1 }
  0xc3   : > { %3622 = vmatmul.mubr.bf16.gmra.mrb[64].mxu1 %v1093_v8  ;;  %3765 = vmatprep.subr.bf16.mxu0 %v4270_v2  ;;  %v1882_v8 = vrot.slane %v4929_v21, 2 }
  0xc4   : > { %3625 = vmatprep.mubr.msk.bf16.mxu1 %vm4271_vm0, %v4270_v2  ;;  %3710 = vmatpush3.bf16.msra.mxu1 %v4131_v26  ;;  %v1883_v26 = vrot.slane %v4932_v23, 2 }
  0xc5   : > { %3678 = vmatmul.mubr.bf16.gmra.mrb[64].mxu0 %v1351_v27  ;;  %3711 = vmatprep.subr.bf16.mxu1 %v4270_v2  ;;  %v1105_v27 = vsel %vm803_vm2, %v1102_v5, %v1104_v6  ;;  %v2638_v6 = vld [vmem:[%s5552_s5 + $0x8] sm:$0xff] }
  0xc6   : > { %3681 = vmatprep.mubr.msk.bf16.mxu0 %vm4271_vm0, %v4270_v2  ;;  %3766 = vmatpush3.bf16.msra.mxu0 %v4139_v19  ;;  %v1884_v28 = vsel %vm1598_vm3, %v1882_v8, %v1883_v26  ;;  %v4946_v19 = vld [vmem:[%s4389_s11 + $0x20] sm:$0xff]   ;;  %v2639_v8 = vld [vmem:[%s5552_s5 + $0x10] sm:$0xff] }
  0xc7   : > { %3767 = vmatprep.subr.bf16.mxu0 %v4270_v2  ;;  %v1885_v31 = vrot.slane %v4946_v19, 2  ;;  %2662 = vperm.xlu0 %4064, %v2638_v6  }
  0xc8   : > { %3712 = vmatpush3.bf16.msra.mxu1 %v4134_v7  ;;  %v4151_v7 = vld [vmem:[%s5548_s1 + $0x208] sm:$0xff]   ;;  %2667 = vperm.xlu1 %4065, %v2639_v8   ;;  %v2395_v8 = vrot.slane %v4932_v23, 3 }
  0xc9   : > { %3713 = vmatprep.subr.bf16.mxu1 %v4270_v2  ;;  %v1886_v33 = vsel %vm1598_vm3, %v1883_v26, %v1885_v31 }
  0xca   : > { %3768 = vmatpush3.bf16.msra.mxu0 %v4143_v17  ;;  %v4154_v17 = vld [vmem:[%s5548_s1 + $0x210] sm:$0xff]  }
  0xcb   : > { %3626 = vmatmul.mubr.bf16.gmra.mrb[68].mxu1 %v1095_v34  ;;  %3857 = vmatprep.subr.bf16.mxu0 %v4270_v2  ;;  %v4150_v34 = vld [vmem:[%s5548_s1 + $0x1c8] sm:$0xff]  }
  0xcc   : > { %3629 = vmatprep.mubr.msk.bf16.mxu1 %vm4271_vm0, %v4270_v2  ;;  %3714 = vmatpush3.bf16.msra.mxu1 %v4137_v35  ;;  %v1887_v35 = vrot.slane %v4962_v25, 2 }
  0xcd   : > { %3682 = vmatmul.mubr.bf16.gmra.mrb[68].mxu0 %v1360_v37  ;;  %3715 = vmatprep.subr.bf16.mxu1 %v4270_v2  ;;  %v4153_v37 = vld [vmem:[%s5548_s1 + $0x1d0] sm:$0xff]  }
  0xce   : > { %3685 = vmatprep.mubr.msk.bf16.mxu0 %vm4271_vm0, %v4270_v2  ;;  %v1888_v38 = vsel %vm1598_vm3, %v1885_v31, %v1887_v35  ;;  %v1890_v46 = vsel %vm1598_vm3, %v1887_v35, %v1889_v9  ;;  %v2640_v31 = vld [vmem:[%s5552_s5 + $0x18] sm:$0xff] }
  0xcf   : > { %2672 = vperm.xlu1 %4065, %v2640_v31  }
  0xd0   : > { %3716 = vmatpush3.bf16.msra.mxu1 %v4142_v40  ;;  %v4156_v40 = vld [vmem:[%s5548_s1 + $0x1d8] sm:$0xff]  }
  0xd1   : > { %3805 = vmatprep.subr.bf16.mxu1 %v4270_v2 }
  0xd3   : > { %3630 = vmatmul.mubr.bf16.gmra.mrb[72].mxu1 %v1097_v47  ;;  %v5014_v47 = vld [vmem:[%s4389_s11 + $0x38] sm:$0xff]  }
  0xd4   : > { %3633 = vmatprep.mubr.msk.bf16.mxu1 %vm4271_vm0, %v4270_v2  ;;  %v1891_v49 = vrot.slane %v5014_v47, 2 }
  0xd5   : > { %3686 = vmatmul.mubr.bf16.gmra.mrb[72].mxu0 %v1369_v24  ;;  %v4167_v24 = vld [vmem:[%s5548_s1 + $0x230] sm:$0xff]  }
  0xd6   : > { %3689 = vmatprep.mubr.msk.bf16.mxu0 %vm4271_vm0, %v4270_v2  ;;  %v1892_v60 = vsel %vm1598_vm3, %v1889_v9, %v1891_v49 }
  0xdb   : > { %3634 = vmatmul.mubr.bf16.gmra.mrb[76].mxu1 %v1099_v53 }
  0xdc   : > { %3637 = vmatprep.mubr.msk.bf16.mxu1 %vm4271_vm0, %v4270_v2 }
  0xdd   : > { %3690 = vmatmul.mubr.bf16.gmra.mrb[76].mxu0 %v1378_v54 }
  0xde   : > { %3693 = vmatprep.mubr.msk.bf16.mxu0 %vm4271_vm0, %v4270_v2 }
  0xe3   : > { %3638 = vmatmul.mubr.bf16.gmra.mrb[80].mxu1 %v1101_v1 }
  0xe4   : > { %3641 = vmatprep.mubr.msk.bf16.mxu1 %vm4271_vm0, %v4270_v2 }
  0xe5   : > { %3694 = vmatmul.mubr.bf16.gmra.mrb[80].mxu0 %v1387_v59  ;;  %v5062_v59 = vld [vmem:[%s4389_s11 + $0x48] sm:$0xff]  }
  0xe6   : > { %3697 = vmatprep.mubr.msk.bf16.mxu0 %vm4271_vm0, %v4270_v2 }
  0xeb   : > { %3642 = vmatmul.mubr.bf16.gmra.mrb[84].mxu1 %v1103_v16 }
  0xec   : > { %3645 = vmatprep.mubr.msk.bf16.mxu1 %vm4271_vm0, %v4270_v2 }
  0xed   : > { %3698 = vmatmul.mubr.bf16.gmra.mrb[84].mxu0 %v1396_v20 }
  0xee   : > { %3769 = vmatprep.mubr.msk.bf16.mxu0 %vm4271_vm0, %v4270_v2 }
  0xf3   : > { %3646 = vmatmul.mubr.bf16.gmra.mrb[88].mxu1 %v1105_v27 }
  0xf4   : > { %3717 = vmatprep.mubr.msk.bf16.mxu1 %vm4271_vm0, %v4270_v2 }
  0xf5   : > { %3770 = vmatmul.mubr.bf16.vlgmr.msra.gmra.mrb[88].mxu0 %v1884_v28 }
  0xf6   : > { %3858 = vmatpush3.bf16.msra.mxu0 %v4148_v30  ;;  %3773 = vmatprep.mubr.msk.bf16.mxu0 %vm4271_vm0, %v4270_v2  ;;  %v5089_v30 = vld [vmem:[%s4389_s11 + $0x50] sm:$0xff]  }
  0xf7   : > { %3859 = vmatprep.subr.bf16.mxu0 %v4270_v2 }
  0xfa   : > { %3860 = vmatpush3.bf16.msra.mxu0 %v4151_v7  ;;  %v2641_v7 = vld [vmem:[%s5552_s5 + $0x20] sm:$0xff] }
  0xfb   : > { %3718 = vmatmul.mubr.bf16.vlgmr.msra.gmra.mrb[92].mxu1 %v4673_v63  ;;  %3861 = vmatprep.subr.bf16.mxu0 %v4270_v2  ;;  %v4157_v63 = vld [vmem:[%s5548_s1 + $0x218] sm:$0xff]  }
  0xfc   : > { %3806 = vmatpush3.bf16.msra.mxu1 %v4147_v32  ;;  %3721 = vmatprep.mubr.msk.bf16.mxu1 %vm4271_vm0, %v4270_v2 }
  0xfd   : > { %3774 = vmatmul.mubr.bf16.gmra.mrb[92].mxu0 %v1886_v33  ;;  %3807 = vmatprep.subr.bf16.mxu1 %v4270_v2 }
  0xfe   : > { %3777 = vmatprep.mubr.msk.bf16.mxu0 %vm4271_vm0, %v4270_v2  ;;  %3862 = vmatpush3.bf16.msra.mxu0 %v4154_v17 }
  0xff   : > { %3863 = vmatprep.subr.bf16.mxu0 %v4270_v2  ;;  %2677 = vperm.xlu0 %4064, %v2641_v7  }
 0x100   : > { %3808 = vmatpush3.bf16.msra.mxu1 %v4150_v34 }
 0x101   : > { %3809 = vmatprep.subr.bf16.mxu1 %v4270_v2 }
 0x102   : > { %3864 = vmatpush3.bf16.msra.mxu0 %v4157_v63 }
 0x103   : > { %3722 = vmatmul.mubr.bf16.gmra.mrb[96].mxu1 %v4691_v4  ;;  %3865 = vmatprep.subr.bf16.mxu0 %v4270_v2  ;;  %v4164_v4 = vld [vmem:[%s5548_s1 + $0x228] sm:$0xff]  }
 0x104   : > { %3725 = vmatprep.mubr.msk.bf16.mxu1 %vm4271_vm0, %v4270_v2  ;;  %3810 = vmatpush3.bf16.msra.mxu1 %v4153_v37  ;;  %v2642_v37 = vld [vmem:[%s5552_s5 + $0x28] sm:$0xff] }
 0x105   : > { %3778 = vmatmul.mubr.bf16.gmra.mrb[96].mxu0 %v1888_v38  ;;  %3811 = vmatprep.subr.bf16.mxu1 %v4270_v2  ;;  %v2643_v38 = vld [vmem:[%s5552_s5 + $0x30] sm:$0xff] }
 0x106   : > { %3781 = vmatprep.mubr.msk.bf16.mxu0 %vm4271_vm0, %v4270_v2  ;;  %3866 = vmatpush3.bf16.msra.mxu0 %v4160_v41 }
 0x107   : > { %3867 = vmatprep.subr.bf16.mxu0 %v4270_v2  ;;  %2682 = vperm.xlu1 %4065, %v2642_v37   ;;  %v2650_v37 = vld [vmem:[%s5552_s5 + $0x68] sm:$0xff] }
 0x108   : > { %3812 = vmatpush3.bf16.msra.mxu1 %v4156_v40  ;;  %2687 = vperm.xlu0 %4064, %v2643_v38  }
 0x109   : > { %3813 = vmatprep.subr.bf16.mxu1 %v4270_v2 }
 0x10a   : > { %3868 = vmatpush3.bf16.msra.mxu0 %v4164_v4  ;;  %v4168_v4 = vld [vmem:[%s4389_s11 + $0x58] ss:$0 sps:$4 sm:$0x33]  }
 0x10b   : > { %3726 = vmatmul.mubr.bf16.gmra.mrb[100].mxu1 %v4715_v44  ;;  %3869 = vmatprep.subr.bf16.mxu0 %v4270_v2  ;;  %v4170_v44 = vld [vmem:[%s5548_s1 + $0x238] sm:$0xff]  }
 0x10c   : > { %3729 = vmatprep.mubr.msk.bf16.mxu1 %vm4271_vm0, %v4270_v2  ;;  %3814 = vmatpush3.bf16.msra.mxu1 %v4159_v45  ;;  %v2644_v45 = vld [vmem:[%s5552_s5 + $0x38] sm:$0xff] }
 0x10d   : > { %3782 = vmatmul.mubr.bf16.gmra.mrb[100].mxu0 %v1890_v46  ;;  %3815 = vmatprep.subr.bf16.mxu1 %v4270_v2  ;;  %v2645_v46 = vld [vmem:[%s5552_s5 + $0x40] sm:$0xff] }
 0x10e   : > { %3785 = vmatprep.mubr.msk.bf16.mxu0 %vm4271_vm0, %v4270_v2  ;;  %3870 = vmatpush3.bf16.msra.mxu0 %v4167_v24  ;;  %v1614_v24 = vrot.slane %v4893_v51, 2 }
 0x10f   : > { %3871 = vmatprep.subr.bf16.mxu0 %v4270_v2  ;;  %2692 = vperm.xlu1 %4065, %v2644_v45   ;;  %v2653_v45 = vld [vmem:[%s5552_s5 + $0x80] sm:$0xff] }
 0x110   : > { %3816 = vmatpush3.bf16.msra.mxu1 %v4162_v48  ;;  %2697 = vperm.xlu0 %4064, %v2645_v46   ;;  %v1615_v51 = vsel %vm1598_vm3, %v1612_v43, %v1614_v24  ;;  %v2107_v43 = vshll.u32 %v4929_v21, 16 }
 0x111   : > { %3817 = vmatprep.subr.bf16.mxu1 %v4270_v2 }
 0x112   : > { %3872 = vmatpush3.bf16.msra.mxu0 %v4170_v44  ;;  %v2109_v31 = vrot.slane %v2107_v43, 3 }
 0x113   : > { %3730 = vmatmul.mubr.bf16.gmra.mrb[104].mxu1 %v4730_v22  ;;  %v1893_v22 = vrot.slane %v5040_v14, 2 }
 0x114   : > { %3733 = vmatprep.mubr.msk.bf16.mxu1 %vm4271_vm0, %v4270_v2  ;;  %3818 = vmatpush3.bf16.msra.mxu1 %v4165_v52 }
 0x115   : > { %3786 = vmatmul.mubr.bf16.gmra.mrb[104].mxu0 %v1892_v60  ;;  %3819 = vmatprep.subr.bf16.mxu1 %v4270_v2  ;;  %v1894_v1 = vsel %vm1598_vm3, %v1891_v49, %v1893_v22  ;;  %v2372_v60 = vld [vmem:[%s4389_s11 + $0x10] sm:$0x8] }
 0x116   : > { %v5049_v53 = vpop.f32.mrb[0].mxu1  ;;  %v5051_v54 = vpop.f32.mrb[0].mxu0  ;;  %3789 = vmatprep.mubr.msk.bf16.mxu0 %vm4271_vm0, %v4270_v2  ;;  %v3218_v3 = vcombine.low %v2372_v60, %v4923_v15  ;;  %v2112_v15 = vshrl.u32 %v4932_v23, 16  ;;  %v2397_v60 = vrot.slane %v4946_v19, 3 }
 0x117   : > { %v3475_v55 = vpop.f32.mrb[1].mxu1  ;;  %v3459_v56 = vpop.f32.mrb[1].mxu0 }
 0x118   : > { %v5056_v62 = vpop.f32.mrb[2].mxu1  ;;  %v5058_v58 = vpop.f32.mrb[2].mxu0  ;;  %3820 = vmatpush3.bf16.msra.mxu1 %v4169_v50  ;;  %v2646_v55 = vld [vmem:[%s5552_s5 + $0x48] sm:$0xff]  ;;  %v2647_v56 = vld [vmem:[%s5552_s5 + $0x50] sm:$0xff]  ;;  %v2394_v6 = vrot.slane %v3218_v3, 3 }
 0x119   : > { %v3476_v61 = vpop.f32.mrb[3].mxu1  ;;  %v3460_v0 = vpop.f32.mrb[3].mxu0  ;;  %2702 = vperm.xlu1 %4065, %v2646_v55   ;;  %2707 = vperm.xlu0 %4064, %v2647_v56  }
 0x11b   : > { %3734 = vmatmul.mubr.bf16.gmra.mrb[108].mxu1 %v4748_v11  ;;  %v1895_v11 = vrot.slane %v5062_v59, 2 }
 0x11c   : > { %3737 = vmatprep.mubr.msk.bf16.mxu1 %vm4271_vm0, %v4270_v2 }
 0x11d   : > { %3790 = vmatmul.mubr.bf16.gmra.mrb[108].mxu0 %v1894_v1  ;;  %v1896_v28 = vsel %vm1598_vm3, %v1893_v22, %v1895_v11  ;;  %2712 = vperm.xlu1 %4065, %v2648_v29  }
 0x11e   : > { %v5070_v5 = vpop.f32.mrb[4].mxu1  ;;  %v5072_v12 = vpop.f32.mrb[4].mxu0  ;;  %3793 = vmatprep.mubr.msk.bf16.mxu0 %vm4271_vm0, %v4270_v2 }
 0x11f   : > { %v3479_v13 = vpop.f32.mrb[5].mxu1  ;;  %v3463_v16 = vpop.f32.mrb[5].mxu0 }
 0x120   : > { %v5077_v18 = vpop.f32.mrb[6].mxu1  ;;  %v5079_v20 = vpop.f32.mrb[6].mxu0  ;;  %v1616_v13 = vrot.slane %v4905_v57, 2  ;;  %v2115_v16 = vshll.u32 %v4932_v23, 16  ;;  %v2651_v23 = vld [vmem:[%s5552_s5 + $0x70] sm:$0xff] }
 0x121   : > { %v3480_v26 = vpop.f32.mrb[7].mxu1  ;;  %v3464_v27 = vpop.f32.mrb[7].mxu0  ;;  %2722 = vperm.xlu1 %4065, %v2650_v37  }
 0x122   : > { %v1617_v7 = vsel %vm1598_vm3, %v1614_v24, %v1616_v13 }
 0x123   : > { %3738 = vmatmul.mubr.bf16.gmra.mrb[112].mxu1 %v4762_v36  ;;  %v1897_v36 = vrot.slane %v5089_v30, 2 }
 0x124   : > { %3741 = vmatprep.mubr.msk.bf16.mxu1 %vm4271_vm0, %v4270_v2 }
 0x125   : > { %3794 = vmatmul.mubr.bf16.gmra.mrb[112].mxu0 %v1896_v28  ;;  %v1898_v9 = vsel %vm1598_vm3, %v1895_v11, %v1897_v36  ;;  %v2649_v11 = vld [vmem:[%s5552_s5 + $0x60] sm:$0xff]  ;;  %v2106_v28 = vrot.slane %v2104_v42, 2  ;;  %v2654_v42 = vld [vmem:[%s5552_s5 + $0x88] sm:$0xff] }
 0x126   : > { %v5100_v32 = vpop.f32.mrb[8].mxu1  ;;  %v5102_v33 = vpop.f32.mrb[8].mxu0  ;;  %3797 = vmatprep.mubr.msk.bf16.mxu0 %vm4271_vm0, %v4270_v2  ;;  %2717 = vperm.xlu0 %4064, %v2649_v11  }
 0x127   : > { %v3483_v17 = vpop.f32.mrb[9].mxu1  ;;  %v3467_v34 = vpop.f32.mrb[9].mxu0  ;;  %v2110_v46 = vor.u32 %v2109_v31, %v2106_v28  ;;  %v2399_v28 = vrot.slane %v4962_v25, 3 }
 0x128   : > { %v5107_v35 = vpop.f32.mrb[10].mxu1  ;;  %v5109_v63 = vpop.f32.mrb[10].mxu0  ;;  %v2114_v17 = vrot.slane %v2112_v15, 2  ;;  %v2117_v34 = vrot.slane %v2115_v16, 3 }
 0x129   : > { %v3484_v41 = vpop.f32.mrb[11].mxu1  ;;  %v3468_v40 = vpop.f32.mrb[11].mxu0 }
 0x12a   : > { %2727 = vperm.xlu0 %4064, %v2651_v23   ;;  %v2118_v24 = vor.u32 %v2117_v34, %v2114_v17 }
 0x12b   : > { %3742 = vmatmul.mubr.bf16.gmra.mrb[116].mxu1 %v4783_v10  ;;  %v1899_v10 = vrot.slane %v4168_v4, 2  ;;  %v2652_v4 = vld [vmem:[%s5552_s5 + $0x78] sm:$0xff] }
 0x12c   : > { %3745 = vmatprep.mubr.msk.bf16.mxu1 %vm4271_vm0, %v4270_v2  ;;  %2732 = vperm.xlu1 %4065, %v2652_v4   ;;  %v2400_v4 = vsel %vm2393_vm5, %v2397_v60, %v2399_v28 }
 0x12d   : > { %3798 = vmatmul.mubr.bf16.gmra.mrb[116].mxu0 %v1898_v9  ;;  %v1900_v1 = vsel %vm1598_vm3, %v1897_v36, %v1899_v10  ;;  %v2396_v9 = vsel %vm2393_vm5, %v2394_v6, %v2395_v8  ;;  %v2121_v10 = vshrl.u32 %v4946_v19, 16 }
 0x12e   : > { %v5129_v48 = vpop.f32.mrb[12].mxu1  ;;  %v5131_v49 = vpop.f32.mrb[12].mxu0  ;;  %3801 = vmatprep.mubr.msk.bf16.mxu0 %vm4271_vm0, %v4270_v2  ;;  %2737 = vperm.xlu0 %4064, %v2653_v45  }
 0x12f   : > { %v3487_v44 = vpop.f32.mrb[13].mxu1  ;;  %v3471_v52 = vpop.f32.mrb[13].mxu0 }
 0x130   : > { %v5136_v50 = vpop.f32.mrb[14].mxu1  ;;  %v5141_v22 = vpop.f32.mrb[14].mxu0  ;;  %v2124_v44 = vshll.u32 %v4946_v19, 16  ;;  %2742 = vperm.xlu1 %4065, %v2654_v42  }
 0x131   : > { %v3488_v61 = vpop.f32.mrb[15].mxu1  ;;  %v3472_v0 = vpop.f32.mrb[15].mxu0 }
 0x132   : > { %v2119_v61 = vsel %vm2102_vm6, %v2110_v46, %v2118_v24  ;;  %v2126_v3 = vrot.slane %v2124_v44, 3  ;;  %v2139_v46 = vshrl.u32 %v4988_v39, 16 }
 0x133   : > { %3746 = vmatmul.mubr.bf16.gmra.mrb[120].mxu1 %v1615_v51 }
 0x134   : > { %3749 = vmatprep.mubr.msk.bf16.mxu1 %vm4271_vm0, %v4270_v2 }
 0x135   : > { %3802 = vmatmul.mubr.bf16.gmra.mrb[120].mxu0 %v1900_v1  ;;  %v2123_v1 = vrot.slane %v2121_v10, 2 }
 0x136   : > { %v5164_v21 = vpop.f32.mrb[16].mxu1  ;;  %3873 = vmatprep.mubr.msk.bf16.mxu0 %vm4271_vm0, %v4270_v2 }
 0x137   : > { %v3491_v26 = vpop.f32.mrb[17].mxu1  ;;  %v914_v27 = vpop.f32.mrb[16].mxu0  ;;  %v2127_v6 = vor.u32 %v2126_v3, %v2123_v1 }
 0x138   : > { %v5169_v57 = vpop.f32.mrb[18].mxu1  ;;  %v3563_v36 = vpop.f32.mrb[17].mxu0  ;;  %v2130_v26 = vshrl.u32 %v4962_v25, 16 }
 0x139   : > { %v3492_v38 = vpop.f32.mrb[19].mxu1  ;;  %v917_v41 = vpop.f32.mrb[18].mxu0  ;;  %v2128_v36 = vsel %vm2102_vm6, %v2118_v24, %v2127_v6  ;;  %v2142_v24 = vshll.u32 %v4988_v39, 16 }
 0x13a   : > { %v3564_v40 = vpop.f32.mrb[19].mxu0  ;;  %v2132_v34 = vrot.slane %v2130_v26, 2 }
 0x13b   : > { %3750 = vmatmul.mubr.bf16.gmra.mrb[124].mxu1 %v1617_v7 }
 0x13c   : > { %3821 = vmatprep.mubr.msk.bf16.mxu1 %vm4271_vm0, %v4270_v2 }
 0x13d   : > { %3874 = vmatmul.mubr.bf16.vlgmr.msra.gmra.mrb[124].mxu0 %v2396_v9 }
 0x13e   : > { %v711_v52 = vpop.f32.mrb[20].mxu1  ;;  %3877 = vmatprep.mubr.msk.bf16.mxu0 %vm4271_vm0, %v4270_v2 }
 0x13f   : > { %v712_v51 = vadd.f32 %v711_v52, %v5051_v54  ;;  %v3511_v55 = vpop.f32.mrb[21].mxu1  ;;  %v2398_v54 = vsel %vm2393_vm5, %v2395_v8, %v2397_v60 }
 0x140   : > { %v714_v56 = vpop.f32.mrb[22].mxu1  ;;  %v922_v0 = vpop.f32.mrb[20].mxu0 }
 0x141   : > { %v5197_v43 = vadd.f32 %v914_v27, %v712_v51  ;;  %v715_v29 = vadd.f32 %v714_v56, %v5058_v58  ;;  %v3512_v11 = vpop.f32.mrb[23].mxu1  ;;  %v3567_v19 = vpop.f32.mrb[21].mxu0  ;;  %v2133_v27 = vshll.u32 %v4962_v25, 16  ;;  %v2141_v56 = vrot.slane %v2139_v46, 2 }
 0x142   : > { %v925_v13 = vpop.f32.mrb[22].mxu0 }
 0x143   : > { %v5201_v15 = vadd.f32 %v917_v41, %v715_v29  ;;  %3822 = vmatmul.mubr.bf16.vlgmr.msra.gmra.mrb[128].mxu1 %v2119_v61  ;;  %v3568_v16 = vpop.f32.mrb[23].mxu0  ;;  %v2135_v37 = vrot.slane %v2133_v27, 3  ;;  %v2144_v61 = vrot.slane %v2142_v24, 3 }
 0x144   : > { %3825 = vmatprep.mubr.msk.bf16.mxu1 %vm4271_vm0, %v4270_v2 }
 0x145   : > { %3878 = vmatmul.mubr.bf16.gmra.mrb[128].mxu0 %v2398_v54  ;;  %v2151_v54 = vshll.u32 %v5014_v47, 16 }
 0x146   : > { %v719_v58 = vpop.f32.mrb[24].mxu1  ;;  %3881 = vmatprep.mubr.msk.bf16.mxu0 %vm4271_vm0, %v4270_v2 }
 0x147   : > { %v720_v8 = vadd.f32 %v719_v58, %v5072_v12  ;;  %v3515_v31 = vpop.f32.mrb[25].mxu1  ;;  %v2136_v12 = vor.u32 %v2135_v37, %v2132_v34 }
 0x148   : > { %v722_v7 = vpop.f32.mrb[26].mxu1  ;;  %v930_v17 = vpop.f32.mrb[24].mxu0  ;;  %v2153_v31 = vrot.slane %v2151_v54, 3 }
 0x149   : > { %v5212_v23 = vadd.f32 %v922_v0, %v720_v8  ;;  %v723_v38 = vadd.f32 %v722_v7, %v5079_v20  ;;  %v3516_v41 = vpop.f32.mrb[27].mxu1  ;;  %v3571_v40 = vpop.f32.mrb[25].mxu0  ;;  %v2401_v20 = vrot.slane %v4988_v39, 3  ;;  %v2137_v51 = vsel %vm2102_vm6, %v2127_v6, %v2136_v12 }
 0x14a   : > { %v933_v9 = vpop.f32.mrb[26].mxu0  ;;  %v2157_v40 = vshrl.u32 %v5040_v14, 16 }
 0x14b   : > { %v5216_v45 = vadd.f32 %v925_v13, %v723_v38  ;;  %3826 = vmatmul.mubr.bf16.gmra.mrb[132].mxu1 %v2128_v36  ;;  %v3572_v25 = vpop.f32.mrb[27].mxu0  ;;  %v2402_v11 = vsel %vm2393_vm5, %v2399_v28, %v2401_v20  ;;  %v2148_v13 = vshrl.u32 %v5014_v47, 16 }
 0x14c   : > { %3829 = vmatprep.mubr.msk.bf16.mxu1 %vm4271_vm0, %v4270_v2 }
 0x14d   : > { %3882 = vmatmul.mubr.bf16.gmra.mrb[132].mxu0 %v2400_v4  ;;  %v2150_v8 = vrot.slane %v2148_v13, 2 }
 0x14e   : > { %v727_v10 = vpop.f32.mrb[28].mxu1  ;;  %3885 = vmatprep.mubr.msk.bf16.mxu0 %vm4271_vm0, %v4270_v2 }
 0x14f   : > { %v728_v44 = vadd.f32 %v727_v10, %v5102_v33  ;;  %v3519_v52 = vpop.f32.mrb[29].mxu1  ;;  %v2145_v33 = vor.u32 %v2144_v61, %v2141_v56 }
 0x150   : > { %v730_v60 = vpop.f32.mrb[30].mxu1  ;;  %v938_v55 = vpop.f32.mrb[28].mxu0 }
 0x151   : > { %v5227_v0 = vadd.f32 %v930_v17, %v728_v44  ;;  %v731_v1 = vadd.f32 %v730_v60, %v5109_v63  ;;  %v3520_v3 = vpop.f32.mrb[31].mxu1  ;;  %v3575_v42 = vpop.f32.mrb[29].mxu0  ;;  %v2403_v63 = vrot.slane %v5014_v47, 3  ;;  %v2146_v58 = vsel %vm2102_vm6, %v2136_v12, %v2145_v33 }
 0x152   : > { %v941_v29 = vpop.f32.mrb[30].mxu0  ;;  %v2166_v3 = vshrl.u32 %v5062_v59, 16  ;;  %v2169_v42 = vshll.u32 %v5062_v59, 16 }
 0x153   : > { %v5231_v19 = vadd.f32 %v933_v9, %v731_v1  ;;  %3830 = vmatmul.mubr.bf16.gmra.mrb[136].mxu1 %v2137_v51  ;;  %v3576_v39 = vpop.f32.mrb[31].mxu0  ;;  %v2404_v38 = vsel %vm2393_vm5, %v2401_v20, %v2403_v63  ;;  %v2160_v9 = vshll.u32 %v5040_v14, 16  ;;  %v2159_v20 = vrot.slane %v2157_v40, 2 }
 0x154   : > { %3833 = vmatprep.mubr.msk.bf16.mxu1 %vm4271_vm0, %v4270_v2 }
 0x155   : > { %3886 = vmatmul.mubr.bf16.gmra.mrb[136].mxu0 %v2402_v11  ;;  %v2162_v44 = vrot.slane %v2160_v9, 3 }
 0x156   : > { %v735_v16 = vpop.f32.mrb[32].mxu1  ;;  %3889 = vmatprep.mubr.msk.bf16.mxu0 %vm4271_vm0, %v4270_v2 }
 0x157   : > { %v736_v6 = vadd.f32 %v735_v16, %v5131_v49  ;;  %v3523_v26 = vpop.f32.mrb[33].mxu1  ;;  %v2154_v49 = vor.u32 %v2153_v31, %v2150_v8  ;;  %v2168_v16 = vrot.slane %v2166_v3, 2 }
 0x158   : > { %v738_v27 = vpop.f32.mrb[34].mxu1  ;;  %v946_v28 = vpop.f32.mrb[32].mxu0 }
 0x159   : > { %v5242_v7 = vadd.f32 %v938_v55, %v736_v6  ;;  %v739_v36 = vadd.f32 %v738_v27, %v5141_v22  ;;  %v3524_v17 = vpop.f32.mrb[35].mxu1  ;;  %v3579_v34 = vpop.f32.mrb[33].mxu0  ;;  %v2405_v22 = vrot.slane %v5040_v14, 3  ;;  %v2155_v24 = vsel %vm2102_vm6, %v2145_v33, %v2154_v49 }
 0x15a   : > { %v949_v37 = vpop.f32.mrb[34].mxu0  ;;  %v2178_v17 = vshll.u32 %v5089_v30, 16  ;;  %v2409_v34 = vrot.slane %v5089_v30, 3 }
 0x15b   : > { %v5246_v41 = vadd.f32 %v941_v29, %v739_v36  ;;  %3834 = vmatmul.mubr.bf16.gmra.mrb[140].mxu1 %v2146_v58  ;;  %v3580_v47 = vpop.f32.mrb[35].mxu0  ;;  %v2406_v61 = vsel %vm2393_vm5, %v2403_v63, %v2405_v22  ;;  %v2171_v63 = vrot.slane %v2169_v42, 3 }
 0x15c   : > { %3837 = vmatprep.mubr.msk.bf16.mxu1 %vm4271_vm0, %v4270_v2 }
 0x15d   : > { %3890 = vmatmul.mubr.bf16.gmra.mrb[140].mxu0 %v2404_v38  ;;  %v2172_v36 = vor.u32 %v2171_v63, %v2168_v16 }
 0x15e   : > { %v743_v4 = vpop.f32.mrb[36].mxu1  ;;  %3893 = vmatprep.mubr.msk.bf16.mxu0 %vm4271_vm0, %v4270_v2 }
 0x15f   : > { %v744_v25 = vadd.f32 %v743_v4, %v5049_v53  ;;  %v3527_v12 = vpop.f32.mrb[37].mxu1  ;;  %v2163_v53 = vor.u32 %v2162_v44, %v2159_v20  ;;  %v2180_v4 = vrot.slane %v2178_v17, 3 }
 0x160   : > { %v746_v46 = vpop.f32.mrb[38].mxu1  ;;  %v954_v10 = vpop.f32.mrb[36].mxu0 }
 0x161   : > { %v5257_v52 = vadd.f32 %v946_v28, %v744_v25  ;;  %v747_v60 = vadd.f32 %v746_v46, %v5056_v62  ;;  %v3528_v51 = vpop.f32.mrb[39].mxu1  ;;  %v3583_v55 = vpop.f32.mrb[37].mxu0  ;;  %v2407_v62 = vrot.slane %v5062_v59, 3  ;;  %v2164_v13 = vsel %vm2102_vm6, %v2154_v49, %v2163_v53 }
 0x162   : > { %v957_v56 = vpop.f32.mrb[38].mxu0  ;;  %v2173_v40 = vsel %vm2102_vm6, %v2163_v53, %v2172_v36 }
 0x163   : > { %v5261_v1 = vadd.f32 %v949_v37, %v747_v60  ;;  %3838 = vmatmul.mubr.bf16.gmra.mrb[144].mxu1 %v2155_v24  ;;  %v3584_v14 = vpop.f32.mrb[39].mxu0  ;;  %v2408_v8 = vsel %vm2393_vm5, %v2405_v22, %v2407_v62  ;;  %v4172_v22 = vld [vmem:[%s4389_s11 + $0x58] ss:$0 sps:$4 sm:$0x77]   ;;  %v2410_v20 = vsel %vm2393_vm5, %v2407_v62, %v2409_v34 }
 0x164   : > { %3841 = vmatprep.mubr.msk.bf16.mxu1 %vm4271_vm0, %v4270_v2  ;;  %v2184_v60 = vshrl.u32 %v4172_v22, 16  ;;  %v2187_v51 = vshll.u32 %v4172_v22, 16 }
 0x165   : > { %3894 = vmatmul.mubr.bf16.gmra.mrb[144].mxu0 %v2406_v61 }
 0x166   : > { %v751_v29 = vpop.f32.mrb[40].mxu1  ;;  %3897 = vmatprep.mubr.msk.bf16.mxu0 %vm4271_vm0, %v4270_v2  ;;  %v2186_v42 = vrot.slane %v2184_v60, 2 }
 0x167   : > { %v752_v11 = vadd.f32 %v751_v29, %v5070_v5  ;;  %v3531_v39 = vpop.f32.mrb[41].mxu1  ;;  %v2175_v5 = vshrl.u32 %v5089_v30, 16  ;;  %v2189_v29 = vrot.slane %v2187_v51, 3 }
 0x168   : > { %v754_v33 = vpop.f32.mrb[42].mxu1  ;;  %v962_v54 = vpop.f32.mrb[40].mxu0 }
 0x169   : > { %v5272_v6 = vadd.f32 %v954_v10, %v752_v11  ;;  %v755_v26 = vadd.f32 %v754_v33, %v5077_v18  ;;  %v3532_v27 = vpop.f32.mrb[43].mxu1  ;;  %v3587_v58 = vpop.f32.mrb[41].mxu0  ;;  %v2177_v47 = vrot.slane %v2175_v5, 2  ;;  %v2190_v63 = vor.u32 %v2189_v29, %v2186_v42 }
 0x16a   : > { %v965_v28 = vpop.f32.mrb[42].mxu0 }
 0x16b   : > { %v5276_v31 = vadd.f32 %v957_v56, %v755_v26  ;;  %3842 = vmatmul.mubr.bf16.gmra.mrb[148].mxu1 %v2164_v13  ;;  %v3588_v59 = vpop.f32.mrb[43].mxu0  ;;  %v2181_v44 = vor.u32 %v2180_v4, %v2177_v47 }
 0x16c   : > { %3845 = vmatprep.mubr.msk.bf16.mxu1 %vm4271_vm0, %v4270_v2 }
 0x16d   : > { %3898 = vmatmul.mubr.bf16.gmra.mrb[148].mxu0 %v2408_v8  ;;  %v2182_v53 = vsel %vm2102_vm6, %v2172_v36, %v2181_v44 }
 0x16e   : > { %v759_v18 = vpop.f32.mrb[44].mxu1  ;;  %3901 = vmatprep.mubr.msk.bf16.mxu0 %vm4271_vm0, %v4270_v2 }
 0x16f   : > { %v760_v37 = vadd.f32 %v759_v18, %v5100_v32  ;;  %v3535_v38 = vpop.f32.mrb[45].mxu1 }
 0x170   : > { %v762_v49 = vpop.f32.mrb[46].mxu1  ;;  %v970_v9 = vpop.f32.mrb[44].mxu0 }
 0x171   : > { %v5288_v25 = vadd.f32 %v962_v54, %v760_v37  ;;  %v763_v12 = vadd.f32 %v762_v49, %v5107_v35  ;;  %v3536_v46 = vpop.f32.mrb[47].mxu1  ;;  %v3591_v24 = vpop.f32.mrb[45].mxu0  ;;  %v2411_v35 = vrot.slane %v4172_v22, 3 }
 0x172   : > { %v973_v10 = vpop.f32.mrb[46].mxu0 }
 0x173   : > { %v5292_v30 = vadd.f32 %v965_v28, %v763_v12  ;;  %3846 = vmatmul.mubr.bf16.gmra.mrb[152].mxu1 %v2173_v40  ;;  %v3592_v32 = vpop.f32.mrb[47].mxu0  ;;  %v2412_v54 = vsel %vm2393_vm5, %v2409_v34, %v2411_v35 }
 0x174   : > { %3849 = vmatprep.mubr.msk.bf16.mxu1 %vm4271_vm0, %v4270_v2 }
 0x175   : > { %3902 = vmatmul.mubr.bf16.gmra.mrb[152].mxu0 %v2410_v20 }
 0x176   : > { %v767_v55 = vpop.f32.mrb[48].mxu1  ;;  %3905 = vmatprep.mubr.msk.bf16.mxu0 %vm4271_vm0, %v4270_v2 }
 0x177   : > { %v768_v56 = vadd.f32 %v767_v55, %v5129_v48  ;;  %v3539_v61 = vpop.f32.mrb[49].mxu1 }
 0x178   : > { %v770_v14 = vpop.f32.mrb[50].mxu1  ;;  %v978_v3 = vpop.f32.mrb[48].mxu0 }
 0x179   : > { %v5300_v62 = vadd.f32 %v970_v9, %v768_v56  ;;  %v771_v11 = vadd.f32 %v770_v14, %v5136_v50  ;;  %v3540_v39 = vpop.f32.mrb[51].mxu1  ;;  %v3595_v33 = vpop.f32.mrb[49].mxu0  ;;  %v2191_v50 = vsel %vm2102_vm6, %v2181_v44, %v2190_v63 }
 0x17a   : > { %v981_v13 = vpop.f32.mrb[50].mxu0 }
 0x17b   : > { %v5304_v16 = vadd.f32 %v973_v10, %v771_v11  ;;  %3850 = vmatmul.mubr.bf16.gmra.mrb[156].mxu1 %v2182_v53  ;;  %v3596_v48 = vpop.f32.mrb[51].mxu0 }
 0x17c   : > { %3853 = vmatprep.mubr.msk.bf16.mxu1 %vm4271_vm0, %v4270_v2 }
 0x17d   : > { %3906 = vmatmul.mubr.bf16.gmra.mrb[156].mxu0 %v2412_v54 }
 0x17e   : > { %v775_v26 = vpop.f32.mrb[52].mxu1 }
 0x17f   : > { %v776_v27 = vadd.f32 %v775_v26, %v5164_v21  ;;  %v3543_v58 = vpop.f32.mrb[53].mxu1 }
 0x180   : > { %v778_v28 = vpop.f32.mrb[54].mxu1  ;;  %v1488_v8 = vpop.f32.mrb[52].mxu0 }
 0x181   : > { %v5310_v59 = vadd.f32 %v978_v3, %v776_v27  ;;  %v779_v5 = vadd.f32 %v778_v28, %v5169_v57  ;;  %v3544_v36 = vpop.f32.mrb[55].mxu1  ;;  %v3667_v17 = vpop.f32.mrb[53].mxu0 }
 0x182   : > { %v1491_v18 = vpop.f32.mrb[54].mxu0 }
 0x183   : > { %v5313_v34 = vadd.f32 %v981_v13, %v779_v5  ;;  %3854 = vmatmul.mubr.bf16.gmra.mrb[160].mxu1 %v2191_v50  ;;  %v3668_v2 = vpop.f32.mrb[55].mxu0 }
 0x186   : > { %v1197_v37 = vpop.f32.mrb[56].mxu1 }
 0x187   : > { %v1268_v38 = vadd.f32 %v1197_v37, %v5197_v43  ;;  %v3615_v21 = vpop.f32.mrb[57].mxu1 }
 0x188   : > { %v1200_v47 = vpop.f32.mrb[58].mxu1  ;;  %v1496_v49 = vpop.f32.mrb[56].mxu0 }
 0x189   : > { %v5316_v40 = vadd.f32 %v1488_v8, %v1268_v38  ;;  %v1269_v9 = vadd.f32 %v1200_v47, %v5201_v15  ;;  %v3616_v4 = vpop.f32.mrb[59].mxu1  ;;  %v3671_v22 = vpop.f32.mrb[57].mxu0 }
 0x18a   : > { %v1499_v57 = vpop.f32.mrb[58].mxu0 }
 0x18b   : > { %v5319_v12 = vadd.f32 %v1491_v18, %v1269_v9  ;;  %v3672_v46 = vpop.f32.mrb[59].mxu0 }
 0x18e   : > { %v1205_v24 = vpop.f32.mrb[60].mxu1 }
 0x18f   : > { %v1270_v10 = vadd.f32 %v1205_v24, %v5212_v23  ;;  %v3619_v20 = vpop.f32.mrb[61].mxu1 }
 0x190   : > { %v1208_v32 = vpop.f32.mrb[62].mxu1  ;;  %v1504_v44 = vpop.f32.mrb[60].mxu0 }
 0x191   : > { %v5322_v43 = vadd.f32 %v1496_v49, %v1270_v10  ;;  %v1271_v60 = vadd.f32 %v1208_v32, %v5216_v45  ;;  %v3620_v51 = vpop.f32.mrb[63].mxu1  ;;  %v3675_v55 = vpop.f32.mrb[61].mxu0 }
 0x192   : > { %v1507_v35 = vpop.f32.mrb[62].mxu0 }
 0x193   : > { %v5325_v15 = vadd.f32 %v1499_v57, %v1271_v60  ;;  %v3676_v56 = vpop.f32.mrb[63].mxu0 }
 0x196   : > { %v1213_v61 = vpop.f32.mrb[64].mxu1 }
 0x197   : > { %v1272_v14 = vadd.f32 %v1213_v61, %v5227_v0  ;;  %v3623_v53 = vpop.f32.mrb[65].mxu1 }
 0x198   : > { %v1216_v3 = vpop.f32.mrb[66].mxu1  ;;  %v1512_v42 = vpop.f32.mrb[64].mxu0 }
 0x199   : > { %v5328_v23 = vadd.f32 %v1504_v44, %v1272_v14  ;;  %v1273_v29 = vadd.f32 %v1216_v3, %v5231_v19  ;;  %v3624_v11 = vpop.f32.mrb[67].mxu1  ;;  %v3679_v39 = vpop.f32.mrb[65].mxu0 }
 0x19a   : > { %v1515_v33 = vpop.f32.mrb[66].mxu0 }
 0x19b   : > { %v5331_v45 = vadd.f32 %v1507_v35, %v1273_v29  ;;  %v3680_v13 = vpop.f32.mrb[67].mxu0 }
 0x19e   : > { %v1221_v54 = vpop.f32.mrb[68].mxu1 }
 0x19f   : > { %v1274_v48 = vadd.f32 %v1221_v54, %v5242_v7  ;;  %v3627_v63 = vpop.f32.mrb[69].mxu1 }
 0x1a0   : > { %v1224_v26 = vpop.f32.mrb[70].mxu1  ;;  %v1520_v27 = vpop.f32.mrb[68].mxu0 }
 0x1a1   : > { %v5334_v0 = vadd.f32 %v1512_v42, %v1274_v48  ;;  %v1275_v58 = vadd.f32 %v1224_v26, %v5246_v41  ;;  %v3628_v28 = vpop.f32.mrb[71].mxu1  ;;  %v3683_v50 = vpop.f32.mrb[69].mxu0 }
 0x1a2   : > { %v1523_v8 = vpop.f32.mrb[70].mxu0 }
 0x1a3   : > { %v5337_v19 = vadd.f32 %v1515_v33, %v1275_v58  ;;  %v3684_v5 = vpop.f32.mrb[71].mxu0 }
 0x1a6   : > { %v1229_v36 = vpop.f32.mrb[72].mxu1 }
 0x1a7   : > { %v1276_v17 = vadd.f32 %v1229_v36, %v5257_v52  ;;  %v3631_v18 = vpop.f32.mrb[73].mxu1 }
 0x1a8   : > { %v1232_v2 = vpop.f32.mrb[74].mxu1  ;;  %v1528_v37 = vpop.f32.mrb[72].mxu0 }
 0x1a9   : > { %v5340_v7 = vadd.f32 %v1520_v27, %v1276_v17  ;;  %v1277_v38 = vadd.f32 %v1232_v2, %v5261_v1  ;;  %v3632_v21 = vpop.f32.mrb[75].mxu1  ;;  %v3687_v47 = vpop.f32.mrb[73].mxu0 }
 0x1aa   : > { %v1531_v49 = vpop.f32.mrb[74].mxu0 }
 0x1ab   : > { %v5343_v41 = vadd.f32 %v1523_v8, %v1277_v38  ;;  %v3688_v9 = vpop.f32.mrb[75].mxu0 }
 0x1ae   : > { %v1237_v4 = vpop.f32.mrb[76].mxu1 }
 0x1af   : > { %v1278_v22 = vadd.f32 %v1237_v4, %v5272_v6  ;;  %v3635_v57 = vpop.f32.mrb[77].mxu1 }
 0x1b0   : > { %v1240_v46 = vpop.f32.mrb[78].mxu1  ;;  %v1536_v24 = vpop.f32.mrb[76].mxu0 }
 0x1b1   : > { %v5346_v52 = vadd.f32 %v1528_v37, %v1278_v22  ;;  %v1279_v10 = vadd.f32 %v1240_v46, %v5276_v31  ;;  %v3636_v20 = vpop.f32.mrb[79].mxu1  ;;  %v3691_v32 = vpop.f32.mrb[77].mxu0 }
 0x1b2   : > { %v1539_v44 = vpop.f32.mrb[78].mxu0 }
 0x1b3   : > { %v5349_v1 = vadd.f32 %v1531_v49, %v1279_v10  ;;  %v3692_v60 = vpop.f32.mrb[79].mxu0 }
 0x1b6   : > { %v1245_v51 = vpop.f32.mrb[80].mxu1 }
 0x1b7   : > { %v1280_v55 = vadd.f32 %v1245_v51, %v5288_v25  ;;  %v3639_v35 = vpop.f32.mrb[81].mxu1 }
 0x1b8   : > { %v1248_v56 = vpop.f32.mrb[82].mxu1  ;;  %v1544_v61 = vpop.f32.mrb[80].mxu0 }
 0x1b9   : > { %v5352_v6 = vadd.f32 %v1536_v24, %v1280_v55  ;;  %v1281_v14 = vadd.f32 %v1248_v56, %v5292_v30  ;;  %v3640_v53 = vpop.f32.mrb[83].mxu1  ;;  %v3695_v3 = vpop.f32.mrb[81].mxu0 }
 0x1ba   : > { %v1547_v42 = vpop.f32.mrb[82].mxu0 }
 0x1bb   : > { %v5355_v31 = vadd.f32 %v1539_v44, %v1281_v14  ;;  %v3696_v29 = vpop.f32.mrb[83].mxu0 }
 0x1be   : > { %v1253_v11 = vpop.f32.mrb[84].mxu1 }
 0x1bf   : > { %v1282_v39 = vadd.f32 %v1253_v11, %v5300_v62  ;;  %v3643_v33 = vpop.f32.mrb[85].mxu1 }
 0x1c0   : > { %v1256_v13 = vpop.f32.mrb[86].mxu1  ;;  %v1552_v54 = vpop.f32.mrb[84].mxu0 }
 0x1c1   : > { %v5358_v25 = vadd.f32 %v1544_v61, %v1282_v39  ;;  %v1283_v48 = vadd.f32 %v1256_v13, %v5304_v16  ;;  %v3644_v63 = vpop.f32.mrb[87].mxu1  ;;  %v3699_v26 = vpop.f32.mrb[85].mxu0 }
 0x1c2   : > { %v1555_v27 = vpop.f32.mrb[86].mxu0 }
 0x1c3   : > { %v5361_v30 = vadd.f32 %v1547_v42, %v1283_v48  ;;  %v3700_v58 = vpop.f32.mrb[87].mxu0 }
 0x1c6   : > { %v1261_v28 = vpop.f32.mrb[88].mxu1 }
 0x1c7   : > { %v1284_v50 = vadd.f32 %v1261_v28, %v5310_v59  ;;  %v3647_v8 = vpop.f32.mrb[89].mxu1 }
 0x1c8   : > { %v1264_v5 = vpop.f32.mrb[90].mxu1  ;;  %v1992_v36 = vpop.f32.mrb[88].mxu0 }
 0x1c9   : > { %v5364_v62 = vadd.f32 %v1552_v54, %v1284_v50  ;;  %v1285_v17 = vadd.f32 %v1264_v5, %v5313_v34  ;;  %v3648_v18 = vpop.f32.mrb[91].mxu1  ;;  %v3771_v2 = vpop.f32.mrb[89].mxu0 }
 0x1ca   : > { %v1995_v37 = vpop.f32.mrb[90].mxu0 }
 0x1cb   : > { %v5367_v16 = vadd.f32 %v1555_v27, %v1285_v17  ;;  %v3772_v38 = vpop.f32.mrb[91].mxu0 }
 0x1ce   : > { %v1709_v21 = vpop.f32.mrb[92].mxu1 }
 0x1cf   : > { %v1780_v47 = vadd.f32 %v1709_v21, %v5316_v40  ;;  %v3719_v49 = vpop.f32.mrb[93].mxu1 }
 0x1d0   : > { %v1712_v9 = vpop.f32.mrb[94].mxu1  ;;  %v2000_v4 = vpop.f32.mrb[92].mxu0 }
 0x1d1   : > { %v5370_v59 = vadd.f32 %v1992_v36, %v1780_v47  ;;  %v1781_v22 = vadd.f32 %v1712_v9, %v5319_v12  ;;  %v3720_v57 = vpop.f32.mrb[95].mxu1  ;;  %v3775_v46 = vpop.f32.mrb[93].mxu0 }
 0x1d2   : > { %v2003_v24 = vpop.f32.mrb[94].mxu0 }
 0x1d3   : > { %v5373_v34 = vadd.f32 %v1995_v37, %v1781_v22  ;;  %v3776_v10 = vpop.f32.mrb[95].mxu0 }
 0x1d6   : > { %v1717_v20 = vpop.f32.mrb[96].mxu1 }
 0x1d7   : > { %v1782_v32 = vadd.f32 %v1717_v20, %v5322_v43  ;;  %v3723_v44 = vpop.f32.mrb[97].mxu1 }
 0x1d8   : > { %v1720_v60 = vpop.f32.mrb[98].mxu1  ;;  %v2008_v51 = vpop.f32.mrb[96].mxu0 }
 0x1d9   : > { %v5376_v40 = vadd.f32 %v2000_v4, %v1782_v32  ;;  %v1783_v55 = vadd.f32 %v1720_v60, %v5325_v15  ;;  %v3724_v35 = vpop.f32.mrb[99].mxu1  ;;  %v3779_v56 = vpop.f32.mrb[97].mxu0 }
 0x1da   : > { %v2011_v61 = vpop.f32.mrb[98].mxu0 }
 0x1db   : > { %v5379_v12 = vadd.f32 %v2003_v24, %v1783_v55  ;;  %v3780_v14 = vpop.f32.mrb[99].mxu0 }
 0x1de   : > { %v1725_v53 = vpop.f32.mrb[100].mxu1 }
 0x1df   : > { %v1784_v3 = vadd.f32 %v1725_v53, %v5328_v23  ;;  %v3727_v42 = vpop.f32.mrb[101].mxu1 }
 0x1e0   : > { %v1728_v29 = vpop.f32.mrb[102].mxu1  ;;  %v2016_v11 = vpop.f32.mrb[100].mxu0 }
 0x1e1   : > { %v5382_v43 = vadd.f32 %v2008_v51, %v1784_v3  ;;  %v1785_v39 = vadd.f32 %v1728_v29, %v5331_v45  ;;  %v3728_v33 = vpop.f32.mrb[103].mxu1  ;;  %v3783_v13 = vpop.f32.mrb[101].mxu0 }
 0x1e2   : > { %v2019_v54 = vpop.f32.mrb[102].mxu0 }
 0x1e3   : > { %v5385_v15 = vadd.f32 %v2011_v61, %v1785_v39  ;;  %v3784_v48 = vpop.f32.mrb[103].mxu0 }
 0x1e6   : > { %v1733_v63 = vpop.f32.mrb[104].mxu1 }
 0x1e7   : > { %v1786_v26 = vadd.f32 %v1733_v63, %v5334_v0  ;;  %v3731_v27 = vpop.f32.mrb[105].mxu1 }
 0x1e8   : > { %v1736_v58 = vpop.f32.mrb[106].mxu1  ;;  %v2024_v28 = vpop.f32.mrb[104].mxu0 }
 0x1e9   : > { %v5388_v23 = vadd.f32 %v2016_v11, %v1786_v26  ;;  %v1787_v50 = vadd.f32 %v1736_v58, %v5337_v19  ;;  %v3732_v8 = vpop.f32.mrb[107].mxu1  ;;  %v3787_v5 = vpop.f32.mrb[105].mxu0 }
 0x1ea   : > { %v2027_v36 = vpop.f32.mrb[106].mxu0 }
 0x1eb   : > { %v5391_v45 = vadd.f32 %v2019_v54, %v1787_v50  ;;  %v3788_v17 = vpop.f32.mrb[107].mxu0 }
 0x1ee   : > { %v1741_v18 = vpop.f32.mrb[108].mxu1 }
 0x1ef   : > { %v1788_v2 = vadd.f32 %v1741_v18, %v5340_v7  ;;  %v3735_v37 = vpop.f32.mrb[109].mxu1 }
 0x1f0   : > { %v1744_v38 = vpop.f32.mrb[110].mxu1  ;;  %v2032_v21 = vpop.f32.mrb[108].mxu0 }
 0x1f1   : > { %v5394_v0 = vadd.f32 %v2024_v28, %v1788_v2  ;;  %v1789_v47 = vadd.f32 %v1744_v38, %v5343_v41  ;;  %v3736_v49 = vpop.f32.mrb[111].mxu1  ;;  %v3791_v9 = vpop.f32.mrb[109].mxu0 }
 0x1f2   : > { %v2035_v4 = vpop.f32.mrb[110].mxu0 }
 0x1f3   : > { %v5397_v19 = vadd.f32 %v2027_v36, %v1789_v47  ;;  %v3792_v22 = vpop.f32.mrb[111].mxu0 }
 0x1f4   : > { %v2658_v22 = vpop.permute.xlu0 %2657 }
 0x1f6   : > { %v1749_v57 = vpop.f32.mrb[112].mxu1 }
 0x1f7   : > { %v1790_v46 = vadd.f32 %v1749_v57, %v5346_v52  ;;  %v3739_v24 = vpop.f32.mrb[113].mxu1 }
 0x1f8   : > { %v1752_v10 = vpop.f32.mrb[114].mxu1  ;;  %v2040_v20 = vpop.f32.mrb[112].mxu0 }
 0x1f9   : > { %v5400_v7 = vadd.f32 %v2032_v21, %v1790_v46  ;;  %v1791_v32 = vadd.f32 %v1752_v10, %v5349_v1  ;;  %v3740_v44 = vpop.f32.mrb[115].mxu1  ;;  %v3795_v60 = vpop.f32.mrb[113].mxu0 }
 0x1fa   : > { %v2043_v51 = vpop.f32.mrb[114].mxu0 }
 0x1fb   : > { %v5403_v41 = vadd.f32 %v2035_v4, %v1791_v32  ;;  %v3796_v55 = vpop.f32.mrb[115].mxu0 }
 0x1fe   : > { %v1757_v35 = vpop.f32.mrb[116].mxu1 }
 0x1ff   : > { %v1792_v56 = vadd.f32 %v1757_v35, %v5352_v6  ;;  %v3743_v61 = vpop.f32.mrb[117].mxu1 }
 0x200   : > { %v1760_v14 = vpop.f32.mrb[118].mxu1  ;;  %v2048_v53 = vpop.f32.mrb[116].mxu0 }
 0x201   : > { %v5406_v52 = vadd.f32 %v2040_v20, %v1792_v56  ;;  %v1793_v3 = vadd.f32 %v1760_v14, %v5355_v31  ;;  %v3744_v42 = vpop.f32.mrb[119].mxu1  ;;  %v3799_v29 = vpop.f32.mrb[117].mxu0 }
 0x202   : > { %v2051_v11 = vpop.f32.mrb[118].mxu0  ;;  %v2663_v56 = vpop.permute.xlu0 %2662 }
 0x203   : > { %v5409_v1 = vadd.f32 %v2043_v51, %v1793_v3  ;;  %v3800_v39 = vpop.f32.mrb[119].mxu0  ;;  %v2668_v3 = vpop.permute.xlu1 %2667 }
 0x206   : > { %v1765_v33 = vpop.f32.mrb[120].mxu1 }
 0x207   : > { %v1794_v13 = vadd.f32 %v1765_v33, %v5358_v25  ;;  %v3747_v54 = vpop.f32.mrb[121].mxu1 }
 0x208   : > { %v1768_v48 = vpop.f32.mrb[122].mxu1  ;;  %v2056_v63 = vpop.f32.mrb[120].mxu0 }
 0x209   : > { %v5412_v6 = vadd.f32 %v2048_v53, %v1794_v13  ;;  %v1795_v26 = vadd.f32 %v1768_v48, %v5361_v30  ;;  %v3748_v27 = vpop.f32.mrb[123].mxu1  ;;  %v3803_v58 = vpop.f32.mrb[121].mxu0 }
 0x20a   : > { %v2059_v28 = vpop.f32.mrb[122].mxu0 }
 0x20b   : > { %v5415_v31 = vadd.f32 %v2051_v11, %v1795_v26  ;;  %v3804_v50 = vpop.f32.mrb[123].mxu0 }
 0x20e   : > { %v1773_v8 = vpop.f32.mrb[124].mxu1 }
 0x20f   : > { %v1796_v5 = vadd.f32 %v1773_v8, %v5364_v62  ;;  %v3751_v36 = vpop.f32.mrb[125].mxu1  ;;  %v5427_v62 = vld [vmem:[%s5549_s2] ss:$0 sm:$0xff] }
 0x210   : > { %v1776_v17 = vpop.f32.mrb[126].mxu1  ;;  %v2504_v18 = vpop.f32.mrb[124].mxu0 }
 0x211   : > { %v5418_v25 = vadd.f32 %v2056_v63, %v1796_v5  ;;  %v1797_v2 = vadd.f32 %v1776_v17, %v5367_v16  ;;  %v3752_v37 = vpop.f32.mrb[127].mxu1  ;;  %v3875_v38 = vpop.f32.mrb[125].mxu0 }
 0x212   : > { %v2507_v21 = vpop.f32.mrb[126].mxu0  ;;  %v2673_v5 = vpop.permute.xlu1 %2672 }
 0x213   : > { %v5421_v30 = vadd.f32 %v2059_v28, %v1797_v2  ;;  %v3876_v47 = vpop.f32.mrb[127].mxu0 }
 0x216   : > { %v2283_v49 = vpop.f32.mrb[128].mxu1 }
 0x217   : > { %v2354_v9 = vadd.f32 %v2283_v49, %v5370_v59  ;;  %v3823_v4 = vpop.f32.mrb[129].mxu1 }
 0x218   : > { %v2286_v57 = vpop.f32.mrb[130].mxu1  ;;  %v2512_v46 = vpop.f32.mrb[128].mxu0 }
 0x219   : > { %v2575_v24 = vadd.f32 %v2504_v18, %v2354_v9  ;;  %v2355_v16 = vadd.f32 %v2286_v57, %v5373_v34  ;;  %v3824_v10 = vpop.f32.mrb[131].mxu1  ;;  %v3879_v20 = vpop.f32.mrb[129].mxu0 }
 0x21a   : > { %v2515_v32 = vpop.f32.mrb[130].mxu0 }
 0x21b   : > { %v2600_v44 = vadd.f32 %v5427_v62, %v2575_v24  ;;  %v2576_v60 = vadd.f32 %v2507_v21, %v2355_v16  ;;  %v3880_v51 = vpop.f32.mrb[131].mxu0 }
 0x21d   : > { %v2601_v59 = vadd.f32 %v5427_v62, %v2576_v60  ;;  %v2618_v55 = vmax.f32 %v2600_v44, 0.0  ;;  %v2683_v44 = vpop.permute.xlu1 %2682 }
 0x21e   : > { %v2291_v35 = vpop.f32.mrb[132].mxu1 }
 0x21f   : > { %v2356_v61 = vadd.f32 %v2291_v35, %v5376_v40  ;;  %v3827_v14 = vpop.f32.mrb[133].mxu1  ;;  %v2619_v53 = vmax.f32 %v2601_v59, 0.0  ;;  %v2745_v34 = vmul.f32 %v2658_v22, %v2618_v55 }
 0x220   : > { %v2294_v42 = vpop.f32.mrb[134].mxu1  ;;  %v2520_v29 = vpop.f32.mrb[132].mxu0 }
 0x221   : > { %v2577_v11 = vadd.f32 %v2512_v46, %v2356_v61  ;;  %v2746_v39 = vmul.f32 %v2663_v56, %v2619_v53  ;;  %v2357_v33 = vadd.f32 %v2294_v42, %v5379_v12  ;;  %v3828_v13 = vpop.f32.mrb[135].mxu1  ;;  %v3883_v54 = vpop.f32.mrb[133].mxu0 }
 0x222   : > { %v2523_v48 = vpop.f32.mrb[134].mxu0 }
 0x223   : > { %v2602_v63 = vadd.f32 %v5427_v62, %v2577_v11  ;;  %v2763_v26 = vadd.f32 %v2746_v39, %v2745_v34  ;;  %v2578_v27 = vadd.f32 %v2515_v32, %v2357_v33  ;;  %v3884_v58 = vpop.f32.mrb[135].mxu0 }
 0x225   : > { %v2603_v40 = vadd.f32 %v5427_v62, %v2578_v27  ;;  %v2620_v28 = vmax.f32 %v2602_v63, 0.0 }
 0x226   : > { %v2299_v50 = vpop.f32.mrb[136].mxu1 }
 0x227   : > { %v2747_v8 = vmul.f32 %v2668_v3, %v2620_v28  ;;  %v2621_v36 = vmax.f32 %v2603_v40, 0.0  ;;  %v2358_v17 = vadd.f32 %v2299_v50, %v5382_v43  ;;  %v3831_v18 = vpop.f32.mrb[137].mxu1  ;;  %v2678_v43 = vpop.permute.xlu0 %2677 }
 0x228   : > { %v2302_v2 = vpop.f32.mrb[138].mxu1  ;;  %v2528_v12 = vpop.f32.mrb[136].mxu0 }
 0x229   : > { %v2764_v37 = vadd.f32 %v2763_v26, %v2747_v8  ;;  %v2748_v38 = vmul.f32 %v2673_v5, %v2621_v36  ;;  %v2579_v21 = vadd.f32 %v2520_v29, %v2358_v17  ;;  %v2359_v47 = vadd.f32 %v2302_v2, %v5385_v15  ;;  %v3832_v49 = vpop.f32.mrb[139].mxu1  ;;  %v3887_v9 = vpop.f32.mrb[137].mxu0 }
 0x22a   : > { %v2531_v4 = vpop.f32.mrb[138].mxu0 }
 0x22b   : > { %v2765_v22 = vadd.f32 %v2764_v37, %v2748_v38  ;;  %v2604_v57 = vadd.f32 %v5427_v62, %v2579_v21  ;;  %v2580_v46 = vadd.f32 %v2523_v48, %v2359_v47  ;;  %v3888_v24 = vpop.f32.mrb[139].mxu0  ;;  %v2693_v48 = vpop.permute.xlu1 %2692 }
 0x22d   : > { %v2622_v16 = vmax.f32 %v2604_v57, 0.0  ;;  %v2605_v10 = vadd.f32 %v5427_v62, %v2580_v46 }
 0x22e   : > { %v2307_v20 = vpop.f32.mrb[140].mxu1 }
 0x22f   : > { %v2749_v32 = vmul.f32 %v2678_v43, %v2622_v16  ;;  %v2623_v60 = vmax.f32 %v2605_v10, 0.0  ;;  %v2360_v51 = vadd.f32 %v2307_v20, %v5388_v23  ;;  %v3835_v59 = vpop.f32.mrb[141].mxu1  ;;  %v2688_v23 = vpop.permute.xlu0 %2687 }
 0x230   : > { %v2310_v15 = vpop.f32.mrb[142].mxu1  ;;  %v2536_v55 = vpop.f32.mrb[140].mxu0 }
 0x231   : > { %v2750_v35 = vmul.f32 %v2683_v44, %v2623_v60  ;;  %v2766_v56 = vadd.f32 %v2765_v22, %v2749_v32  ;;  %v2581_v61 = vadd.f32 %v2528_v12, %v2360_v51  ;;  %v2361_v14 = vadd.f32 %v2310_v15, %v5391_v45  ;;  %v3836_v53 = vpop.f32.mrb[143].mxu1  ;;  %v3891_v3 = vpop.f32.mrb[141].mxu0 }
 0x232   : > { %v2539_v42 = vpop.f32.mrb[142].mxu0  ;;  %v2703_v9 = vpop.permute.xlu1 %2702 }
 0x233   : > { %v2767_v29 = vadd.f32 %v2766_v56, %v2750_v35  ;;  %v2606_v34 = vadd.f32 %v5427_v62, %v2581_v61  ;;  %v2582_v11 = vadd.f32 %v2531_v4, %v2361_v14  ;;  %v3892_v39 = vpop.f32.mrb[143].mxu0 }
 0x235   : > { %v2624_v33 = vmax.f32 %v2606_v34, 0.0  ;;  %v2607_v13 = vadd.f32 %v5427_v62, %v2582_v11 }
 0x236   : > { %v2315_v54 = vpop.f32.mrb[144].mxu1  ;;  %v2713_v14 = vpop.permute.xlu1 %2712 }
 0x237   : > { %v2751_v63 = vmul.f32 %v2688_v23, %v2624_v33  ;;  %v2625_v26 = vmax.f32 %v2607_v13, 0.0  ;;  %v2362_v27 = vadd.f32 %v2315_v54, %v5394_v0  ;;  %v3839_v58 = vpop.f32.mrb[145].mxu1  ;;  %v2698_v0 = vpop.permute.xlu0 %2697 }
 0x238   : > { %v2318_v45 = vpop.f32.mrb[146].mxu1  ;;  %v2544_v40 = vpop.f32.mrb[144].mxu0 }
 0x239   : > { %v2768_v28 = vadd.f32 %v2767_v29, %v2751_v63  ;;  %v2752_v50 = vmul.f32 %v2693_v48, %v2625_v26  ;;  %v2583_v8 = vadd.f32 %v2536_v55, %v2362_v27  ;;  %v2363_v5 = vadd.f32 %v2318_v45, %v5397_v19  ;;  %v3840_v36 = vpop.f32.mrb[147].mxu1  ;;  %v3895_v17 = vpop.f32.mrb[145].mxu0 }
 0x23a   : > { %v2547_v18 = vpop.f32.mrb[146].mxu0 }
 0x23b   : > { %v2769_v2 = vadd.f32 %v2768_v28, %v2752_v50  ;;  %v2608_v12 = vadd.f32 %v5427_v62, %v2583_v8  ;;  %v2584_v37 = vadd.f32 %v2539_v42, %v2363_v5  ;;  %v3896_v38 = vpop.f32.mrb[147].mxu0  ;;  %v2723_v50 = vpop.permute.xlu1 %2722 }
 0x23d   : > { %v2626_v21 = vmax.f32 %v2608_v12, 0.0  ;;  %v2609_v47 = vadd.f32 %v5427_v62, %v2584_v37 }
 0x23e   : > { %v2323_v49 = vpop.f32.mrb[148].mxu1 }
 0x23f   : > { %v2753_v4 = vmul.f32 %v2698_v0, %v2626_v21  ;;  %v2627_v22 = vmax.f32 %v2609_v47, 0.0  ;;  %v2364_v57 = vadd.f32 %v2323_v49, %v5400_v7  ;;  %v3843_v46 = vpop.f32.mrb[149].mxu1  ;;  %v2708_v7 = vpop.permute.xlu0 %2707 }
 0x240   : > { %v2326_v19 = vpop.f32.mrb[150].mxu1  ;;  %v2552_v24 = vpop.f32.mrb[148].mxu0 }
 0x241   : > { %v2770_v16 = vadd.f32 %v2769_v2, %v2753_v4  ;;  %v2754_v10 = vmul.f32 %v2703_v9, %v2627_v22  ;;  %v2585_v43 = vadd.f32 %v2544_v40, %v2364_v57  ;;  %v2365_v20 = vadd.f32 %v2326_v19, %v5403_v41  ;;  %v3844_v32 = vpop.f32.mrb[151].mxu1  ;;  %v3899_v44 = vpop.f32.mrb[149].mxu0 }
 0x242   : > { %v2555_v60 = vpop.f32.mrb[150].mxu0 }
 0x243   : > { %v2771_v51 = vadd.f32 %v2770_v16, %v2754_v10  ;;  %v2610_v59 = vadd.f32 %v5427_v62, %v2585_v43  ;;  %v2586_v15 = vadd.f32 %v2547_v18, %v2365_v20  ;;  %v3900_v55 = vpop.f32.mrb[151].mxu0  ;;  %v2733_v20 = vpop.permute.xlu1 %2732 }
 0x245   : > { %v2628_v35 = vmax.f32 %v2610_v59, 0.0  ;;  %v2611_v56 = vadd.f32 %v5427_v62, %v2586_v15 }
 0x246   : > { %v2331_v61 = vpop.f32.mrb[152].mxu1 }
 0x247   : > { %v2755_v53 = vmul.f32 %v2708_v7, %v2628_v35  ;;  %v2629_v3 = vmax.f32 %v2611_v56, 0.0  ;;  %v2366_v42 = vadd.f32 %v2331_v61, %v5406_v52  ;;  %v3847_v29 = vpop.f32.mrb[153].mxu1  ;;  %v2718_v52 = vpop.permute.xlu0 %2717 }
 0x248   : > { %v2334_v41 = vpop.f32.mrb[154].mxu1  ;;  %v2560_v34 = vpop.f32.mrb[152].mxu0 }
 0x249   : > { %v2772_v11 = vadd.f32 %v2771_v51, %v2755_v53  ;;  %v2756_v39 = vmul.f32 %v2713_v14, %v2629_v3  ;;  %v2587_v33 = vadd.f32 %v2552_v24, %v2366_v42  ;;  %v2367_v13 = vadd.f32 %v2334_v41, %v5409_v1  ;;  %v3848_v23 = vpop.f32.mrb[155].mxu1  ;;  %v3903_v54 = vpop.f32.mrb[153].mxu0 }
 0x24a   : > { %v2563_v48 = vpop.f32.mrb[154].mxu0  ;;  %v4273_v54 = vmov (!%p3228_p1), 0.0|0.0  }
 0x24b   : > { %v2773_v63 = vadd.f32 %v2772_v11, %v2756_v39  ;;  %v2612_v26 = vadd.f32 %v5427_v62, %v2587_v33  ;;  %v2588_v27 = vadd.f32 %v2555_v60, %v2367_v13  ;;  %v3904_v58 = vpop.f32.mrb[155].mxu0  ;;  %v2636_v33 = vld [vmem:[#allocation2] sm:$0x1]  ;;  %3944 = vmatprep.subr.bf16.mxu0 (!%p3228_p1), %v4273_v54 }
 0x24c   : > { %v3267_v58 = vld [vmem:[%s5550_s3 + $0x20] sm:$0xff] (!%p3228_p1)  }
 0x24d   : > { %v2630_v45 = vmax.f32 %v2612_v26, 0.0  ;;  %v2613_v40 = vadd.f32 %v5427_v62, %v2588_v27  ;;  %v3265_v26 = vld [vmem:[%s5550_s3 + $0x10] sm:$0xff] (!%p3228_p1)   ;;  %v3266_v27 = vld [vmem:[%s5550_s3 + $0x18] sm:$0xff] (!%p3228_p1)  }
 0x24e   : > { %v2339_v28 = vpop.f32.mrb[156].mxu1 }
 0x24f   : > { %v2757_v8 = vmul.f32 %v2718_v52, %v2630_v45  ;;  %v2631_v5 = vmax.f32 %v2613_v40, 0.0  ;;  %v2368_v36 = vadd.f32 %v2339_v28, %v5412_v6  ;;  %v3851_v17 = vpop.f32.mrb[157].mxu1  ;;  %v2728_v6 = vpop.permute.xlu0 %2727  ;;  %v3268_v45 = vld [vmem:[%s5550_s3 + $0x28] sm:$0xff] (!%p3228_p1)   ;;  %v3269_v40 = vld [vmem:[%s5550_s3 + $0x30] sm:$0xff] (!%p3228_p1)   ;;  %v3270_v52 = vld [vmem:[%s5550_s3 + $0x38] sm:$0xff] (!%p3228_p1)  }
 0x250   : > { %v2342_v1 = vpop.f32.mrb[158].mxu1  ;;  %v2568_v18 = vpop.f32.mrb[156].mxu0 }
 0x251   : > { %v2774_v2 = vadd.f32 %v2773_v63, %v2757_v8  ;;  %v2758_v12 = vmul.f32 %v2723_v50, %v2631_v5  ;;  %v2589_v37 = vadd.f32 %v2560_v34, %v2368_v36  ;;  %v2369_v38 = vadd.f32 %v2342_v1, %v5415_v31  ;;  %v3852_v21 = vpop.f32.mrb[159].mxu1  ;;  %v3907_v47 = vpop.f32.mrb[157].mxu0  ;;  %v3264_v63 = vld [vmem:[%s5550_s3 + $0x8] sm:$0xff] (!%p3228_p1)   ;;  %v2825_v50 = vld [vmem:[%s5551_s4] sm:$0x1] (!%p3228_p1) }
 0x252   : > { %v2571_v0 = vpop.f32.mrb[158].mxu0 }
 0x253   : > { %v2775_v49 = vadd.f32 %v2774_v2, %v2758_v12  ;;  %v2614_v9 = vadd.f32 %v5427_v62, %v2589_v37  ;;  %v2590_v4 = vadd.f32 %v2563_v48, %v2369_v38  ;;  %v3908_v22 = vpop.f32.mrb[159].mxu0  ;;  %v2738_v61 = vpop.permute.xlu0 %2737  ;;  %v4275_v48 = vmov (!%p3228_p1), 0.0  }
 0x254   : > { %3941 = vmatprep.mubr.msk.f32.mxu0 (!%p3228_p1), %vm4274_vm7, %v4275_v48 }
 0x255   : > { %v2632_v57 = vmax.f32 %v2614_v9, 0.0  ;;  %v2615_v46 = vadd.f32 %v5427_v62, %v2590_v4 }
 0x256   : > { %v2347_v19 = vpop.f32.mrb[160].mxu1 }
 0x257   : > { %v2759_v24 = vmul.f32 %v2728_v6, %v2632_v57  ;;  %v2633_v16 = vmax.f32 %v2615_v46, 0.0  ;;  %v2370_v10 = vadd.f32 %v2347_v19, %v5418_v25  ;;  %v3855_v43 = vpop.f32.mrb[161].mxu1  ;;  %v2743_v25 = vpop.permute.xlu1 %2742 }
 0x258   : > { %v2350_v31 = vpop.f32.mrb[162].mxu1 }
 0x259   : > { %v2776_v32 = vadd.f32 %v2775_v49, %v2759_v24  ;;  %v2760_v44 = vmul.f32 %v2733_v20, %v2633_v16  ;;  %v2591_v60 = vadd.f32 %v2568_v18, %v2370_v10  ;;  %v2371_v51 = vadd.f32 %v2350_v31, %v5421_v30  ;;  %v3856_v59 = vpop.f32.mrb[163].mxu1 }
 0x25b   : > { %v2777_v15 = vadd.f32 %v2776_v32, %v2760_v44  ;;  %v2616_v55 = vadd.f32 %v5427_v62, %v2591_v60  ;;  %v2592_v35 = vadd.f32 %v2571_v0, %v2371_v51 }
 0x25d   : > { %v2634_v56 = vmax.f32 %v2616_v55, 0.0  ;;  %v2617_v7 = vadd.f32 %v5427_v62, %v2592_v35  ;;  %v3233_v62 = vld [vmem:[%s5550_s3] sm:$0xff] (!%p3228_p1)  }
 0x25e   : > { %3946 = vmatpush3.bf16.msra.mxu0 (!%p3228_p1), %v3233_v62 }
 0x25f   : > { %v2761_v14 = vmul.f32 %v2738_v61, %v2634_v56  ;;  %v2635_v53 = vmax.f32 %v2617_v7, 0.0  ;;  %3947 = vmatprep.subr.bf16.mxu0 (!%p3228_p1), %v4273_v54 }
 0x261   : > { %v2778_v3 = vadd.f32 %v2777_v15, %v2761_v14  ;;  %v2762_v42 = vmul.f32 %v2743_v25, %v2635_v53 }
 0x262   : > { %3949 = vmatpush3.bf16.msra.mxu0 (!%p3228_p1), %v3264_v63 }
 0x263   : > { %v2779_v29 = vadd.f32 %v2778_v3, %v2762_v42  ;;  %3950 = vmatprep.subr.bf16.mxu0 (!%p3228_p1), %v4273_v54 }
 0x265   : > { %v2780_v41 = vrot.slane %v2779_v29, 4 }
 0x266   : > { %3952 = vmatpush3.bf16.msra.mxu0 (!%p3228_p1), %v3265_v26 }
 0x267   : > { %v2781_v34 = vadd.f32 %v2780_v41, %v2779_v29  ;;  %3953 = vmatprep.subr.bf16.mxu0 (!%p3228_p1), %v4273_v54 }
 0x269   : > { %v2782_v11 = vrot.slane %v2781_v34, 2 }
 0x26a   : > { %3955 = vmatpush3.bf16.msra.mxu0 (!%p3228_p1), %v3266_v27 }
 0x26b   : > { %v2783_v39 = vadd.f32 %v2782_v11, %v2781_v34  ;;  %3956 = vmatprep.subr.bf16.mxu0 (!%p3228_p1), %v4273_v54 }
 0x26d   : > { %v2784_v30 = vrot.slane %v2783_v39, 1  ;;  %2791 = sbr.rel (%p3228_p1) target bundleno = 852 (0x354), region = 52 }
 0x26e   : > { %3958 = vmatpush3.bf16.msra.mxu0 (!%p3228_p1), %v3267_v58 }
 0x26f   : > { %v2785_v13 = vadd.f32 %v2784_v30, %v2783_v39  ;;  %3959 = vmatprep.subr.bf16.mxu0 (!%p3228_p1), %v4273_v54 }
 0x271   : > { %v2786_v23 = vadd.f32 %v2785_v13, %v2636_v33 }
 0x272   : > { %3961 = vmatpush3.bf16.msra.mxu0 (!%p3228_p1), %v3268_v45 }
 0x273   : > { %2787 = vst [vmem:[#allocation2] sm:$0x1] %v2786_v23  ;;  %3962 = vmatprep.subr.bf16.mxu0 (!%p3228_p1), %v4273_v54 }
 0x276   : > { %3964 = vmatpush3.bf16.msra.mxu0 %v3269_v40 }
 0x277   : > { %3965 = vmatprep.subr.bf16.mxu0 %v4273_v54 }
 0x27a   : > { %3967 = vmatpush3.bf16.msra.mxu0 %v3270_v52  ;;  %v2792_v28 = vld [vmem:[#allocation2] sm:$0x1] }
 0x27d   : > { %3942 = vmatmul.mubr.f32.vlgmr.msra.gmra.mrb[0].mxu0 %v2792_v28 }
 0x350   : > { %v2892_v8 = vpop.f32.mrb[0].mxu0 }
 0x351   : > { %v2893_v5 = vadd.f32 %v2892_v8, %v2825_v50  ;;  %v3943_v36 = vpop.f32.mrb[1].mxu0 }
 0x353   : > { %2896 = vst [vmem:[%s4393_s12] sm:$0x1] %v2893_v5 }
 0x354 PF: > { %s3229_s17 = sshll.u32 %s4255_s25, 4  ;;  %s2910_s11 = sshll.u32 %s4393_s12, 4  ;;  %s2911_s11 = int_to_ptr.vmem [resolvable:$true] %s2910_s11 }
 0x355   : > { %s5497_s20 = scalar_lea.hbm %s5553_s6, %s3229_s17  ;;  %s2898_s29 = scalar_lea.sflag [#allocation4], %s264_s14 }
 0x356   : > { %s4173_s30 = scalar_lea.vmem %s2911_s11, 16  ;;  %s4276_s15 = smov [#allocation3]  }
 0x357   : > { %p4174_p2 = scmp.ne.s32.totalorder %s2911_s11, %s4173_s30  ;;  %s4177_s16 = sshll.u32 %s4276_s15, 4  ;;  %s4178_s16 = int_to_ptr.vmem [resolvable:$false] %s4177_s16 }
 0x358   : > { %s4179_s7 = scalar_lea.vmem %s4178_s16, 32  ;;  %p4180_p6 = scmp.lt.s32.totalorder %s2911_s11, %s4178_s16 }
 0x359   : > { %p4175_p4 = pnand %p4174_p2, %p4361_p3  ;;  %p4181_p7 = scmp.lt.s32.totalorder %s4179_s7, %s4173_s30 }
 0x35b   : > { %p4176_p5 = pneg %p4175_p4  ;;  %p4182_p8 = por %p4181_p7, %p4180_p6 }
 0x35d   : > { %p4183_p10 = pnand %p4182_p8, %p4176_p5 }
 0x35f   : > { %4186 = shalt.err (!%p4183_p10)
}
 0x360   : > { %s4187_s25 = scalar_lea.hbm %s5497_s20, 16  ;;  %s4191_s8 = scalar_lea.hbm %s5553_s6, 32 }
 0x361   : > { %p4188_p11 = scmp.ne.s32.totalorder %s5497_s20, %s4187_s25  ;;  %p4192_p0 = scmp.lt.u32.totalorder %s5497_s20, %s5553_s6 }
 0x362   : > { %p4193_p1 = scmp.lt.u32.totalorder %s4191_s8, %s4187_s25  ;;  %p4195_p4 = scmp.lt.u32.totalorder %s4187_s25, %s5497_s20 }
 0x363   : > { %p4189_p12 = pnand %p4188_p11, %p4361_p3 }
 0x364   : > { %p4194_p2 = por %p4193_p1, %p4192_p0 }
 0x365   : > { %p4190_p13 = pneg %p4189_p12 }
 0x366   : > { %p4196_p5 = por %p4195_p4, %p4194_p2 }
 0x368   : > { %p4197_p6 = pnand %p4196_p5, %p4190_p13 }
 0x36a   : > { %4200 = shalt.err (!%p4197_p6)
}
 0x36b   : > { %3986 = dma.vmem_to_hbm [thread:$0]  (%p4361_p3), %s2911_s11, 16, %s5497_s20, %s2898_s29  }
 0x36c PF: > { %p3992_p7 = scmp.ge.s32.totalorder %s4267_s28, 2  ;;  %s2922_s18 = sand.u32 1, %s4239_s21  }
 0x36d   : > { %s2923_s19 = scalar_lea.sflag [#allocation4], %s2922_s18 }
 0x36e   : > { %p3989_p8 = pnand %p3992_p7, %p4371_p9 }
 0x370   : > { %4234 = dma.done.wait (!%p3989_p8), %s2923_s19, 16  }
 0x371   : > { %4236 = vsyncadd (!%p3989_p8), %s2923_s19, 4294967280  ;;  %s19_s28 = sadd.s32 1, %s4267_s28   ;;  %s5559_s9 = sld [smem:[#allocation6_spill]] }
 0x372   : > { %p16_p10 = scmp.ge.s32.totalorder %s19_s28, 6   ;;  %s5560_s20 = sld [smem:[#allocation7_spill]] }
 0x373   : > { %s5561_s21 = smov %s4243_s22  ;;  %s5562_s22 = smov %s4247_s23 }
 0x374   : > { %s5563_s23 = smov %s4379_s13  ;;  %s5564_s24 = smov %s4259_s26 }
 0x375   : > { %s5565_s25 = smov %s4263_s27  ;;  %18 = sbr.rel (!%p16_p10) target bundleno = 5 (0x5), region = 95 }
 0x377   : > { %s5566_s26 = smov %s5559_s9 }
 0x378   : > { %s5567_s27 = smov %s5560_s20 }
 0x37c   :  { %2927 = vsyncpa [#allocation4], 1 }
 0x37d   :  { %2929 = vsyncpa [#allocation4 + $0x1], 1 }

</bundles_post_ra>
